<compile_context>
chip_gen: v7x
topology: tpu7x:2x2x1
jax: 0.10.0
libtpu: 0.0.40
codegen_flags: <defaults>
</compile_context>

<pallas_src>
import functools

import numpy as np
import jax
import jax.numpy as jnp
from jax import lax
from jax.experimental import pallas as pl
from jax.experimental.pallas import tpu as pltpu


# ----------------------------- fused Pallas kernel --------------------------

def _make_fused_dqn_kernel(cfg):
    GP = cfg["GP"]            # padded pooled-map size (multiple of 128 lanes)
    nG = cfg["P"] * cfg["P"]  # number of pooling parity groups (2x2 -> 4)

    def kernel(x_ref, t1_ref, t2_ref, bc2_ref,
               wl1_ref, bl1_ref, wl2_ref, bl2_ref, wl3_ref, bl3_ref,
               o_ref, h1_ref):
        f32 = jnp.float32

        # conv1: ONE matmul against the unrolled conv matrix.  Columns are
        # grouped by pool parity, each group padded to GP (multiple of 128).
        h1_ref[...] = jnp.dot(x_ref[...], t1_ref[...],
                              preferred_element_type=f32)      # (Bt, nG*GP)

        # 2x2 max-pool = elementwise maxima of lane-aligned GP-wide slabs.
        pooled = h1_ref[:, 0:GP]
        for g in range(1, nG):
            pooled = jnp.maximum(pooled, h1_ref[:, g * GP:(g + 1) * GP])

        # conv2: ONE matmul (conv1 bias already folded into bc2).
        feats = jnp.dot(pooled, t2_ref[...],
                        preferred_element_type=f32) + bc2_ref[...]   # (Bt, 64)

        # MLP head: Linear -> ReLU -> Linear -> ReLU -> Linear.
        h = jnp.maximum(jnp.dot(feats, wl1_ref[...],
                                preferred_element_type=f32) + bl1_ref[...], 0.0)
        h = jnp.maximum(jnp.dot(h, wl2_ref[...],
                                preferred_element_type=f32) + bl2_ref[...], 0.0)
        out = jnp.dot(h, wl3_ref[...],
                      preferred_element_type=f32) + bl3_ref[...]

        o_ref[...] = out.astype(o_ref.dtype)                   # (Bt, nA) store

    return kernel


# --------------------- one-time parameter layout preparation ----------------

def prepare_dqn_params(params, state_shape, kernel_size=5, pool_size=2):
    """Hoist ALL weight-layout work (conv unrolling, pool-parity grouping,
    bias folding, linear transposes/permutation) out of the hot path."""
    (wA, bA), (wB, bB) = params["convs"]
    (w1, b1), (w2, b2), (w3, b3) = params["lins"]
    wA, bA, wB, bB = (np.asarray(t) for t in (wA, bA, wB, bB))
    K, P = kernel_size, pool_size

    C1, C0 = int(wA.shape[0]), int(wA.shape[1])
    C2 = int(wB.shape[0])
    H0, W0 = int(state_shape[1]), int(state_shape[2])
    H1, W1 = H0 - K + 1, W0 - K + 1
    Hp, Wp = (H1 - P) // P + 1, (W1 - P) // P + 1
    H2, W2 = Hp - K + 1, Wp - K + 1
    GP = ((Hp * Wp * C1 + 127) // 128) * 128     # pooled map padded to 128 lanes
    nG = P * P

    # --- conv1 unrolled matrix: (H0*W0*C0, nG*GP), columns grouped by pool
    #     parity g=(a,b) so pooling is a max of nG aligned lane slabs. --------
    w1tap = np.transpose(wA, (2, 3, 1, 0))                      # (K,K,C0,C1)
    t1 = np.zeros((H0, W0, C0, nG, GP), np.float32)
    for a in range(P):
        for b_ in range(P):
            g = a * P + b_
            for py in range(Hp):
                for px in range(Wp):
                    y1, x1 = P * py + a, P * px + b_
                    col = (py * Wp + px) * C1
                    t1[y1:y1 + K, x1:x1 + K, :, g, col:col + C1] = w1tap
    t1 = t1.reshape(H0 * W0 * C0, nG * GP)

    # --- conv2 unrolled matrix: (GP, H2*W2*C2), rows = pooled (py,px,c1). ----
    w2tap = np.transpose(wB, (2, 3, 1, 0))                      # (K,K,C1,C2)
    t2 = np.zeros((Hp, Wp, C1, H2 * W2 * C2), np.float32)
    for h2 in range(H2):
        for w2_ in range(W2):
            col = (h2 * W2 + w2_) * C2
            t2[h2:h2 + K, w2_:w2_ + K, :, col:col + C2] = w2tap
    t2 = t2.reshape(Hp * Wp * C1, H2 * W2 * C2)
    t2 = np.pad(t2, ((0, GP - Hp * Wp * C1), (0, 0)))

    # conv1 bias folded exactly through the max-pool into conv2's bias.
    bc2 = bB + np.einsum('oikl,i->o', wB, bA)                   # (C2,)
    bc2 = np.tile(bc2, H2 * W2).reshape(1, H2 * W2 * C2)        # (1, H2*W2*C2)

    # First Linear expects NCHW flatten (c,h,w); kernel produces (h,w,c) order.
    n1 = int(w1.shape[0])
    wl1 = np.asarray(w1).reshape(n1, C2, H2, W2).transpose(0, 2, 3, 1)
    wl1 = wl1.reshape(n1, H2 * W2 * C2).T                        # (H2*W2*C2, n1)

    tensors = (
        t1, t2, bc2,
        wl1, np.asarray(b1).reshape(1, -1),
        np.asarray(w2).T, np.asarray(b2).reshape(1, -1),
        np.asarray(w3).T, np.asarray(b3).reshape(1, -1),
    )
    tensors = tuple(jnp.asarray(t, jnp.float32) for t in tensors)

    cfg = dict(K=K, P=P, C0=C0, C1=C1, C2=C2, H0=H0, W0=W0, H1=H1, W1=W1,
               Hp=Hp, Wp=Wp, H2=H2, W2=W2, GP=GP, n_actions=int(w3.shape[0]))
    return {"cfg": cfg, "tensors": tensors}


# ------------------------------ forward pass ---------------------------------

def dqn_forward(prepped, x, batch_block=32):
    """x: (B, C, H, W) float32 NCHW (PyTorch layout)."""
    cfg, tensors = prepped["cfg"], prepped["tensors"]
    B = int(x.shape[0])
    H0, W0, C0 = cfg["H0"], cfg["W0"], cfg["C0"]
    nA, GP, nG = cfg["n_actions"], cfg["GP"], cfg["P"] * cfg["P"]
    HWC = H0 * W0 * C0

    # channels-last, (h, w, c)-flattened features on the lane axis.
    x2d = jnp.transpose(x, (0, 2, 3, 1)).reshape(B, HWC)

    # Batch tiling: Bt samples per grid step (amortizes per-step overhead and
    # fills MXU sublanes); pad B to a multiple of Bt if needed.
    if B <= batch_block:
        Bt, Bp = B, B
    else:
        Bt = batch_block
        Bp = ((B + Bt - 1) // Bt) * Bt
    if Bp != B:
        x2d = jnp.pad(x2d, ((0, Bp - B), (0, 0)))
    nb = Bp // Bt

    def wspec(t):
        return pl.BlockSpec(tuple(int(s) for s in t.shape), lambda i: (0, 0))

    in_specs = [pl.BlockSpec((Bt, HWC), lambda i: (i, 0))]
    in_specs += [wspec(t) for t in tensors]

    flops = 2 * Bp * (HWC * nG * GP
                      + GP * int(tensors[1].shape[1])
                      + sum(int(t.shape[0]) * int(t.shape[1])
                            for t in (tensors[3], tensors[5], tensors[7])))
    bytes_accessed = int(Bp * HWC * 4 + Bp * nA * 4
                         + sum(int(np.prod(t.shape)) * 4 for t in tensors))

    out = pl.pallas_call(
        _make_fused_dqn_kernel(cfg),
        out_shape=jax.ShapeDtypeStruct((Bp, nA), jnp.float32),
        grid=(nb,),
        in_specs=in_specs,
        out_specs=pl.BlockSpec((Bt, nA), lambda i: (i, 0)),
        scratch_shapes=[pltpu.VMEM((Bt, nG * GP), jnp.float32)],  # conv1 out
        compiler_params=pltpu.CompilerParams(
            dimension_semantics=("parallel",),
            vmem_limit_bytes=32 * 1024 * 1024),
        cost_estimate=pl.CostEstimate(flops=flops, transcendentals=0,
                                      bytes_accessed=bytes_accessed),
    )(x2d, *tensors)
    return out[:B]


# ------------------------- parameter init (torch shapes) ---------------------

def init_dqn_params(key, state_shape, n_actions, n_convs=2, kernel_size=5,
                    pool_size=2, n_out_channels=16, n_lins=3):
    state_shape = np.array(state_shape)
    channels = np.linspace(state_shape[0], n_out_channels,
                           num=n_convs + 1).astype(int)
    params = {"convs": [], "lins": []}
    for i in range(n_convs):
        cin, cout = int(channels[i]), int(channels[i + 1])
        key, k1, k2 = jax.random.split(key, 3)
        fan_in = cin * kernel_size * kernel_size
        bound = 1.0 / np.sqrt(fan_in)
        w = jax.random.uniform(k1, (cout, cin, kernel_size, kernel_size),
                               jnp.float32, -bound, bound)
        b = jax.random.uniform(k2, (cout,), jnp.float32, -bound, bound)
        params["convs"].append((w, b))
        state_shape[1:] = state_shape[1:] - (kernel_size - 1)
        if i < n_convs - 1:
            state_shape[1:] = np.floor((state_shape[1:] - pool_size) / pool_size + 1)
        state_shape[0] = cout
    lin_sizes = np.linspace(np.prod(state_shape), n_actions,
                            num=n_lins + 1).astype(int)
    for i in range(n_lins):
        fin, fout = int(lin_sizes[i]), int(lin_sizes[i + 1])
        key, k1, k2 = jax.random.split(key, 3)
        bound = 1.0 / np.sqrt(fin)
        w = jax.random.uniform(k1, (fout, fin), jnp.float32, -bound, bound)
        b = jax.random.uniform(k2, (fout,), jnp.float32, -bound, bound)
        params["lins"].append((w, b))
    return params


# ------------------------------ pure-JAX reference ---------------------------

def dqn_reference(params, x, pool_size=2):
    h = x
    n_convs = len(params["convs"])
    for i, (w, b) in enumerate(params["convs"]):
        h = lax.conv_general_dilated(h, w, (1, 1), 'VALID',
                                     dimension_numbers=('NCHW', 'OIHW', 'NCHW'))
        h = h + b.reshape(1, -1, 1, 1)
        if i < n_convs - 1:
            h = lax.reduce_window(h, -jnp.inf, lax.max,
                                  (1, 1, pool_size, pool_size),
                                  (1, 1, pool_size, pool_size), 'VALID')
    h = h.reshape(h.shape[0], -1)
    lins = params["lins"]
    for j, (w, b) in enumerate(lins):
        h = h @ w.T + b
        if j < len(lins) - 1:
            h = jnp.maximum(h, 0.0)
    return h


# ---------------------------------- main --------------------------------------

if __name__ == "__main__":
    key = jax.random.PRNGKey(0)
    key, kx = jax.random.split(key)

    state_shape = [4, 16, 16]   # (channels, height, width)
    n_actions = 4
    B = 2

    params = init_dqn_params(key, state_shape, n_actions)
    prepped = prepare_dqn_params(params, state_shape)
    x = jax.random.normal(kx, (B, *state_shape), jnp.float32)

    fwd = jax.jit(functools.partial(dqn_forward, prepped))
    out = jax.block_until_ready(fwd(x))

    ref = dqn_reference(params, x)
    assert out.shape == (B, n_actions), out.shape
    assert np.allclose(np.asarray(out), np.asarray(ref), atol=1e-3, rtol=1e-3), \
        float(np.max(np.abs(np.asarray(out) - np.asarray(ref))))

    print("KERNEL_OK")
</pallas_src>

<mosaic_0001>
module attributes {stable_mosaic.version = 11 : i64} {
  func.func @kernel(%arg0: i32, %arg1: memref<2x1024xf32, #tpu.memory_space<vmem>>, %arg2: memref<1024x1536xf32, #tpu.memory_space<vmem>>, %arg3: memref<384x64xf32, #tpu.memory_space<vmem>>, %arg4: memref<1x64xf32, #tpu.memory_space<vmem>>, %arg5: memref<64x44xf32, #tpu.memory_space<vmem>>, %arg6: memref<1x44xf32, #tpu.memory_space<vmem>>, %arg7: memref<44x24xf32, #tpu.memory_space<vmem>>, %arg8: memref<1x24xf32, #tpu.memory_space<vmem>>, %arg9: memref<24x4xf32, #tpu.memory_space<vmem>>, %arg10: memref<1x4xf32, #tpu.memory_space<vmem>>, %arg11: memref<2x4xf32, #tpu.memory_space<vmem>>, %arg12: memref<2x1536xf32, #tpu.memory_space<vmem>>) attributes {dimension_semantics = [#tpu.dimension_semantics<parallel>], iteration_bounds = array<i64: 1>, scalar_prefetch = 0 : i64, scratch_operands = 1 : i64, tpu.core_type = #tpu.core_type<tc>, window_params = [{transform_indices = @transform_0, window_bounds = array<i64: 2, 1024>}, {pipeline_mode = #tpu.pipeline_mode<synchronous>, transform_indices = @transform_1, window_bounds = array<i64: 1024, 1536>}, {pipeline_mode = #tpu.pipeline_mode<synchronous>, transform_indices = @transform_2, window_bounds = array<i64: 384, 64>}, {pipeline_mode = #tpu.pipeline_mode<synchronous>, transform_indices = @transform_3, window_bounds = array<i64: 1, 64>}, {pipeline_mode = #tpu.pipeline_mode<synchronous>, transform_indices = @transform_4, window_bounds = array<i64: 64, 44>}, {pipeline_mode = #tpu.pipeline_mode<synchronous>, transform_indices = @transform_5, window_bounds = array<i64: 1, 44>}, {pipeline_mode = #tpu.pipeline_mode<synchronous>, transform_indices = @transform_6, window_bounds = array<i64: 44, 24>}, {pipeline_mode = #tpu.pipeline_mode<synchronous>, transform_indices = @transform_7, window_bounds = array<i64: 1, 24>}, {pipeline_mode = #tpu.pipeline_mode<synchronous>, transform_indices = @transform_8, window_bounds = array<i64: 24, 4>}, {pipeline_mode = #tpu.pipeline_mode<synchronous>, transform_indices = @transform_9, window_bounds = array<i64: 1, 4>}, {transform_indices = @transform_10, window_bounds = array<i64: 2, 4>}]} {
    %c0 = arith.constant 0 : index
    %c0_0 = arith.constant 0 : index
    %0 = vector.load %arg1[%c0, %c0_0] : memref<2x1024xf32, #tpu.memory_space<vmem>>, vector<2x1024xf32>
    %c0_1 = arith.constant 0 : index
    %c0_2 = arith.constant 0 : index
    %1 = vector.load %arg2[%c0_1, %c0_2] : memref<1024x1536xf32, #tpu.memory_space<vmem>>, vector<1024x1536xf32>
    %cst = arith.constant dense<0.000000e+00> : vector<2x1536xf32>
    %2 = tpu.matmul %0, %1, %cst {dimension_numbers = #tpu.dot_dimension_numbers<[1], [0], [0], [1], [0, 0, 1, 1], [], []>} : vector<2x1024xf32>, vector<1024x1536xf32>, vector<2x1536xf32> -> vector<2x1536xf32>
    %c0_3 = arith.constant 0 : index
    %c0_4 = arith.constant 0 : index
    %3 = vector.load %arg12[%c0_3, %c0_4] : memref<2x1536xf32, #tpu.memory_space<vmem>>, vector<2x1536xf32>
    tpu.vector_store %arg12[%c0_3, %c0_4], %2 {strides = array<i32>} : memref<2x1536xf32, #tpu.memory_space<vmem>>, vector<2x1536xf32>,
    %c0_5 = arith.constant 0 : index
    %c0_6 = arith.constant 0 : index
    %4 = vector.load %arg12[%c0_5, %c0_6] : memref<2x1536xf32, #tpu.memory_space<vmem>>, vector<2x384xf32>
    %c0_7 = arith.constant 0 : index
    %c384 = arith.constant 384 : index
    %5 = vector.load %arg12[%c0_7, %c384] : memref<2x1536xf32, #tpu.memory_space<vmem>>, vector<2x384xf32>
    %6 = arith.maximumf %4, %5 : vector<2x384xf32>
    %c0_8 = arith.constant 0 : index
    %c768 = arith.constant 768 : index
    %7 = vector.load %arg12[%c0_8, %c768] : memref<2x1536xf32, #tpu.memory_space<vmem>>, vector<2x384xf32>
    %8 = arith.maximumf %6, %7 : vector<2x384xf32>
    %c0_9 = arith.constant 0 : index
    %c1152 = arith.constant 1152 : index
    %9 = vector.load %arg12[%c0_9, %c1152] : memref<2x1536xf32, #tpu.memory_space<vmem>>, vector<2x384xf32>
    %10 = arith.maximumf %8, %9 : vector<2x384xf32>
    %c0_10 = arith.constant 0 : index
    %c0_11 = arith.constant 0 : index
    %11 = vector.load %arg3[%c0_10, %c0_11] : memref<384x64xf32, #tpu.memory_space<vmem>>, vector<384x64xf32>
    %cst_12 = arith.constant dense<0.000000e+00> : vector<2x64xf32>
    %12 = tpu.matmul %10, %11, %cst_12 {dimension_numbers = #tpu.dot_dimension_numbers<[1], [0], [0], [1], [0, 0, 1, 1], [], []>} : vector<2x384xf32>, vector<384x64xf32>, vector<2x64xf32> -> vector<2x64xf32>
    %c0_13 = arith.constant 0 : index
    %c0_14 = arith.constant 0 : index
    %13 = vector.load %arg4[%c0_13, %c0_14] : memref<1x64xf32, #tpu.memory_space<vmem>>, vector<1x64xf32>
    %14 = vector.broadcast %13 : vector<1x64xf32> to vector<2x64xf32>
    %15 = arith.addf %12, %14 : vector<2x64xf32>
    %c0_15 = arith.constant 0 : index
    %c0_16 = arith.constant 0 : index
    %16 = vector.load %arg5[%c0_15, %c0_16] : memref<64x44xf32, #tpu.memory_space<vmem>>, vector<64x44xf32>
    %cst_17 = arith.constant dense<0.000000e+00> : vector<2x44xf32>
    %17 = tpu.matmul %15, %16, %cst_17 {dimension_numbers = #tpu.dot_dimension_numbers<[1], [0], [0], [1], [0, 0, 1, 1], [], []>} : vector<2x64xf32>, vector<64x44xf32>, vector<2x44xf32> -> vector<2x44xf32>
    %c0_18 = arith.constant 0 : index
    %c0_19 = arith.constant 0 : index
    %18 = vector.load %arg6[%c0_18, %c0_19] : memref<1x44xf32, #tpu.memory_space<vmem>>, vector<1x44xf32>
    %19 = vector.broadcast %18 : vector<1x44xf32> to vector<2x44xf32>
    %20 = arith.addf %17, %19 : vector<2x44xf32>
    %cst_20 = arith.constant 0.000000e+00 : f32
    %21 = vector.broadcast %cst_20 : f32 to vector<2x44xf32>
    %22 = arith.maximumf %20, %21 : vector<2x44xf32>
    %c0_21 = arith.constant 0 : index
    %c0_22 = arith.constant 0 : index
    %23 = vector.load %arg7[%c0_21, %c0_22] : memref<44x24xf32, #tpu.memory_space<vmem>>, vector<44x24xf32>
    %cst_23 = arith.constant dense<0.000000e+00> : vector<2x24xf32>
    %24 = tpu.matmul %22, %23, %cst_23 {dimension_numbers = #tpu.dot_dimension_numbers<[1], [0], [0], [1], [0, 0, 1, 1], [], []>} : vector<2x44xf32>, vector<44x24xf32>, vector<2x24xf32> -> vector<2x24xf32>
    %c0_24 = arith.constant 0 : index
    %c0_25 = arith.constant 0 : index
    %25 = vector.load %arg8[%c0_24, %c0_25] : memref<1x24xf32, #tpu.memory_space<vmem>>, vector<1x24xf32>
    %26 = vector.broadcast %25 : vector<1x24xf32> to vector<2x24xf32>
    %27 = arith.addf %24, %26 : vector<2x24xf32>
    %cst_26 = arith.constant 0.000000e+00 : f32
    %28 = vector.broadcast %cst_26 : f32 to vector<2x24xf32>
    %29 = arith.maximumf %27, %28 : vector<2x24xf32>
    %c0_27 = arith.constant 0 : index
    %c0_28 = arith.constant 0 : index
    %30 = vector.load %arg9[%c0_27, %c0_28] : memref<24x4xf32, #tpu.memory_space<vmem>>, vector<24x4xf32>
    %cst_29 = arith.constant dense<0.000000e+00> : vector<2x4xf32>
    %31 = tpu.matmul %29, %30, %cst_29 {dimension_numbers = #tpu.dot_dimension_numbers<[1], [0], [0], [1], [0, 0, 1, 1], [], []>} : vector<2x24xf32>, vector<24x4xf32>, vector<2x4xf32> -> vector<2x4xf32>
    %c0_30 = arith.constant 0 : index
    %c0_31 = arith.constant 0 : index
    %32 = vector.load %arg10[%c0_30, %c0_31] : memref<1x4xf32, #tpu.memory_space<vmem>>, vector<1x4xf32>
    %33 = vector.broadcast %32 : vector<1x4xf32> to vector<2x4xf32>
    %34 = arith.addf %31, %33 : vector<2x4xf32>
    %c0_32 = arith.constant 0 : index
    %c0_33 = arith.constant 0 : index
    %35 = vector.load %arg11[%c0_32, %c0_33] : memref<2x4xf32, #tpu.memory_space<vmem>>, vector<2x4xf32>
    tpu.vector_store %arg11[%c0_32, %c0_33], %34 {strides = array<i32>} : memref<2x4xf32, #tpu.memory_space<vmem>>, vector<2x4xf32>,
    return
  }
  func.func @transform_0(%arg0: i32) -> (i32, i32) {
    %c0_i32 = arith.constant 0 : i32
    %c0_i32_0 = arith.constant 0 : i32
    return %arg0, %c0_i32 : i32, i32
  }
  func.func @transform_1(%arg0: i32) -> (i32, i32) {
    %c0_i32 = arith.constant 0 : i32
    %c0_i32_0 = arith.constant 0 : i32
    %c0_i32_1 = arith.constant 0 : i32
    return %c0_i32, %c0_i32_0 : i32, i32
  }
  func.func @transform_2(%arg0: i32) -> (i32, i32) {
    %c0_i32 = arith.constant 0 : i32
    %c0_i32_0 = arith.constant 0 : i32
    %c0_i32_1 = arith.constant 0 : i32
    return %c0_i32, %c0_i32_0 : i32, i32
  }
  func.func @transform_3(%arg0: i32) -> (i32, i32) {
    %c0_i32 = arith.constant 0 : i32
    %c0_i32_0 = arith.constant 0 : i32
    %c0_i32_1 = arith.constant 0 : i32
    return %c0_i32, %c0_i32_0 : i32, i32
  }
  func.func @transform_4(%arg0: i32) -> (i32, i32) {
    %c0_i32 = arith.constant 0 : i32
    %c0_i32_0 = arith.constant 0 : i32
    %c0_i32_1 = arith.constant 0 : i32
    return %c0_i32, %c0_i32_0 : i32, i32
  }
  func.func @transform_5(%arg0: i32) -> (i32, i32) {
    %c0_i32 = arith.constant 0 : i32
    %c0_i32_0 = arith.constant 0 : i32
    %c0_i32_1 = arith.constant 0 : i32
    return %c0_i32, %c0_i32_0 : i32, i32
  }
  func.func @transform_6(%arg0: i32) -> (i32, i32) {
    %c0_i32 = arith.constant 0 : i32
    %c0_i32_0 = arith.constant 0 : i32
    %c0_i32_1 = arith.constant 0 : i32
    return %c0_i32, %c0_i32_0 : i32, i32
  }
  func.func @transform_7(%arg0: i32) -> (i32, i32) {
    %c0_i32 = arith.constant 0 : i32
    %c0_i32_0 = arith.constant 0 : i32
    %c0_i32_1 = arith.constant 0 : i32
    return %c0_i32, %c0_i32_0 : i32, i32
  }
  func.func @transform_8(%arg0: i32) -> (i32, i32) {
    %c0_i32 = arith.constant 0 : i32
    %c0_i32_0 = arith.constant 0 : i32
    %c0_i32_1 = arith.constant 0 : i32
    return %c0_i32, %c0_i32_0 : i32, i32
  }
  func.func @transform_9(%arg0: i32) -> (i32, i32) {
    %c0_i32 = arith.constant 0 : i32
    %c0_i32_0 = arith.constant 0 : i32
    %c0_i32_1 = arith.constant 0 : i32
    return %c0_i32, %c0_i32_0 : i32, i32
  }
  func.func @transform_10(%arg0: i32) -> (i32, i32) {
    %c0_i32 = arith.constant 0 : i32
    %c0_i32_0 = arith.constant 0 : i32
    return %arg0, %c0_i32 : i32, i32
  }
}

</mosaic_0001>

<bundles_post_ra>
// kernel: dqn_forward.1
= control target key start
LH: loop header
LB: loop body
LE: loop exit
PB: predicated region body
PF: predicated region fallthrough
CT: control target
= control target key end

     0   :  { %15 = vsyncpa [#allocation4], 0  ;;  %s6411_s0 = inlined_call_operand.vmem [shape: f32[2,1024], index: 0, kind: input, shape index: {}]   ;;  %s6412_s1 = inlined_call_operand.hbm [shape: f32[1024,1536], index: 1, kind: input, shape index: {}]   ;;  %s6413_s2 = inlined_call_operand.hbm [shape: f32[384,64], index: 2, kind: input, shape index: {}]   ;;  %s6414_s3 = inlined_call_operand.hbm [shape: f32[1,64], index: 3, kind: input, shape index: {}]   ;;  %s6415_s4 = inlined_call_operand.hbm [shape: f32[64,44], index: 4, kind: input, shape index: {}]   ;;  %s6416_s5 = inlined_call_operand.hbm [shape: f32[1,44], index: 5, kind: input, shape index: {}]   ;;  %s6417_s6 = inlined_call_operand.hbm [shape: f32[44,24], index: 6, kind: input, shape index: {}]   ;;  %s6418_s7 = inlined_call_operand.hbm [shape: f32[1,24], index: 7, kind: input, shape index: {}]   ;;  %s6419_s8 = inlined_call_operand.hbm [shape: f32[24,4], index: 8, kind: input, shape index: {}]   ;;  %s6420_s9 = inlined_call_operand.hbm [shape: f32[1,4], index: 9, kind: input, shape index: {}]   ;;  %s6421_s10 = inlined_call_operand.hbm [shape: f32[2,4], index: 10, kind: output, shape index: {}]  }
   0x1   :  { %16 = vsyncpa [#allocation7], 0 }
   0x2   :  { %17 = vsyncpa [#allocation10], 0 }
   0x3   :  { %18 = vsyncpa [#allocation13], 0 }
   0x4   :  { %19 = vsyncpa [#allocation16], 0 }
   0x5   :  { %20 = vsyncpa [#allocation5], 0  ;;  %s6078_s13 = smov [#allocation6]   ;;  %s5846_s17 = scalar_lea.hbm %s6413_s2, 6144 }
   0x6   :  { %s40_s14 = sshll.u32 %s6078_s13, 4  ;;  %p5847_p0 = scmp.ne.s32.totalorder %s6413_s2, %s5846_s17  ;;  %s41_s14 = int_to_ptr.vmem [resolvable:$true] %s40_s14 }
   0x7   :  { %p5850_p1 = scmp.lt.u32.totalorder %s5846_s17, %s6413_s2 }
   0x9   :  { %p5852_p2 = pnand %p5850_p1, %p5847_p0 }
   0xb   :  { %5855 = shalt.err (!%p5852_p2)
}
   0xc   :  { %s5856_s22 = scalar_lea.vmem %s41_s14, 6144  ;;  %p5861_p4 = scmp.lt.s32.totalorder %s41_s14, %s41_s14 }
   0xd   :  { %p5857_p3 = scmp.ne.s32.totalorder %s41_s14, %s5856_s22  ;;  %p5862_p5 = scmp.lt.s32.totalorder %s5856_s22, %s5856_s22 }
   0xf   :  { %p5863_p6 = por %p5862_p5, %p5861_p4 }
  0x11   :  { %p5864_p7 = pnand %p5863_p6, %p5857_p3 }
  0x13   :  { %5867 = shalt.err (!%p5864_p7)
}
  0x14   :  { %s6079_s23 = smov 128   ;;  %s6080_s24 = smov 8  }
  0x15   :  { %46 = dma.hbm_to_vmem [thread:$0]  %s6413_s2, 6144, %s41_s14, [#allocation7], %s6079_s23, %s6079_s23, %s6080_s24  }
  0x16   :  { %s6081_s27 = smov [#allocation9]   ;;  %s6082_s29 = smov [#allocation12]  }
  0x17   :  { %s62_s28 = sshll.u32 %s6081_s27, 4  ;;  %s84_s30 = sshll.u32 %s6082_s29, 4  ;;  %s63_s28 = int_to_ptr.vmem [resolvable:$true] %s62_s28  ;;  %s85_s30 = int_to_ptr.vmem [resolvable:$true] %s84_s30 }
  0x18   :  { %s5868_s13 = scalar_lea.hbm %s6415_s4, 1024 }
  0x19   :  { %p5869_p8 = scmp.ne.s32.totalorder %s6415_s4, %s5868_s13  ;;  %p5872_p9 = scmp.lt.u32.totalorder %s5868_s13, %s6415_s4 }
  0x1b   :  { %p5874_p10 = pnand %p5872_p9, %p5869_p8 }
  0x1d   :  { %5877 = shalt.err (!%p5874_p10)
}
  0x1e   :  { %s5878_s2 = scalar_lea.vmem %s63_s28, 1024  ;;  %p5883_p12 = scmp.lt.s32.totalorder %s63_s28, %s63_s28 }
  0x1f   :  { %p5879_p11 = scmp.ne.s32.totalorder %s63_s28, %s5878_s2  ;;  %p5884_p13 = scmp.lt.s32.totalorder %s5878_s2, %s5878_s2 }
  0x21   :  { %p5885_p0 = por %p5884_p13, %p5883_p12 }
  0x23   :  { %p5886_p1 = pnand %p5885_p0, %p5879_p11 }
  0x25   :  { %5889 = shalt.err (!%p5886_p1)
}
  0x26   :  { %68 = dma.hbm_to_vmem [thread:$0]  %s6415_s4, 1024, %s63_s28, [#allocation10], %s6079_s23, %s6079_s23, %s6080_s24  }
  0x27   :  { %s5890_s22 = scalar_lea.hbm %s6417_s6, 768 }
  0x28   :  { %p5891_p2 = scmp.ne.s32.totalorder %s6417_s6, %s5890_s22  ;;  %p5894_p3 = scmp.lt.u32.totalorder %s5890_s22, %s6417_s6 }
  0x2a   :  { %p5896_p4 = pnand %p5894_p3, %p5891_p2 }
  0x2c   :  { %5899 = shalt.err (!%p5896_p4)
}
  0x2d   :  { %s5900_s11 = scalar_lea.vmem %s85_s30, 768  ;;  %p5905_p6 = scmp.lt.s32.totalorder %s85_s30, %s85_s30 }
  0x2e   :  { %p5901_p5 = scmp.ne.s32.totalorder %s85_s30, %s5900_s11  ;;  %p5906_p7 = scmp.lt.s32.totalorder %s5900_s11, %s5900_s11 }
  0x30   :  { %p5907_p8 = por %p5906_p7, %p5905_p6 }
  0x32   :  { %p5908_p9 = pnand %p5907_p8, %p5901_p5 }
  0x34   :  { %5911 = shalt.err (!%p5908_p9)
}
  0x35   :  { %90 = dma.hbm_to_vmem [thread:$0]  %s6417_s6, 768, %s85_s30, [#allocation13], %s6079_s23, %s6079_s23, %s6080_s24  }
  0x36   :  { %s6083_s12 = smov [#allocation15]   ;;  %s6084_s15 = smov [#allocation3]  }
  0x37   :  { %s106_s13 = sshll.u32 %s6083_s12, 4  ;;  %s28_s16 = sshll.u32 %s6084_s15, 4  ;;  %s107_s13 = int_to_ptr.vmem [resolvable:$true] %s106_s13  ;;  %s29_s16 = int_to_ptr.vmem [resolvable:$true] %s28_s16 }
  0x38   :  { %s5912_s2 = scalar_lea.hbm %s6419_s8, 384 }
  0x39   :  { %p5913_p10 = scmp.ne.s32.totalorder %s6419_s8, %s5912_s2  ;;  %p5916_p11 = scmp.lt.u32.totalorder %s5912_s2, %s6419_s8 }
  0x3b   :  { %p5918_p12 = pnand %p5916_p11, %p5913_p10 }
  0x3d   :  { %5921 = shalt.err (!%p5918_p12)
}
  0x3e   :  { %s5922_s6 = scalar_lea.vmem %s107_s13, 384  ;;  %p5927_p0 = scmp.lt.s32.totalorder %s107_s13, %s107_s13 }
  0x3f   :  { %p5923_p13 = scmp.ne.s32.totalorder %s107_s13, %s5922_s6  ;;  %p5928_p1 = scmp.lt.s32.totalorder %s5922_s6, %s5922_s6 }
  0x41   :  { %p5929_p2 = por %p5928_p1, %p5927_p0 }
  0x43   :  { %p5930_p3 = pnand %p5929_p2, %p5923_p13 }
  0x45   :  { %5933 = shalt.err (!%p5930_p3)
}
  0x46   :  { %112 = dma.hbm_to_vmem [thread:$0]  %s6419_s8, 384, %s107_s13, [#allocation16], %s6079_s23, %s6079_s23, %s6080_s24  }
  0x47   :  { %s5934_s27 = scalar_lea.hbm %s6412_s1, 196608 }
  0x48   :  { %p5935_p4 = scmp.ne.s32.totalorder %s6412_s1, %s5934_s27  ;;  %p5938_p5 = scmp.lt.u32.totalorder %s5934_s27, %s6412_s1 }
  0x4a   :  { %p5940_p6 = pnand %p5938_p5, %p5935_p4 }
  0x4c   :  { %5943 = shalt.err (!%p5940_p6)
}
  0x4d   :  { %s5944_s12 = scalar_lea.vmem %s29_s16, 196608  ;;  %p5949_p8 = scmp.lt.s32.totalorder %s29_s16, %s29_s16 }
  0x4e   :  { %p5945_p7 = scmp.ne.s32.totalorder %s29_s16, %s5944_s12  ;;  %p5950_p9 = scmp.lt.s32.totalorder %s5944_s12, %s5944_s12 }
  0x50   :  { %p5951_p10 = por %p5950_p9, %p5949_p8 }
  0x52   :  { %p5952_p11 = pnand %p5951_p10, %p5945_p7 }
  0x54   :  { %5955 = shalt.err (!%p5952_p11)
}
  0x55   :  { %s6085_s8 = smov 1536   ;;  %s6086_s23 = smov 96  }
  0x56   :  { %34 = dma.hbm_to_vmem [thread:$0]  %s6412_s1, 196608, %s29_s16, [#allocation4], %s6085_s8, %s6085_s8, %s6086_s23  }
  0x57   :  { %s6087_s15 = smov [#allocation8]   ;;  %s6088_s18 = smov [#allocation11]  }
  0x58   :  { %s53_s17 = sshll.u32 %s6087_s15, 4  ;;  %s75_s2 = sshll.u32 %s6088_s18, 4  ;;  %s54_s17 = int_to_ptr.vmem [resolvable:$true] %s53_s17  ;;  %s76_s2 = int_to_ptr.vmem [resolvable:$true] %s75_s2 }
  0x59   :  { %s5956_s20 = scalar_lea.hbm %s6414_s3, 16 }
  0x5a   :  { %p5957_p12 = scmp.ne.s32.totalorder %s6414_s3, %s5956_s20  ;;  %p5960_p13 = scmp.lt.u32.totalorder %s5956_s20, %s6414_s3 }
  0x5c   :  { %p5962_p0 = pnand %p5960_p13, %p5957_p12 }
  0x5e   :  { %5965 = shalt.err (!%p5962_p0)
}
  0x5f   :  { %s5966_s1 = scalar_lea.vmem %s54_s17, 16  ;;  %s5970_s16 = scalar_lea.vmem %s54_s17, 32 }
  0x60   :  { %p5967_p1 = scmp.ne.s32.totalorder %s54_s17, %s5966_s1  ;;  %p5971_p2 = scmp.lt.s32.totalorder %s54_s17, %s54_s17 }
  0x61   :  { %p5972_p3 = scmp.lt.s32.totalorder %s5970_s16, %s5966_s1 }
  0x63   :  { %p5973_p4 = por %p5972_p3, %p5971_p2 }
  0x65   :  { %p5974_p5 = pnand %p5973_p4, %p5967_p1 }
  0x67   :  { %5977 = shalt.err (!%p5974_p5)
}
  0x68   :  { %56 = dma.hbm_to_vmem [thread:$0]  %s6414_s3, 16, %s54_s17, [#allocation7]  }
  0x69   :  { %s5978_s11 = scalar_lea.hbm %s6416_s5, 16 }
  0x6a   :  { %p5979_p6 = scmp.ne.s32.totalorder %s6416_s5, %s5978_s11  ;;  %p5982_p7 = scmp.lt.u32.totalorder %s5978_s11, %s6416_s5 }
  0x6c   :  { %p5984_p8 = pnand %p5982_p7, %p5979_p6 }
  0x6e   :  { %5987 = shalt.err (!%p5984_p8)
}
  0x6f   :  { %s5988_s23 = scalar_lea.vmem %s76_s2, 16  ;;  %s5992_s24 = scalar_lea.vmem %s76_s2, 32 }
  0x70   :  { %p5989_p9 = scmp.ne.s32.totalorder %s76_s2, %s5988_s23  ;;  %p5993_p10 = scmp.lt.s32.totalorder %s76_s2, %s76_s2 }
  0x71   :  { %p5994_p11 = scmp.lt.s32.totalorder %s5992_s24, %s5988_s23 }
  0x73   :  { %p5995_p12 = por %p5994_p11, %p5993_p10 }
  0x75   :  { %p5996_p13 = pnand %p5995_p12, %p5989_p9 }
  0x77   :  { %5999 = shalt.err (!%p5996_p13)
}
  0x78   :  { %78 = dma.hbm_to_vmem [thread:$0]  %s6416_s5, 16, %s76_s2, [#allocation10]  }
  0x79   :  { %s6089_s15 = smov [#allocation14]   ;;  %s6090_s18 = smov [#allocation17]  }
  0x7a   :  { %s97_s17 = sshll.u32 %s6089_s15, 4  ;;  %s119_s14 = sshll.u32 %s6090_s18, 4  ;;  %s98_s17 = int_to_ptr.vmem [resolvable:$true] %s97_s17  ;;  %s120_s14 = int_to_ptr.vmem [resolvable:$true] %s119_s14 }
  0x7b   :  { %s6000_s21 = scalar_lea.hbm %s6418_s7, 16 }
  0x7c   :  { %p6001_p0 = scmp.ne.s32.totalorder %s6418_s7, %s6000_s21  ;;  %p6004_p1 = scmp.lt.u32.totalorder %s6000_s21, %s6418_s7 }
  0x7e   :  { %p6006_p2 = pnand %p6004_p1, %p6001_p0 }
  0x80   :  { %6009 = shalt.err (!%p6006_p2)
}
  0x81   :  { %s6010_s5 = scalar_lea.vmem %s98_s17, 16  ;;  %s6014_s2 = scalar_lea.vmem %s98_s17, 32 }
  0x82   :  { %p6011_p3 = scmp.ne.s32.totalorder %s98_s17, %s6010_s5  ;;  %p6015_p4 = scmp.lt.s32.totalorder %s98_s17, %s98_s17 }
  0x83   :  { %p6016_p5 = scmp.lt.s32.totalorder %s6014_s2, %s6010_s5 }
  0x85   :  { %p6017_p6 = por %p6016_p5, %p6015_p4 }
  0x87   :  { %p6018_p7 = pnand %p6017_p6, %p6011_p3 }
  0x89   :  { %6021 = shalt.err (!%p6018_p7)
}
  0x8a   :  { %100 = dma.hbm_to_vmem [thread:$0]  %s6418_s7, 16, %s98_s17, [#allocation13]  }
  0x8b   :  { %s6022_s29 = scalar_lea.hbm %s6420_s9, 16 }
  0x8c   :  { %p6023_p8 = scmp.ne.s32.totalorder %s6420_s9, %s6022_s29  ;;  %p6026_p9 = scmp.lt.u32.totalorder %s6022_s29, %s6420_s9 }
  0x8e   :  { %p6028_p10 = pnand %p6026_p9, %p6023_p8 }
  0x90   :  { %6031 = shalt.err (!%p6028_p10)
}
  0x91   :  { %s6032_s8 = scalar_lea.vmem %s120_s14, 16  ;;  %s6036_s23 = scalar_lea.vmem %s120_s14, 32 }
  0x92   :  { %p6033_p11 = scmp.ne.s32.totalorder %s120_s14, %s6032_s8  ;;  %p6037_p12 = scmp.lt.s32.totalorder %s120_s14, %s120_s14 }
  0x93   :  { %p6038_p13 = scmp.lt.s32.totalorder %s6036_s23, %s6032_s8 }
  0x95   :  { %p6039_p0 = por %p6038_p13, %p6037_p12 }
  0x97   :  { %p6040_p1 = pnand %p6039_p0, %p6033_p11 }
  0x99   :  { %6043 = shalt.err (!%p6040_p1)
}
  0x9a   :  { %122 = dma.hbm_to_vmem [thread:$0]  %s6420_s9, 16, %s120_s14, [#allocation16]  }
  0x9b   :  { %6066 = dma.done.wait [#allocation4], 196608  }
  0x9c   :  { %6067 = vsyncadd [#allocation4], 4294770688 }
  0x9d   :  { %6068 = dma.done.wait [#allocation7], 6160  }
  0x9e   :  { %6069 = vsyncadd [#allocation7], 4294961136 }
  0x9f   :  { %6070 = dma.done.wait [#allocation10], 1040  }
  0xa0   :  { %6071 = vsyncadd [#allocation10], 4294966256 }
  0xa1   :  { %6072 = dma.done.wait [#allocation13], 784  }
  0xa2   :  { %6073 = vsyncadd [#allocation13], 4294966512 }
  0xa3   :  { %6074 = dma.done.wait [#allocation16], 400  }
  0xa4   :  { %6075 = vsyncadd [#allocation16], 4294966896  ;;  %v153_v0 = vld [vmem:[#allocation3 + $0x8] sm:$0xff]  ;;  %v155_v2 = vld [vmem:[#allocation3 + $0x18] sm:$0xff]  ;;  %vm6093_vm0 = vmmov 0   ;;  %vm3742_vm1 = vcmask 523264  }
  0xa5   :  { %v165_v1 = vld [vmem:[#allocation3 + $0x68] sm:$0xff]  ;;  %v167_v4 = vld [vmem:[#allocation3 + $0x78] sm:$0xff]  ;;  %v152_v5 = vld [vmem:[#allocation3] sm:$0xff]  ;;  %vm3834_vm2 = vcmask 1043456   ;;  %vm6095_vm3 = vmmov 1   ;;  %vm3830_vm5 = vcmask 359424  }
  0xa6   :  { %v4172_v3 = vpack.c.bf16 %v165_v1, %v153_v0  ;;  %v164_v6 = vld [vmem:[#allocation3 + $0x60] sm:$0xff]  ;;  %v4428_v7 = vpack.c.bf16 %v167_v4, %v155_v2  ;;  %v154_v9 = vld [vmem:[#allocation3 + $0x10] sm:$0xff]  ;;  %v177_v11 = vld [vmem:[#allocation3 + $0xc8] sm:$0xff]  ;;  %vm3919_vm6 = vcmask 195584   ;;  %vm3993_vm7 = vcmask 25600  }
  0xa7   :  { %v4174_v8 = vpack.c.bf16 %v164_v6, %v152_v5  ;;  %v166_v10 = vld [vmem:[#allocation3 + $0x70] sm:$0xff]  ;;  %v189_v13 = vld [vmem:[#allocation3 + $0x128] sm:$0xff]  ;;  %v179_v14 = vld [vmem:[#allocation3 + $0xd8] sm:$0xff] }
  0xa8   :  { %4173 = vmatprep.subr.bf16.mxu0 %v4172_v3  ;;  %v4430_v12 = vpack.c.bf16 %v166_v10, %v154_v9  ;;  %v191_v15 = vld [vmem:[#allocation3 + $0x138] sm:$0xff]  ;;  %4429 = vmatprep.subr.bf16.mxu1 %v4428_v7  ;;  %v4176_v16 = vpack.c.bf16 %v189_v13, %v177_v11  ;;  %v176_v18 = vld [vmem:[#allocation3 + $0xc0] sm:$0xff]  ;;  %v178_v20 = vld [vmem:[#allocation3 + $0xd0] sm:$0xff] }
  0xa9   :  { %4175 = vmatpush1.bf16.msra.mxu0 %v4174_v8  ;;  %v4432_v17 = vpack.c.bf16 %v191_v15, %v179_v14  ;;  %v188_v19 = vld [vmem:[#allocation3 + $0x120] sm:$0xff]  ;;  %v190_v22 = vld [vmem:[#allocation3 + $0x130] sm:$0xff]  ;;  %v201_v23 = vld [vmem:[#allocation3 + $0x188] sm:$0xff] }
  0xaa   :  { %4431 = vmatpush1.bf16.msra.mxu1 %v4430_v12  ;;  %v4178_v21 = vpack.c.bf16 %v188_v19, %v176_v18  ;;  %v213_v24 = vld [vmem:[#allocation3 + $0x1e8] sm:$0xff]  ;;  %4177 = vmatprep.subr.bf16.mxu0 %v4176_v16  ;;  %v4434_v25 = vpack.c.bf16 %v190_v22, %v178_v20  ;;  %v203_v27 = vld [vmem:[#allocation3 + $0x198] sm:$0xff]  ;;  %v200_v29 = vld [vmem:[#allocation3 + $0x180] sm:$0xff] }
  0xab   :  { %4433 = vmatprep.subr.bf16.mxu1 %v4432_v17  ;;  %v4180_v26 = vpack.c.bf16 %v213_v24, %v201_v23  ;;  %v215_v28 = vld [vmem:[#allocation3 + $0x1f8] sm:$0xff]  ;;  %v212_v31 = vld [vmem:[#allocation3 + $0x1e0] sm:$0xff]  ;;  %v202_v32 = vld [vmem:[#allocation3 + $0x190] sm:$0xff] }
  0xac   :  { %v4436_v30 = vpack.c.bf16 %v215_v28, %v203_v27  ;;  %v214_v33 = vld [vmem:[#allocation3 + $0x1f0] sm:$0xff]  ;;  %v4182_v34 = vpack.c.bf16 %v212_v31, %v200_v29  ;;  %v225_v35 = vld [vmem:[#allocation3 + $0x248] sm:$0xff]  ;;  %v227_v37 = vld [vmem:[#allocation3 + $0x258] sm:$0xff] }
  0xad   :  { %4179 = vmatpush1.bf16.msra.mxu0 %v4178_v21  ;;  %v237_v36 = vld [vmem:[#allocation3 + $0x2a8] sm:$0xff]  ;;  %v4438_v38 = vpack.c.bf16 %v214_v33, %v202_v32  ;;  %v239_v40 = vld [vmem:[#allocation3 + $0x2b8] sm:$0xff]  ;;  %v224_v41 = vld [vmem:[#allocation3 + $0x240] sm:$0xff] }
  0xae   :  { %4435 = vmatpush1.bf16.msra.mxu1 %v4434_v25  ;;  %4181 = vmatprep.subr.bf16.mxu0 %v4180_v26  ;;  %v4184_v39 = vpack.c.bf16 %v237_v36, %v225_v35  ;;  %v236_v42 = vld [vmem:[#allocation3 + $0x2a0] sm:$0xff]  ;;  %v4440_v43 = vpack.c.bf16 %v239_v40, %v227_v37  ;;  %v226_v44 = vld [vmem:[#allocation3 + $0x250] sm:$0xff]  ;;  %v249_v46 = vld [vmem:[#allocation3 + $0x308] sm:$0xff] }
  0xaf   :  { %4437 = vmatprep.subr.bf16.mxu1 %v4436_v30  ;;  %v238_v45 = vld [vmem:[#allocation3 + $0x2b0] sm:$0xff]  ;;  %v261_v47 = vld [vmem:[#allocation3 + $0x368] sm:$0xff]  ;;  %v251_v48 = vld [vmem:[#allocation3 + $0x318] sm:$0xff]  ;;  %v4186_v50 = vpack.c.bf16 %v236_v42, %v224_v41 }
  0xb0   :  { %v263_v49 = vld [vmem:[#allocation3 + $0x378] sm:$0xff]  ;;  %v4442_v51 = vpack.c.bf16 %v238_v45, %v226_v44  ;;  %v4188_v52 = vpack.c.bf16 %v261_v47, %v249_v46  ;;  %v248_v53 = vld [vmem:[#allocation3 + $0x300] sm:$0xff]  ;;  %v250_v55 = vld [vmem:[#allocation3 + $0x310] sm:$0xff]  ;;  %v6091_v46 = vmov 1983009808  }
  0xb1   :  { %4183 = vmatpush1.bf16.msra.mxu0 %v4182_v34  ;;  %v260_v54 = vld [vmem:[#allocation3 + $0x360] sm:$0xff]  ;;  %v4444_v56 = vpack.c.bf16 %v263_v49, %v251_v48  ;;  %v262_v57 = vld [vmem:[#allocation3 + $0x370] sm:$0xff]  ;;  %v273_v58 = vld [vmem:[#allocation3 + $0x3c8] sm:$0xff]  ;;  %v1692_v47 = vunpack.c.l.s4 %v6091_v46  ;;  %v1694_v48 = vlaneseq }
  0xb2   :  { %4439 = vmatpush1.bf16.msra.mxu1 %v4438_v38  ;;  %4185 = vmatprep.subr.bf16.mxu0 %v4184_v39  ;;  %v285_v59 = vld [vmem:[#allocation3 + $0x428] sm:$0xff]  ;;  %v275_v60 = vld [vmem:[#allocation3 + $0x3d8] sm:$0xff]  ;;  %v4190_v62 = vpack.c.bf16 %v260_v54, %v248_v53  ;;  %v4446_v63 = vpack.c.bf16 %v262_v57, %v250_v55  ;;  %v272_v1 = vld [vmem:[#allocation3 + $0x3c0] sm:$0xff] }
  0xb3   :  { %4441 = vmatprep.subr.bf16.mxu1 %v4440_v43  ;;  %v287_v61 = vld [vmem:[#allocation3 + $0x438] sm:$0xff]  ;;  %v4192_v0 = vpack.c.bf16 %v285_v59, %v273_v58  ;;  %v284_v2 = vld [vmem:[#allocation3 + $0x420] sm:$0xff]  ;;  %v274_v3 = vld [vmem:[#allocation3 + $0x3d0] sm:$0xff] }
  0xb4   :  { %v4448_v4 = vpack.c.bf16 %v287_v61, %v275_v60  ;;  %v286_v5 = vld [vmem:[#allocation3 + $0x430] sm:$0xff]  ;;  %v297_v6 = vld [vmem:[#allocation3 + $0x488] sm:$0xff]  ;;  %v299_v8 = vld [vmem:[#allocation3 + $0x498] sm:$0xff]  ;;  %v4194_v10 = vpack.c.bf16 %v284_v2, %v272_v1  ;;  %v1693_v61 = vunpack.c.0.s8 %v1692_v47 }
  0xb5   :  { %4187 = vmatpush1.bf16.msra.mxu0 %v4186_v50  ;;  %v309_v7 = vld [vmem:[#allocation3 + $0x4e8] sm:$0xff]  ;;  %v311_v9 = vld [vmem:[#allocation3 + $0x4f8] sm:$0xff]  ;;  %v4450_v11 = vpack.c.bf16 %v286_v5, %v274_v3  ;;  %v296_v13 = vld [vmem:[#allocation3 + $0x480] sm:$0xff] }
  0xb6   :  { %4443 = vmatpush1.bf16.msra.mxu1 %v4442_v51  ;;  %4189 = vmatprep.subr.bf16.mxu0 %v4188_v52  ;;  %v4196_v12 = vpack.c.bf16 %v309_v7, %v297_v6  ;;  %v308_v14 = vld [vmem:[#allocation3 + $0x4e0] sm:$0xff]  ;;  %v298_v15 = vld [vmem:[#allocation3 + $0x490] sm:$0xff]  ;;  %v4452_v16 = vpack.c.bf16 %v311_v9, %v299_v8  ;;  %v321_v18 = vld [vmem:[#allocation3 + $0x548] sm:$0xff] }
  0xb7   :  { %4445 = vmatprep.subr.bf16.mxu1 %v4444_v56  ;;  %v310_v17 = vld [vmem:[#allocation3 + $0x4f0] sm:$0xff]  ;;  %v333_v19 = vld [vmem:[#allocation3 + $0x5a8] sm:$0xff]  ;;  %v323_v20 = vld [vmem:[#allocation3 + $0x558] sm:$0xff]  ;;  %v4198_v22 = vpack.c.bf16 %v308_v14, %v296_v13 }
  0xb8   :  { %v335_v21 = vld [vmem:[#allocation3 + $0x5b8] sm:$0xff]  ;;  %v4454_v23 = vpack.c.bf16 %v310_v17, %v298_v15  ;;  %v4200_v24 = vpack.c.bf16 %v333_v19, %v321_v18  ;;  %v320_v25 = vld [vmem:[#allocation3 + $0x540] sm:$0xff]  ;;  %v322_v27 = vld [vmem:[#allocation3 + $0x550] sm:$0xff] }
  0xb9   :  { %4191 = vmatpush1.bf16.msra.mxu0 %v4190_v62  ;;  %v332_v26 = vld [vmem:[#allocation3 + $0x5a0] sm:$0xff]  ;;  %v4456_v28 = vpack.c.bf16 %v335_v21, %v323_v20  ;;  %v334_v29 = vld [vmem:[#allocation3 + $0x5b0] sm:$0xff]  ;;  %v345_v30 = vld [vmem:[#allocation3 + $0x608] sm:$0xff]  ;;  %v1695_v62 = vshrl.u32 %v1694_v48, 7 }
  0xba   :  { %4447 = vmatpush1.bf16.msra.mxu1 %v4446_v63  ;;  %4193 = vmatprep.subr.bf16.mxu0 %v4192_v0  ;;  %v357_v31 = vld [vmem:[#allocation3 + $0x668] sm:$0xff]  ;;  %v347_v32 = vld [vmem:[#allocation3 + $0x618] sm:$0xff]  ;;  %v4202_v34 = vpack.c.bf16 %v332_v26, %v320_v25  ;;  %v4458_v35 = vpack.c.bf16 %v334_v29, %v322_v27  ;;  %v344_v37 = vld [vmem:[#allocation3 + $0x600] sm:$0xff] }
  0xbb   :  { %4449 = vmatprep.subr.bf16.mxu1 %v4448_v4  ;;  %v359_v33 = vld [vmem:[#allocation3 + $0x678] sm:$0xff]  ;;  %v4204_v36 = vpack.c.bf16 %v357_v31, %v345_v30  ;;  %v356_v38 = vld [vmem:[#allocation3 + $0x660] sm:$0xff]  ;;  %v346_v39 = vld [vmem:[#allocation3 + $0x610] sm:$0xff] }
  0xbc   :  { %v4460_v40 = vpack.c.bf16 %v359_v33, %v347_v32  ;;  %v358_v41 = vld [vmem:[#allocation3 + $0x670] sm:$0xff]  ;;  %v369_v42 = vld [vmem:[#allocation3 + $0x6c8] sm:$0xff]  ;;  %v371_v44 = vld [vmem:[#allocation3 + $0x6d8] sm:$0xff]  ;;  %v4206_v49 = vpack.c.bf16 %v356_v38, %v344_v37 }
  0xbd   :  { %4195 = vmatpush1.bf16.msra.mxu0 %v4194_v10  ;;  %v381_v43 = vld [vmem:[#allocation3 + $0x728] sm:$0xff]  ;;  %v383_v45 = vld [vmem:[#allocation3 + $0x738] sm:$0xff]  ;;  %v4462_v50 = vpack.c.bf16 %v358_v41, %v346_v39  ;;  %v368_v52 = vld [vmem:[#allocation3 + $0x6c0] sm:$0xff] }
  0xbe   :  { %4451 = vmatpush1.bf16.msra.mxu1 %v4450_v11  ;;  %4197 = vmatprep.subr.bf16.mxu0 %v4196_v12  ;;  %v4208_v51 = vpack.c.bf16 %v381_v43, %v369_v42  ;;  %v380_v53 = vld [vmem:[#allocation3 + $0x720] sm:$0xff]  ;;  %v370_v54 = vld [vmem:[#allocation3 + $0x6d0] sm:$0xff]  ;;  %v4464_v55 = vpack.c.bf16 %v383_v45, %v371_v44  ;;  %v393_v57 = vld [vmem:[#allocation3 + $0x788] sm:$0xff]  ;;  %v6272_v11 = vsub.s32 %v1693_v61, %v1695_v62 }
  0xbf   :  { %4453 = vmatprep.subr.bf16.mxu1 %v4452_v16  ;;  %v382_v56 = vld [vmem:[#allocation3 + $0x730] sm:$0xff]  ;;  %v405_v58 = vld [vmem:[#allocation3 + $0x7e8] sm:$0xff]  ;;  %v395_v59 = vld [vmem:[#allocation3 + $0x798] sm:$0xff]  ;;  %v4210_v63 = vpack.c.bf16 %v380_v53, %v368_v52 }
  0xc0   :  { %v407_v60 = vld [vmem:[#allocation3 + $0x7f8] sm:$0xff]  ;;  %v4466_v0 = vpack.c.bf16 %v382_v56, %v370_v54  ;;  %v4212_v1 = vpack.c.bf16 %v405_v58, %v393_v57  ;;  %v392_v2 = vld [vmem:[#allocation3 + $0x780] sm:$0xff]  ;;  %v394_v4 = vld [vmem:[#allocation3 + $0x790] sm:$0xff] }
  0xc1   :  { %4199 = vmatpush1.bf16.msra.mxu0 %v4198_v22  ;;  %v404_v3 = vld [vmem:[#allocation3 + $0x7e0] sm:$0xff]  ;;  %v4468_v5 = vpack.c.bf16 %v407_v60, %v395_v59  ;;  %v406_v6 = vld [vmem:[#allocation3 + $0x7f0] sm:$0xff]  ;;  %v417_v7 = vld [vmem:[#allocation3 + $0x848] sm:$0xff] }
  0xc2   :  { %4455 = vmatpush1.bf16.msra.mxu1 %v4454_v23  ;;  %4201 = vmatprep.subr.bf16.mxu0 %v4200_v24  ;;  %v429_v8 = vld [vmem:[#allocation3 + $0x8a8] sm:$0xff]  ;;  %v419_v9 = vld [vmem:[#allocation3 + $0x858] sm:$0xff]  ;;  %v4214_v12 = vpack.c.bf16 %v404_v3, %v392_v2  ;;  %v416_v13 = vld [vmem:[#allocation3 + $0x840] sm:$0xff]  ;;  %v4470_v14 = vpack.c.bf16 %v406_v6, %v394_v4 }
  0xc3   :  { %4457 = vmatprep.subr.bf16.mxu1 %v4456_v28  ;;  %v431_v10 = vld [vmem:[#allocation3 + $0x8b8] sm:$0xff]  ;;  %v4216_v15 = vpack.c.bf16 %v429_v8, %v417_v7  ;;  %v428_v16 = vld [vmem:[#allocation3 + $0x8a0] sm:$0xff]  ;;  %v418_v17 = vld [vmem:[#allocation3 + $0x850] sm:$0xff] }
  0xc4   :  { %v430_v18 = vld [vmem:[#allocation3 + $0x8b0] sm:$0xff]  ;;  %v4472_v19 = vpack.c.bf16 %v431_v10, %v419_v9  ;;  %v441_v20 = vld [vmem:[#allocation3 + $0x908] sm:$0xff]  ;;  %v443_v23 = vld [vmem:[#allocation3 + $0x918] sm:$0xff]  ;;  %v4218_v26 = vpack.c.bf16 %v428_v16, %v416_v13 }
  0xc5   :  { %4203 = vmatpush1.bf16.msra.mxu0 %v4202_v34  ;;  %v453_v21 = vld [vmem:[#allocation3 + $0x968] sm:$0xff]  ;;  %v455_v24 = vld [vmem:[#allocation3 + $0x978] sm:$0xff]  ;;  %v4474_v27 = vpack.c.bf16 %v430_v18, %v418_v17  ;;  %v440_v29 = vld [vmem:[#allocation3 + $0x900] sm:$0xff] }
  0xc6   :  { %4459 = vmatpush1.bf16.msra.mxu1 %v4458_v35  ;;  %4205 = vmatprep.subr.bf16.mxu0 %v4204_v36  ;;  %v6277_v22 = vld [vmem:[%s6411_s0] sm:$0xff]  ;;  %v4220_v28 = vpack.c.bf16 %v453_v21, %v441_v20  ;;  %v452_v30 = vld [vmem:[#allocation3 + $0x960] sm:$0xff]  ;;  %v442_v31 = vld [vmem:[#allocation3 + $0x910] sm:$0xff]  ;;  %v4476_v33 = vpack.c.bf16 %v455_v24, %v443_v23 }
  0xc7   :  { %4461 = vmatprep.subr.bf16.mxu1 %v4460_v40  ;;  %v6281_v25 = vrot.slane %v6277_v22, %v6272_v11  ;;  %v454_v34 = vld [vmem:[#allocation3 + $0x970] sm:$0xff]  ;;  %v465_v35 = vld [vmem:[#allocation3 + $0x9c8] sm:$0xff]  ;;  %v467_v37 = vld [vmem:[#allocation3 + $0x9d8] sm:$0xff]  ;;  %v4222_v39 = vpack.c.bf16 %v452_v30, %v440_v29  ;;  %v1690_v9 = vcombine.high %v6277_v22, %v6277_v22 }
  0xc8   :  { %v477_v36 = vld [vmem:[#allocation3 + $0xa28] sm:$0xff]  ;;  %v479_v38 = vld [vmem:[#allocation3 + $0xa38] sm:$0xff]  ;;  %v4478_v40 = vpack.c.bf16 %v454_v34, %v442_v31  ;;  %v464_v42 = vld [vmem:[#allocation3 + $0x9c0] sm:$0xff] }
  0xc9   :  { %4207 = vmatpush1.bf16.msra.mxu0 %v4206_v49  ;;  %v6285_v32 = vcombine.high %v6281_v25, %v6281_v25  ;;  %v4224_v41 = vpack.c.bf16 %v477_v36, %v465_v35  ;;  %v476_v43 = vld [vmem:[#allocation3 + $0xa20] sm:$0xff]  ;;  %v466_v44 = vld [vmem:[#allocation3 + $0x9d0] sm:$0xff]  ;;  %v4480_v45 = vpack.c.bf16 %v479_v38, %v467_v37  ;;  %v489_v47 = vld [vmem:[#allocation3 + $0xa88] sm:$0xff]  ;;  %v6292_v24 = vrot.slane %v1690_v9, %v6272_v11 }
  0xca   :  { %4463 = vmatpush1.bf16.msra.mxu1 %v4462_v50  ;;  %4209 = vmatprep.subr.bf16.mxu0 %v4208_v51  ;;  %v478_v46 = vld [vmem:[#allocation3 + $0xa30] sm:$0xff]  ;;  %v501_v48 = vld [vmem:[#allocation3 + $0xae8] sm:$0xff]  ;;  %v491_v49 = vld [vmem:[#allocation3 + $0xa98] sm:$0xff]  ;;  %v4226_v51 = vpack.c.bf16 %v476_v43, %v464_v42 }
  0xcb   :  { %4465 = vmatprep.subr.bf16.mxu1 %v4464_v55  ;;  %1796 = vmatprep.mubr.f32.mxu0 %v6285_v32  ;;  %v503_v50 = vld [vmem:[#allocation3 + $0xaf8] sm:$0xff]  ;;  %v4482_v52 = vpack.c.bf16 %v478_v46, %v466_v44  ;;  %v4228_v53 = vpack.c.bf16 %v501_v48, %v489_v47  ;;  %v488_v54 = vld [vmem:[#allocation3 + $0xa80] sm:$0xff]  ;;  %v490_v56 = vld [vmem:[#allocation3 + $0xa90] sm:$0xff]  ;;  %v6296_v38 = vcombine.high %v6292_v24, %v6292_v24 }
  0xcc   :  { %2080 = vmatprep.mubr.f32.mxu1 %v6285_v32  ;;  %v500_v55 = vld [vmem:[#allocation3 + $0xae0] sm:$0xff]  ;;  %v4484_v57 = vpack.c.bf16 %v503_v50, %v491_v49  ;;  %v502_v58 = vld [vmem:[#allocation3 + $0xaf0] sm:$0xff]  ;;  %v513_v59 = vld [vmem:[#allocation3 + $0xb48] sm:$0xff] }
  0xcd   :  { %4211 = vmatpush1.bf16.msra.mxu0 %v4210_v63  ;;  %v525_v60 = vld [vmem:[#allocation3 + $0xba8] sm:$0xff]  ;;  %v515_v61 = vld [vmem:[#allocation3 + $0xb58] sm:$0xff]  ;;  %v4230_v63 = vpack.c.bf16 %v500_v55, %v488_v54  ;;  %v512_v2 = vld [vmem:[#allocation3 + $0xb40] sm:$0xff] }
  0xce   :  { %4467 = vmatpush1.bf16.msra.mxu1 %v4466_v0  ;;  %4213 = vmatprep.subr.bf16.mxu0 %v4212_v1  ;;  %v527_v62 = vld [vmem:[#allocation3 + $0xbb8] sm:$0xff]  ;;  %v4486_v0 = vpack.c.bf16 %v502_v58, %v490_v56  ;;  %v4232_v1 = vpack.c.bf16 %v525_v60, %v513_v59  ;;  %v524_v3 = vld [vmem:[#allocation3 + $0xba0] sm:$0xff]  ;;  %v514_v4 = vld [vmem:[#allocation3 + $0xb50] sm:$0xff] }
  0xcf   :  { %4469 = vmatprep.subr.bf16.mxu1 %v4468_v5  ;;  %v4488_v5 = vpack.c.bf16 %v527_v62, %v515_v61  ;;  %v526_v6 = vld [vmem:[#allocation3 + $0xbb0] sm:$0xff]  ;;  %v537_v7 = vld [vmem:[#allocation3 + $0xc08] sm:$0xff]  ;;  %v539_v10 = vld [vmem:[#allocation3 + $0xc18] sm:$0xff]  ;;  %v4234_v13 = vpack.c.bf16 %v524_v3, %v512_v2 }
  0xd0   :  { %v549_v8 = vld [vmem:[#allocation3 + $0xc68] sm:$0xff]  ;;  %v536_v16 = vld [vmem:[#allocation3 + $0xc00] sm:$0xff]  ;;  %v538_v18 = vld [vmem:[#allocation3 + $0xc10] sm:$0xff] }
  0xd1   :  { %4215 = vmatpush1.bf16.msra.mxu0 %v4214_v12  ;;  %v551_v12 = vld [vmem:[#allocation3 + $0xc78] sm:$0xff]  ;;  %v548_v17 = vld [vmem:[#allocation3 + $0xc60] sm:$0xff]  ;;  %v550_v20 = vld [vmem:[#allocation3 + $0xc70] sm:$0xff] }
  0xd2   :  { %4471 = vmatpush1.bf16.msra.mxu1 %v4470_v14  ;;  %4217 = vmatprep.subr.bf16.mxu0 %v4216_v15  ;;  %v4490_v14 = vpack.c.bf16 %v526_v6, %v514_v4  ;;  %v4236_v15 = vpack.c.bf16 %v549_v8, %v537_v7  ;;  %v561_v21 = vld [vmem:[#allocation3 + $0xcc8] sm:$0xff]  ;;  %v563_v22 = vld [vmem:[#allocation3 + $0xcd8] sm:$0xff]  ;;  %v560_v30 = vld [vmem:[#allocation3 + $0xcc0] sm:$0xff] }
  0xd3   :  { %4473 = vmatprep.subr.bf16.mxu1 %v4472_v19  ;;  %v4492_v19 = vpack.c.bf16 %v551_v12, %v539_v10  ;;  %v573_v23 = vld [vmem:[#allocation3 + $0xd28] sm:$0xff]  ;;  %v572_v31 = vld [vmem:[#allocation3 + $0xd20] sm:$0xff]  ;;  %v574_v35 = vld [vmem:[#allocation3 + $0xd30] sm:$0xff] }
  0xd4   :  { %v4240_v29 = vpack.c.bf16 %v573_v23, %v561_v21  ;;  %v585_v36 = vld [vmem:[#allocation3 + $0xd88] sm:$0xff]  ;;  %v584_v44 = vld [vmem:[#allocation3 + $0xd80] sm:$0xff]  ;;  %v586_v46 = vld [vmem:[#allocation3 + $0xd90] sm:$0xff] }
  0xd5   :  { %4219 = vmatpush1.bf16.msra.mxu0 %v4218_v26  ;;  %v575_v26 = vld [vmem:[#allocation3 + $0xd38] sm:$0xff]  ;;  %v597_v37 = vld [vmem:[#allocation3 + $0xde8] sm:$0xff]  ;;  %v598_v48 = vld [vmem:[#allocation3 + $0xdf0] sm:$0xff] }
  0xd6   :  { %4475 = vmatpush1.bf16.msra.mxu1 %v4474_v27  ;;  %4221 = vmatprep.subr.bf16.mxu0 %v4220_v28  ;;  %v4238_v27 = vpack.c.bf16 %v548_v17, %v536_v16  ;;  %v4494_v28 = vpack.c.bf16 %v550_v20, %v538_v18  ;;  %v4496_v34 = vpack.c.bf16 %v575_v26, %v563_v22  ;;  %v609_v49 = vld [vmem:[#allocation3 + $0xe48] sm:$0xff]  ;;  %v608_v56 = vld [vmem:[#allocation3 + $0xe40] sm:$0xff]  ;;  %v610_v58 = vld [vmem:[#allocation3 + $0xe50] sm:$0xff] }
  0xd7   :  { %4477 = vmatprep.subr.bf16.mxu1 %v4476_v33  ;;  %v562_v33 = vld [vmem:[#allocation3 + $0xcd0] sm:$0xff]  ;;  %v4244_v43 = vpack.c.bf16 %v597_v37, %v585_v36  ;;  %v621_v50 = vld [vmem:[#allocation3 + $0xea8] sm:$0xff]  ;;  %v4502_v54 = vpack.c.bf16 %v598_v48, %v586_v46  ;;  %v632_v4 = vld [vmem:[#allocation3 + $0xf00] sm:$0xff] }
  0xd8   :  { %v4498_v42 = vpack.c.bf16 %v574_v35, %v562_v33  ;;  %v4248_v55 = vpack.c.bf16 %v621_v50, %v609_v49  ;;  %v622_v60 = vld [vmem:[#allocation3 + $0xeb0] sm:$0xff]  ;;  %v633_v61 = vld [vmem:[#allocation3 + $0xf08] sm:$0xff]  ;;  %v659_v12 = vld [vmem:[#allocation3 + $0xfd8] sm:$0xff] }
  0xd9   :  { %4223 = vmatpush1.bf16.msra.mxu0 %v4222_v39  ;;  %v587_v39 = vld [vmem:[#allocation3 + $0xd98] sm:$0xff]  ;;  %v645_v62 = vld [vmem:[#allocation3 + $0xf68] sm:$0xff]  ;;  %v4506_v2 = vpack.c.bf16 %v622_v60, %v610_v58  ;;  %v634_v6 = vld [vmem:[#allocation3 + $0xf10] sm:$0xff] }
  0xda   :  { %4479 = vmatpush1.bf16.msra.mxu1 %v4478_v40  ;;  %4225 = vmatprep.subr.bf16.mxu0 %v4224_v41  ;;  %v599_v40 = vld [vmem:[#allocation3 + $0xdf8] sm:$0xff]  ;;  %v4242_v41 = vpack.c.bf16 %v572_v31, %v560_v30  ;;  %v4252_v3 = vpack.c.bf16 %v645_v62, %v633_v61  ;;  %v646_v8 = vld [vmem:[#allocation3 + $0xf70] sm:$0xff]  ;;  %v657_v9 = vld [vmem:[#allocation3 + $0xfc8] sm:$0xff] }
  0xdb   :  { %4481 = vmatprep.subr.bf16.mxu1 %v4480_v45  ;;  %v596_v45 = vld [vmem:[#allocation3 + $0xde0] sm:$0xff]  ;;  %v4500_v47 = vpack.c.bf16 %v599_v40, %v587_v39  ;;  %v669_v10 = vld [vmem:[#allocation3 + $0x1028] sm:$0xff]  ;;  %v670_v21 = vld [vmem:[#allocation3 + $0x1030] sm:$0xff] }
  0xdc   :  { %v4256_v16 = vpack.c.bf16 %v669_v10, %v657_v9  ;;  %v656_v17 = vld [vmem:[#allocation3 + $0xfc0] sm:$0xff]  ;;  %v681_v23 = vld [vmem:[#allocation3 + $0x1088] sm:$0xff]  ;;  %v683_v26 = vld [vmem:[#allocation3 + $0x1098] sm:$0xff] }
  0xdd   :  { %4227 = vmatpush1.bf16.msra.mxu0 %v4226_v51  ;;  %v611_v51 = vld [vmem:[#allocation3 + $0xe58] sm:$0xff]  ;;  %v668_v18 = vld [vmem:[#allocation3 + $0x1020] sm:$0xff]  ;;  %v693_v22 = vld [vmem:[#allocation3 + $0x10e8] sm:$0xff] }
  0xde   :  { %4483 = vmatpush1.bf16.msra.mxu1 %v4482_v52  ;;  %4229 = vmatprep.subr.bf16.mxu0 %v4228_v53  ;;  %v623_v52 = vld [vmem:[#allocation3 + $0xeb8] sm:$0xff]  ;;  %v4246_v53 = vpack.c.bf16 %v596_v45, %v584_v44  ;;  %v4260_v30 = vpack.c.bf16 %v693_v22, %v681_v23  ;;  %v680_v31 = vld [vmem:[#allocation3 + $0x1080] sm:$0xff]  ;;  %v694_v36 = vld [vmem:[#allocation3 + $0x10f0] sm:$0xff] }
  0xdf   :  { %4485 = vmatprep.subr.bf16.mxu1 %v4484_v57  ;;  %v620_v57 = vld [vmem:[#allocation3 + $0xea0] sm:$0xff]  ;;  %v4504_v59 = vpack.c.bf16 %v623_v52, %v611_v51  ;;  %v705_v37 = vld [vmem:[#allocation3 + $0x1148] sm:$0xff]  ;;  %v707_v40 = vld [vmem:[#allocation3 + $0x1158] sm:$0xff] }
  0xe0   :  { %v692_v33 = vld [vmem:[#allocation3 + $0x10e0] sm:$0xff]  ;;  %v717_v39 = vld [vmem:[#allocation3 + $0x11a8] sm:$0xff]  ;;  %v718_v49 = vld [vmem:[#allocation3 + $0x11b0] sm:$0xff] }
  0xe1   :  { %4231 = vmatpush1.bf16.msra.mxu0 %v4230_v63  ;;  %v635_v63 = vld [vmem:[#allocation3 + $0xf18] sm:$0xff]  ;;  %v4264_v44 = vpack.c.bf16 %v717_v39, %v705_v37  ;;  %v704_v45 = vld [vmem:[#allocation3 + $0x1140] sm:$0xff]  ;;  %v729_v50 = vld [vmem:[#allocation3 + $0x1208] sm:$0xff] }
  0xe2   :  { %4487 = vmatpush1.bf16.msra.mxu1 %v4486_v0  ;;  %4233 = vmatprep.subr.bf16.mxu0 %v4232_v1  ;;  %v647_v0 = vld [vmem:[#allocation3 + $0xf78] sm:$0xff]  ;;  %v4250_v1 = vpack.c.bf16 %v620_v57, %v608_v56  ;;  %v716_v46 = vld [vmem:[#allocation3 + $0x11a0] sm:$0xff]  ;;  %v741_v51 = vld [vmem:[#allocation3 + $0x1268] sm:$0xff] }
  0xe3   :  { %4489 = vmatprep.subr.bf16.mxu1 %v4488_v5  ;;  %v644_v5 = vld [vmem:[#allocation3 + $0xf60] sm:$0xff]  ;;  %v4508_v7 = vpack.c.bf16 %v647_v0, %v635_v63  ;;  %v731_v52 = vld [vmem:[#allocation3 + $0x1218] sm:$0xff]  ;;  %v4268_v56 = vpack.c.bf16 %v741_v51, %v729_v50  ;;  %v742_v61 = vld [vmem:[#allocation3 + $0x1270] sm:$0xff] }
  0xe4   :  { %v728_v57 = vld [vmem:[#allocation3 + $0x1200] sm:$0xff]  ;;  %v753_v62 = vld [vmem:[#allocation3 + $0x12c8] sm:$0xff]  ;;  %v755_v0 = vld [vmem:[#allocation3 + $0x12d8] sm:$0xff] }
  0xe5   :  { %4235 = vmatpush1.bf16.msra.mxu0 %v4234_v13  ;;  %v671_v13 = vld [vmem:[#allocation3 + $0x1038] sm:$0xff]  ;;  %v740_v58 = vld [vmem:[#allocation3 + $0x1260] sm:$0xff]  ;;  %v765_v63 = vld [vmem:[#allocation3 + $0x1328] sm:$0xff] }
  0xe6   :  { %4491 = vmatpush1.bf16.msra.mxu1 %v4490_v14  ;;  %4237 = vmatprep.subr.bf16.mxu0 %v4236_v15  ;;  %v4254_v14 = vpack.c.bf16 %v644_v5, %v632_v4  ;;  %v4510_v15 = vpack.c.bf16 %v646_v8, %v634_v6  ;;  %v4512_v20 = vpack.c.bf16 %v671_v13, %v659_v12  ;;  %v752_v5 = vld [vmem:[#allocation3 + $0x12c0] sm:$0xff]  ;;  %v766_v9 = vld [vmem:[#allocation3 + $0x1330] sm:$0xff]  ;;  %v777_v10 = vld [vmem:[#allocation3 + $0x1388] sm:$0xff] }
  0xe7   :  { %4493 = vmatprep.subr.bf16.mxu1 %v4492_v19  ;;  %v658_v19 = vld [vmem:[#allocation3 + $0xfd0] sm:$0xff]  ;;  %v4272_v4 = vpack.c.bf16 %v765_v63, %v753_v62  ;;  %v764_v6 = vld [vmem:[#allocation3 + $0x1320] sm:$0xff]  ;;  %v789_v12 = vld [vmem:[#allocation3 + $0x13e8] sm:$0xff] }
  0xe8   :  { %1797 = vmatmul.mubr.f32.vlgmr.msra.gmra.mrb[0].mxu0 %v6281_v25  ;;  %v779_v13 = vld [vmem:[#allocation3 + $0x1398] sm:$0xff]  ;;  %v790_v23 = vld [vmem:[#allocation3 + $0x13f0] sm:$0xff]  ;;  %v801_v22 = vld [vmem:[#allocation3 + $0x1448] sm:$0xff] }
  0xe9   :  { %4239 = vmatpush1.bf16.msra.mxu0 %v4238_v27  ;;  %2081 = vmatmul.mubr.f32.vlgmr.msra.gmra.mrb[0].mxu1 %v6281_v25  ;;  %v695_v27 = vld [vmem:[#allocation3 + $0x10f8] sm:$0xff]  ;;  %v814_v37 = vld [vmem:[#allocation3 + $0x14b0] sm:$0xff]  ;;  %v825_v39 = vld [vmem:[#allocation3 + $0x1508] sm:$0xff] }
  0xea   :  { %4495 = vmatpush1.bf16.msra.mxu1 %v4494_v28  ;;  %4241 = vmatprep.subr.bf16.mxu0 %v4240_v29  ;;  %v4258_v28 = vpack.c.bf16 %v668_v18, %v656_v17  ;;  %v4514_v29 = vpack.c.bf16 %v670_v21, %v658_v19  ;;  %v4516_v35 = vpack.c.bf16 %v695_v27, %v683_v26  ;;  %v776_v18 = vld [vmem:[#allocation3 + $0x1380] sm:$0xff]  ;;  %v813_v26 = vld [vmem:[#allocation3 + $0x14a8] sm:$0xff]  ;;  %v803_v27 = vld [vmem:[#allocation3 + $0x1458] sm:$0xff] }
  0xeb   :  { %4497 = vmatprep.subr.bf16.mxu1 %v4496_v34  ;;  %1867 = vmatprep.mubr.f32.mxu0 %v6296_v38  ;;  %v682_v34 = vld [vmem:[#allocation3 + $0x1090] sm:$0xff]  ;;  %v4276_v17 = vpack.c.bf16 %v789_v12, %v777_v10  ;;  %v788_v19 = vld [vmem:[#allocation3 + $0x13e0] sm:$0xff]  ;;  %v849_v51 = vld [vmem:[#allocation3 + $0x15c8] sm:$0xff] }
  0xec   :  { %2151 = vmatprep.mubr.f32.mxu1 %v6296_v38  ;;  %v838_v50 = vld [vmem:[#allocation3 + $0x1570] sm:$0xff]  ;;  %v873_v63 = vld [vmem:[#allocation3 + $0x1688] sm:$0xff]  ;;  %vm5784_vm4 = vmpackc.low %vm3834_vm2, %vm6095_vm3 }
  0xed   :  { %4243 = vmatpush1.bf16.msra.mxu0 %v4242_v41  ;;  %v719_v41 = vld [vmem:[#allocation3 + $0x11b8] sm:$0xff]  ;;  %v862_v62 = vld [vmem:[#allocation3 + $0x1630] sm:$0xff]  ;;  %v897_v12 = vld [vmem:[#allocation3 + $0x1748] sm:$0xff] }
  0xee   :  { %4499 = vmatpush1.bf16.msra.mxu1 %v4498_v42  ;;  %4245 = vmatprep.subr.bf16.mxu0 %v4244_v43  ;;  %v4262_v42 = vpack.c.bf16 %v692_v33, %v680_v31  ;;  %v4518_v43 = vpack.c.bf16 %v694_v36, %v682_v34  ;;  %v4520_v48 = vpack.c.bf16 %v719_v41, %v707_v40  ;;  %v800_v33 = vld [vmem:[#allocation3 + $0x1440] sm:$0xff]  ;;  %v837_v40 = vld [vmem:[#allocation3 + $0x1568] sm:$0xff]  ;;  %v827_v41 = vld [vmem:[#allocation3 + $0x1518] sm:$0xff] }
  0xef   :  { %4501 = vmatprep.subr.bf16.mxu1 %v4500_v47  ;;  %v706_v47 = vld [vmem:[#allocation3 + $0x1150] sm:$0xff]  ;;  %v4280_v31 = vpack.c.bf16 %v813_v26, %v801_v22  ;;  %v812_v34 = vld [vmem:[#allocation3 + $0x14a0] sm:$0xff]  ;;  %v921_v26 = vld [vmem:[#allocation3 + $0x1808] sm:$0xff] }
  0xf0   :  { %v886_v10 = vld [vmem:[#allocation3 + $0x16f0] sm:$0xff] }
  0xf1   :  { %4247 = vmatpush1.bf16.msra.mxu0 %v4246_v53  ;;  %v743_v53 = vld [vmem:[#allocation3 + $0x1278] sm:$0xff]  ;;  %v910_v22 = vld [vmem:[#allocation3 + $0x17b0] sm:$0xff] }
  0xf2   :  { %4503 = vmatpush1.bf16.msra.mxu1 %v4502_v54  ;;  %4249 = vmatprep.subr.bf16.mxu0 %v4248_v55  ;;  %v4266_v54 = vpack.c.bf16 %v716_v46, %v704_v45  ;;  %v4522_v55 = vpack.c.bf16 %v718_v49, %v706_v47  ;;  %v4524_v60 = vpack.c.bf16 %v743_v53, %v731_v52  ;;  %v824_v46 = vld [vmem:[#allocation3 + $0x1500] sm:$0xff]  ;;  %v861_v52 = vld [vmem:[#allocation3 + $0x1628] sm:$0xff]  ;;  %v851_v53 = vld [vmem:[#allocation3 + $0x15d8] sm:$0xff] }
  0xf3   :  { %4505 = vmatprep.subr.bf16.mxu1 %v4504_v59  ;;  %v730_v59 = vld [vmem:[#allocation3 + $0x1210] sm:$0xff]  ;;  %v4284_v45 = vpack.c.bf16 %v837_v40, %v825_v39  ;;  %v836_v47 = vld [vmem:[#allocation3 + $0x1560] sm:$0xff]  ;;  %v945_v40 = vld [vmem:[#allocation3 + $0x18c8] sm:$0xff] }
  0xf4   :  { %v934_v39 = vld [vmem:[#allocation3 + $0x1870] sm:$0xff] }
  0xf5   :  { %4251 = vmatpush1.bf16.msra.mxu0 %v4250_v1  ;;  %v767_v1 = vld [vmem:[#allocation3 + $0x1338] sm:$0xff] }
  0xf6   :  { %4507 = vmatpush1.bf16.msra.mxu1 %v4506_v2  ;;  %4253 = vmatprep.subr.bf16.mxu0 %v4252_v3  ;;  %v4270_v2 = vpack.c.bf16 %v740_v58, %v728_v57  ;;  %v4526_v3 = vpack.c.bf16 %v742_v61, %v730_v59  ;;  %v4528_v8 = vpack.c.bf16 %v767_v1, %v755_v0  ;;  %v848_v58 = vld [vmem:[#allocation3 + $0x15c0] sm:$0xff]  ;;  %v885_v0 = vld [vmem:[#allocation3 + $0x16e8] sm:$0xff]  ;;  %v875_v1 = vld [vmem:[#allocation3 + $0x1698] sm:$0xff] }
  0xf7   :  { %4509 = vmatprep.subr.bf16.mxu1 %v4508_v7  ;;  %v754_v7 = vld [vmem:[#allocation3 + $0x12d0] sm:$0xff]  ;;  %v4288_v57 = vpack.c.bf16 %v861_v52, %v849_v51  ;;  %v860_v59 = vld [vmem:[#allocation3 + $0x1620] sm:$0xff] }
  0xf9   :  { %4255 = vmatpush1.bf16.msra.mxu0 %v4254_v14  ;;  %v791_v14 = vld [vmem:[#allocation3 + $0x13f8] sm:$0xff] }
  0xfa   :  { %4511 = vmatpush1.bf16.msra.mxu1 %v4510_v15  ;;  %4257 = vmatprep.subr.bf16.mxu0 %v4256_v16  ;;  %v4274_v15 = vpack.c.bf16 %v764_v6, %v752_v5  ;;  %v4530_v16 = vpack.c.bf16 %v766_v9, %v754_v7  ;;  %v4532_v21 = vpack.c.bf16 %v791_v14, %v779_v13  ;;  %v872_v6 = vld [vmem:[#allocation3 + $0x1680] sm:$0xff]  ;;  %v909_v13 = vld [vmem:[#allocation3 + $0x17a8] sm:$0xff]  ;;  %v899_v14 = vld [vmem:[#allocation3 + $0x1758] sm:$0xff] }
  0xfb   :  { %4513 = vmatprep.subr.bf16.mxu1 %v4512_v20  ;;  %v778_v20 = vld [vmem:[#allocation3 + $0x1390] sm:$0xff]  ;;  %v4292_v5 = vpack.c.bf16 %v885_v0, %v873_v63  ;;  %v884_v7 = vld [vmem:[#allocation3 + $0x16e0] sm:$0xff] }
  0xfc   :  { %v980_v63 = vld [vmem:[#allocation3 + $0x19e0] sm:$0xff]  ;;  %v970_v0 = vld [vmem:[#allocation3 + $0x1990] sm:$0xff] }
  0xfd   :  { %4259 = vmatpush1.bf16.msra.mxu0 %v4258_v28  ;;  %v815_v28 = vld [vmem:[#allocation3 + $0x14b8] sm:$0xff] }
  0xfe   :  { %4515 = vmatpush1.bf16.msra.mxu1 %v4514_v29  ;;  %4261 = vmatprep.subr.bf16.mxu0 %v4260_v30  ;;  %v4278_v29 = vpack.c.bf16 %v788_v19, %v776_v18  ;;  %v4534_v30 = vpack.c.bf16 %v790_v23, %v778_v20  ;;  %v4536_v36 = vpack.c.bf16 %v815_v28, %v803_v27  ;;  %v896_v19 = vld [vmem:[#allocation3 + $0x1740] sm:$0xff]  ;;  %v933_v27 = vld [vmem:[#allocation3 + $0x1868] sm:$0xff]  ;;  %v923_v28 = vld [vmem:[#allocation3 + $0x1818] sm:$0xff] }
  0xff   :  { %4517 = vmatprep.subr.bf16.mxu1 %v4516_v35  ;;  %v802_v35 = vld [vmem:[#allocation3 + $0x1450] sm:$0xff]  ;;  %v4296_v18 = vpack.c.bf16 %v909_v13, %v897_v12  ;;  %v908_v20 = vld [vmem:[#allocation3 + $0x17a0] sm:$0xff] }
 0x100   :  { %v1004_v12 = vld [vmem:[#allocation3 + $0x1aa0] sm:$0xff]  ;;  %v994_v13 = vld [vmem:[#allocation3 + $0x1a50] sm:$0xff] }
 0x101   :  { %4263 = vmatpush1.bf16.msra.mxu0 %v4262_v42  ;;  %v839_v42 = vld [vmem:[#allocation3 + $0x1578] sm:$0xff] }
 0x102   :  { %4519 = vmatpush1.bf16.msra.mxu1 %v4518_v43  ;;  %4265 = vmatprep.subr.bf16.mxu0 %v4264_v44  ;;  %v4282_v43 = vpack.c.bf16 %v812_v34, %v800_v33  ;;  %v4538_v44 = vpack.c.bf16 %v814_v37, %v802_v35  ;;  %v4540_v49 = vpack.c.bf16 %v839_v42, %v827_v41  ;;  %v920_v34 = vld [vmem:[#allocation3 + $0x1800] sm:$0xff]  ;;  %v957_v41 = vld [vmem:[#allocation3 + $0x1928] sm:$0xff]  ;;  %v947_v42 = vld [vmem:[#allocation3 + $0x18d8] sm:$0xff] }
 0x103   :  { %4521 = vmatprep.subr.bf16.mxu1 %v4520_v48  ;;  %v826_v48 = vld [vmem:[#allocation3 + $0x1510] sm:$0xff]  ;;  %v4300_v33 = vpack.c.bf16 %v933_v27, %v921_v26  ;;  %v932_v35 = vld [vmem:[#allocation3 + $0x1860] sm:$0xff] }
 0x104   :  { %v1028_v26 = vld [vmem:[#allocation3 + $0x1b60] sm:$0xff]  ;;  %v1018_v27 = vld [vmem:[#allocation3 + $0x1b10] sm:$0xff] }
 0x105   :  { %4267 = vmatpush1.bf16.msra.mxu0 %v4266_v54  ;;  %v863_v54 = vld [vmem:[#allocation3 + $0x1638] sm:$0xff] }
 0x106   :  { %4523 = vmatpush1.bf16.msra.mxu1 %v4522_v55  ;;  %4269 = vmatprep.subr.bf16.mxu0 %v4268_v56  ;;  %v4286_v55 = vpack.c.bf16 %v836_v47, %v824_v46  ;;  %v4542_v56 = vpack.c.bf16 %v838_v50, %v826_v48  ;;  %v4544_v61 = vpack.c.bf16 %v863_v54, %v851_v53  ;;  %v944_v48 = vld [vmem:[#allocation3 + $0x18c0] sm:$0xff]  ;;  %v946_v50 = vld [vmem:[#allocation3 + $0x18d0] sm:$0xff]  ;;  %v969_v54 = vld [vmem:[#allocation3 + $0x1988] sm:$0xff] }
 0x107   :  { %4525 = vmatprep.subr.bf16.mxu1 %v4524_v60  ;;  %v850_v60 = vld [vmem:[#allocation3 + $0x15d0] sm:$0xff]  ;;  %v4304_v47 = vpack.c.bf16 %v957_v41, %v945_v40  ;;  %v1052_v40 = vld [vmem:[#allocation3 + $0x1c20] sm:$0xff] }
 0x108   :  { %v958_v53 = vld [vmem:[#allocation3 + $0x1930] sm:$0xff] }
 0x109   :  { %4271 = vmatpush1.bf16.msra.mxu0 %v4270_v2  ;;  %v887_v2 = vld [vmem:[#allocation3 + $0x16f8] sm:$0xff]  ;;  %v1042_v41 = vld [vmem:[#allocation3 + $0x1bd0] sm:$0xff] }
 0x10a   :  { %4527 = vmatpush1.bf16.msra.mxu1 %v4526_v3  ;;  %4273 = vmatprep.subr.bf16.mxu0 %v4272_v4  ;;  %v4290_v3 = vpack.c.bf16 %v860_v59, %v848_v58  ;;  %v4546_v4 = vpack.c.bf16 %v862_v62, %v850_v60  ;;  %v4548_v9 = vpack.c.bf16 %v887_v2, %v875_v1  ;;  %v968_v62 = vld [vmem:[#allocation3 + $0x1980] sm:$0xff]  ;;  %v982_v2 = vld [vmem:[#allocation3 + $0x19f0] sm:$0xff] }
 0x10b   :  { %4529 = vmatprep.subr.bf16.mxu1 %v4528_v8  ;;  %v874_v8 = vld [vmem:[#allocation3 + $0x1690] sm:$0xff]  ;;  %v4562_v60 = vpack.c.bf16 %v958_v53, %v946_v50  ;;  %v1064_v53 = vld [vmem:[#allocation3 + $0x1c80] sm:$0xff] }
 0x10d   :  { %4275 = vmatpush1.bf16.msra.mxu0 %v4274_v15  ;;  %v911_v15 = vld [vmem:[#allocation3 + $0x17b8] sm:$0xff] }
 0x10e   :  { %4531 = vmatpush1.bf16.msra.mxu1 %v4530_v16  ;;  %4277 = vmatprep.subr.bf16.mxu0 %v4276_v17  ;;  %v4294_v16 = vpack.c.bf16 %v884_v7, %v872_v6  ;;  %v4550_v17 = vpack.c.bf16 %v886_v10, %v874_v8  ;;  %v4552_v23 = vpack.c.bf16 %v911_v15, %v899_v14  ;;  %v1007_v6 = vld [vmem:[#allocation3 + $0x1ab8] sm:$0xff]  ;;  %v992_v10 = vld [vmem:[#allocation3 + $0x1a40] sm:$0xff]  ;;  %v1006_v15 = vld [vmem:[#allocation3 + $0x1ab0] sm:$0xff] }
 0x10f   :  { %4533 = vmatprep.subr.bf16.mxu1 %v4532_v21  ;;  %v898_v21 = vld [vmem:[#allocation3 + $0x1750] sm:$0xff]  ;;  %v4310_v7 = vpack.c.bf16 %v980_v63, %v968_v62  ;;  %v4566_v8 = vpack.c.bf16 %v982_v2, %v970_v0  ;;  %v1103_v62 = vld [vmem:[#allocation3 + $0x1db8] sm:$0xff]  ;;  %v1088_v2 = vld [vmem:[#allocation3 + $0x1d40] sm:$0xff] }
 0x111   :  { %4279 = vmatpush1.bf16.msra.mxu0 %v4278_v29  ;;  %v935_v29 = vld [vmem:[#allocation3 + $0x1878] sm:$0xff] }
 0x112   :  { %4535 = vmatpush1.bf16.msra.mxu1 %v4534_v30  ;;  %4281 = vmatprep.subr.bf16.mxu0 %v4280_v31  ;;  %v4298_v30 = vpack.c.bf16 %v908_v20, %v896_v19  ;;  %v4554_v31 = vpack.c.bf16 %v910_v22, %v898_v21  ;;  %v4556_v37 = vpack.c.bf16 %v935_v29, %v923_v28  ;;  %v1031_v19 = vld [vmem:[#allocation3 + $0x1b78] sm:$0xff]  ;;  %v1016_v22 = vld [vmem:[#allocation3 + $0x1b00] sm:$0xff]  ;;  %v1030_v29 = vld [vmem:[#allocation3 + $0x1b70] sm:$0xff] }
 0x113   :  { %4537 = vmatprep.subr.bf16.mxu1 %v4536_v36  ;;  %v922_v36 = vld [vmem:[#allocation3 + $0x1810] sm:$0xff]  ;;  %v4314_v20 = vpack.c.bf16 %v1004_v12, %v992_v10  ;;  %v4570_v21 = vpack.c.bf16 %v1006_v15, %v994_v13  ;;  %v1127_v10 = vld [vmem:[#allocation3 + $0x1e78] sm:$0xff]  ;;  %v1112_v15 = vld [vmem:[#allocation3 + $0x1e00] sm:$0xff] }
 0x114   :  { %v4558_v46 = vpack.c.bf16 %v934_v39, %v922_v36  ;;  %v4574_v36 = vpack.c.bf16 %v1030_v29, %v1018_v27  ;;  %v1040_v39 = vld [vmem:[#allocation3 + $0x1bc0] sm:$0xff] }
 0x115   :  { %4283 = vmatpush1.bf16.msra.mxu0 %v4282_v43  ;;  %v959_v43 = vld [vmem:[#allocation3 + $0x1938] sm:$0xff]  ;;  %v1136_v29 = vld [vmem:[#allocation3 + $0x1ec0] sm:$0xff] }
 0x116   :  { %4539 = vmatpush1.bf16.msra.mxu1 %v4538_v44  ;;  %4285 = vmatprep.subr.bf16.mxu0 %v4284_v45  ;;  %v4302_v44 = vpack.c.bf16 %v932_v35, %v920_v34  ;;  %v6305_v45 = vld [vmem:[%s6411_s0 + $0x8] sm:$0xff]  ;;  %v4560_v52 = vpack.c.bf16 %v959_v43, %v947_v42  ;;  %v1055_v34 = vld [vmem:[#allocation3 + $0x1c38] sm:$0xff]  ;;  %v4318_v35 = vpack.c.bf16 %v1028_v26, %v1016_v22  ;;  %s6096_s0 = smov [#allocation18]  }
 0x117   :  { %4541 = vmatprep.subr.bf16.mxu1 %v4540_v49  ;;  %v956_v49 = vld [vmem:[#allocation3 + $0x1920] sm:$0xff]  ;;  %v6309_v51 = vrot.slane %v6305_v45, %v6272_v11  ;;  %v1054_v43 = vld [vmem:[#allocation3 + $0x1c30] sm:$0xff]  ;;  %v1151_v22 = vld [vmem:[#allocation3 + $0x1f38] sm:$0xff]  ;;  %s4001_s17 = sshll.u32 %s6096_s0, 4  ;;  %s4002_s17 = int_to_ptr.vmem [resolvable:$true] %s4001_s17 }
 0x118   :  { %v4306_v59 = vpack.c.bf16 %v956_v49, %v944_v48  ;;  %v1079_v48 = vld [vmem:[#allocation3 + $0x1cf8] sm:$0xff]  ;;  %v4322_v49 = vpack.c.bf16 %v1052_v40, %v1040_v39  ;;  %v4578_v50 = vpack.c.bf16 %v1054_v43, %v1042_v41  ;;  %v1160_v43 = vld [vmem:[#allocation3 + $0x1f80] sm:$0xff]  ;;  %s6044_s18 = scalar_lea.vmem %s4002_s17, 32  ;;  %p6049_p3 = scmp.lt.s32.totalorder %s4002_s17, %s4002_s17 }
 0x119   :  { %4287 = vmatpush1.bf16.msra.mxu0 %v4286_v55  ;;  %v981_v55 = vld [vmem:[#allocation3 + $0x19e8] sm:$0xff]  ;;  %v6314_v58 = vcombine.high %v6309_v51, %v6309_v51  ;;  %v1175_v39 = vld [vmem:[#allocation3 + $0x1ff8] sm:$0xff]  ;;  %p6045_p2 = scmp.ne.s32.totalorder %s4002_s17, %s6044_s18  ;;  %p6050_p4 = scmp.lt.s32.totalorder %s6044_s18, %s6044_s18 }
 0x11a   :  { %4543 = vmatpush1.bf16.msra.mxu1 %v4542_v56  ;;  %4289 = vmatprep.subr.bf16.mxu0 %v4288_v57  ;;  %v971_v56 = vld [vmem:[#allocation3 + $0x1998] sm:$0xff] }
 0x11b   :  { %4545 = vmatprep.subr.bf16.mxu1 %v4544_v61  ;;  %v983_v57 = vld [vmem:[#allocation3 + $0x19f8] sm:$0xff]  ;;  %v4308_v61 = vpack.c.bf16 %v981_v55, %v969_v54  ;;  %v1076_v54 = vld [vmem:[#allocation3 + $0x1ce0] sm:$0xff]  ;;  %v1066_v55 = vld [vmem:[#allocation3 + $0x1c90] sm:$0xff]  ;;  %p6051_p5 = por %p6050_p4, %p6049_p3 }
 0x11c   :  { %v4564_v1 = vpack.c.bf16 %v983_v57, %v971_v56  ;;  %v1078_v57 = vld [vmem:[#allocation3 + $0x1cf0] sm:$0xff]  ;;  %v4326_v63 = vpack.c.bf16 %v1076_v54, %v1064_v53  ;;  %v1199_v53 = vld [vmem:[#allocation3 + $0x20b8] sm:$0xff] }
 0x11d   :  { %4291 = vmatpush1.bf16.msra.mxu0 %v4290_v3  ;;  %v993_v3 = vld [vmem:[#allocation3 + $0x1a48] sm:$0xff]  ;;  %v4582_v0 = vpack.c.bf16 %v1078_v57, %v1066_v55  ;;  %v1184_v57 = vld [vmem:[#allocation3 + $0x2040] sm:$0xff]  ;;  %p6052_p6 = pnand %p6051_p5, %p6045_p2 }
 0x11e   :  { %4547 = vmatpush1.bf16.msra.mxu1 %v4546_v4  ;;  %4293 = vmatprep.subr.bf16.mxu0 %v4292_v5  ;;  %v1005_v4 = vld [vmem:[#allocation3 + $0x1aa8] sm:$0xff]  ;;  %v995_v5 = vld [vmem:[#allocation3 + $0x1a58] sm:$0xff] }
 0x11f   :  { %4549 = vmatprep.subr.bf16.mxu1 %v4548_v9  ;;  %v4312_v9 = vpack.c.bf16 %v1005_v4, %v993_v3  ;;  %v4568_v14 = vpack.c.bf16 %v1007_v6, %v995_v5  ;;  %v1100_v3 = vld [vmem:[#allocation3 + $0x1da0] sm:$0xff]  ;;  %v1090_v4 = vld [vmem:[#allocation3 + $0x1d50] sm:$0xff] }
 0x120   :  { %v1102_v6 = vld [vmem:[#allocation3 + $0x1db0] sm:$0xff]  ;;  %v4330_v12 = vpack.c.bf16 %v1100_v3, %v1088_v2  ;;  %v1223_v2 = vld [vmem:[#allocation3 + $0x2178] sm:$0xff] }
 0x121   :  { %4295 = vmatpush1.bf16.msra.mxu0 %v4294_v16  ;;  %v1017_v16 = vld [vmem:[#allocation3 + $0x1b08] sm:$0xff]  ;;  %v4586_v13 = vpack.c.bf16 %v1102_v6, %v1090_v4  ;;  %v1208_v6 = vld [vmem:[#allocation3 + $0x2100] sm:$0xff] }
 0x122   :  { %4551 = vmatpush1.bf16.msra.mxu1 %v4550_v17  ;;  %4297 = vmatprep.subr.bf16.mxu0 %v4296_v18  ;;  %v1029_v17 = vld [vmem:[#allocation3 + $0x1b68] sm:$0xff]  ;;  %v1019_v18 = vld [vmem:[#allocation3 + $0x1b18] sm:$0xff] }
 0x123   :  { %4553 = vmatprep.subr.bf16.mxu1 %v4552_v23  ;;  %v4316_v23 = vpack.c.bf16 %v1029_v17, %v1017_v16  ;;  %v4572_v28 = vpack.c.bf16 %v1031_v19, %v1019_v18  ;;  %v1124_v16 = vld [vmem:[#allocation3 + $0x1e60] sm:$0xff]  ;;  %v1114_v17 = vld [vmem:[#allocation3 + $0x1e10] sm:$0xff] }
 0x124   :  { %v1126_v19 = vld [vmem:[#allocation3 + $0x1e70] sm:$0xff]  ;;  %v4334_v26 = vpack.c.bf16 %v1124_v16, %v1112_v15  ;;  %v1247_v15 = vld [vmem:[#allocation3 + $0x2238] sm:$0xff] }
 0x125   :  { %4299 = vmatpush1.bf16.msra.mxu0 %v4298_v30  ;;  %v1041_v30 = vld [vmem:[#allocation3 + $0x1bc8] sm:$0xff]  ;;  %v4590_v27 = vpack.c.bf16 %v1126_v19, %v1114_v17  ;;  %v1232_v19 = vld [vmem:[#allocation3 + $0x21c0] sm:$0xff] }
 0x126   :  { %4555 = vmatpush1.bf16.msra.mxu1 %v4554_v31  ;;  %4301 = vmatprep.subr.bf16.mxu0 %v4300_v33  ;;  %v1053_v31 = vld [vmem:[#allocation3 + $0x1c28] sm:$0xff]  ;;  %v1043_v33 = vld [vmem:[#allocation3 + $0x1bd8] sm:$0xff] }
 0x127   :  { %4557 = vmatprep.subr.bf16.mxu1 %v4556_v37  ;;  %v4320_v37 = vpack.c.bf16 %v1053_v31, %v1041_v30  ;;  %v4576_v42 = vpack.c.bf16 %v1055_v34, %v1043_v33  ;;  %v1148_v30 = vld [vmem:[#allocation3 + $0x1f20] sm:$0xff]  ;;  %v1138_v31 = vld [vmem:[#allocation3 + $0x1ed0] sm:$0xff] }
 0x128   :  { %1868 = vmatmul.mubr.f32.vlgmr.msra.gmra.mrb[0].mxu0 %v6292_v24  ;;  %v1150_v34 = vld [vmem:[#allocation3 + $0x1f30] sm:$0xff]  ;;  %v4338_v40 = vpack.c.bf16 %v1148_v30, %v1136_v29  ;;  %v1271_v29 = vld [vmem:[#allocation3 + $0x22f8] sm:$0xff] }
 0x129   :  { %4303 = vmatpush1.bf16.msra.mxu0 %v4302_v44  ;;  %2152 = vmatmul.mubr.f32.vlgmr.msra.gmra.mrb[0].mxu1 %v6292_v24  ;;  %v1065_v44 = vld [vmem:[#allocation3 + $0x1c88] sm:$0xff]  ;;  %v4594_v41 = vpack.c.bf16 %v1150_v34, %v1138_v31  ;;  %v1256_v34 = vld [vmem:[#allocation3 + $0x2280] sm:$0xff] }
 0x12a   :  { %4559 = vmatpush1.bf16.msra.mxu1 %v4558_v46  ;;  %4305 = vmatprep.subr.bf16.mxu0 %v4304_v47  ;;  %v1077_v46 = vld [vmem:[#allocation3 + $0x1ce8] sm:$0xff]  ;;  %v1067_v47 = vld [vmem:[#allocation3 + $0x1c98] sm:$0xff] }
 0x12b   :  { %4561 = vmatprep.subr.bf16.mxu1 %v4560_v52  ;;  %1938 = vmatprep.mubr.f32.mxu0 %v6314_v58  ;;  %v4324_v52 = vpack.c.bf16 %v1077_v46, %v1065_v44  ;;  %v4580_v56 = vpack.c.bf16 %v1079_v48, %v1067_v47  ;;  %v1172_v44 = vld [vmem:[#allocation3 + $0x1fe0] sm:$0xff]  ;;  %v1162_v46 = vld [vmem:[#allocation3 + $0x1f90] sm:$0xff] }
 0x12c   :  { %2222 = vmatprep.mubr.f32.mxu1 %v6314_v58  ;;  %v1174_v48 = vld [vmem:[#allocation3 + $0x1ff0] sm:$0xff]  ;;  %v4342_v54 = vpack.c.bf16 %v1172_v44, %v1160_v43  ;;  %v1295_v43 = vld [vmem:[#allocation3 + $0x23b8] sm:$0xff] }
 0x12d   :  { %4307 = vmatpush1.bf16.msra.mxu0 %v4306_v59  ;;  %v1089_v59 = vld [vmem:[#allocation3 + $0x1d48] sm:$0xff]  ;;  %v4598_v55 = vpack.c.bf16 %v1174_v48, %v1162_v46  ;;  %v1280_v48 = vld [vmem:[#allocation3 + $0x2340] sm:$0xff] }
 0x12e   :  { %4563 = vmatpush1.bf16.msra.mxu1 %v4562_v60  ;;  %4309 = vmatprep.subr.bf16.mxu0 %v4308_v61  ;;  %v1101_v60 = vld [vmem:[#allocation3 + $0x1da8] sm:$0xff]  ;;  %v1091_v61 = vld [vmem:[#allocation3 + $0x1d58] sm:$0xff] }
 0x12f   :  { %4565 = vmatprep.subr.bf16.mxu1 %v4564_v1  ;;  %v4328_v1 = vpack.c.bf16 %v1101_v60, %v1089_v59  ;;  %v4584_v5 = vpack.c.bf16 %v1103_v62, %v1091_v61  ;;  %v1196_v59 = vld [vmem:[#allocation3 + $0x20a0] sm:$0xff]  ;;  %v1186_v60 = vld [vmem:[#allocation3 + $0x2050] sm:$0xff] }
 0x130   :  { %v1198_v62 = vld [vmem:[#allocation3 + $0x20b0] sm:$0xff]  ;;  %v4346_v3 = vpack.c.bf16 %v1196_v59, %v1184_v57  ;;  %v1307_v57 = vld [vmem:[#allocation3 + $0x2418] sm:$0xff] }
 0x131   :  { %4311 = vmatpush1.bf16.msra.mxu0 %v4310_v7  ;;  %v1113_v7 = vld [vmem:[#allocation3 + $0x1e08] sm:$0xff]  ;;  %v4602_v4 = vpack.c.bf16 %v1198_v62, %v1186_v60  ;;  %v1319_v59 = vld [vmem:[#allocation3 + $0x2478] sm:$0xff] }
 0x132   :  { %4567 = vmatpush1.bf16.msra.mxu1 %v4566_v8  ;;  %4313 = vmatprep.subr.bf16.mxu0 %v4312_v9  ;;  %v1125_v8 = vld [vmem:[#allocation3 + $0x1e68] sm:$0xff]  ;;  %v1115_v9 = vld [vmem:[#allocation3 + $0x1e18] sm:$0xff] }
 0x133   :  { %4569 = vmatprep.subr.bf16.mxu1 %v4568_v14  ;;  %v4332_v14 = vpack.c.bf16 %v1125_v8, %v1113_v7  ;;  %v4588_v18 = vpack.c.bf16 %v1127_v10, %v1115_v9  ;;  %v1220_v7 = vld [vmem:[#allocation3 + $0x2160] sm:$0xff]  ;;  %v1210_v8 = vld [vmem:[#allocation3 + $0x2110] sm:$0xff] }
 0x134   :  { %v1222_v10 = vld [vmem:[#allocation3 + $0x2170] sm:$0xff]  ;;  %v4350_v16 = vpack.c.bf16 %v1220_v7, %v1208_v6  ;;  %v1343_v7 = vld [vmem:[#allocation3 + $0x2538] sm:$0xff] }
 0x135   :  { %4315 = vmatpush1.bf16.msra.mxu0 %v4314_v20  ;;  %v1137_v20 = vld [vmem:[#allocation3 + $0x1ec8] sm:$0xff]  ;;  %v4606_v17 = vpack.c.bf16 %v1222_v10, %v1210_v8 }
 0x136   :  { %4571 = vmatpush1.bf16.msra.mxu1 %v4570_v21  ;;  %4317 = vmatprep.subr.bf16.mxu0 %v4316_v23  ;;  %v1149_v21 = vld [vmem:[#allocation3 + $0x1f28] sm:$0xff]  ;;  %v1139_v23 = vld [vmem:[#allocation3 + $0x1ed8] sm:$0xff] }
 0x137   :  { %4573 = vmatprep.subr.bf16.mxu1 %v4572_v28  ;;  %v4336_v28 = vpack.c.bf16 %v1149_v21, %v1137_v20  ;;  %v4592_v33 = vpack.c.bf16 %v1151_v22, %v1139_v23  ;;  %v1244_v20 = vld [vmem:[#allocation3 + $0x2220] sm:$0xff]  ;;  %v1234_v21 = vld [vmem:[#allocation3 + $0x21d0] sm:$0xff] }
 0x138   :  { %v1246_v22 = vld [vmem:[#allocation3 + $0x2230] sm:$0xff]  ;;  %v4354_v30 = vpack.c.bf16 %v1244_v20, %v1232_v19  ;;  %v1355_v20 = vld [vmem:[#allocation3 + $0x2598] sm:$0xff] }
 0x139   :  { %4319 = vmatpush1.bf16.msra.mxu0 %v4318_v35  ;;  %v1161_v35 = vld [vmem:[#allocation3 + $0x1f88] sm:$0xff]  ;;  %v4610_v31 = vpack.c.bf16 %v1246_v22, %v1234_v21  ;;  %v1367_v21 = vld [vmem:[#allocation3 + $0x25f8] sm:$0xff] }
 0x13a   :  { %4575 = vmatpush1.bf16.msra.mxu1 %v4574_v36  ;;  %4321 = vmatprep.subr.bf16.mxu0 %v4320_v37  ;;  %v1173_v36 = vld [vmem:[#allocation3 + $0x1fe8] sm:$0xff]  ;;  %v1163_v37 = vld [vmem:[#allocation3 + $0x1f98] sm:$0xff] }
 0x13b   :  { %4577 = vmatprep.subr.bf16.mxu1 %v4576_v42  ;;  %v4340_v42 = vpack.c.bf16 %v1173_v36, %v1161_v35  ;;  %v4596_v47 = vpack.c.bf16 %v1175_v39, %v1163_v37  ;;  %v1268_v35 = vld [vmem:[#allocation3 + $0x22e0] sm:$0xff]  ;;  %v1258_v36 = vld [vmem:[#allocation3 + $0x2290] sm:$0xff] }
 0x13c   :  { %v1270_v39 = vld [vmem:[#allocation3 + $0x22f0] sm:$0xff]  ;;  %v4358_v44 = vpack.c.bf16 %v1268_v35, %v1256_v34  ;;  %v1389_v34 = vld [vmem:[#allocation3 + $0x26a8] sm:$0xff]  ;;  %v1379_v35 = vld [vmem:[#allocation3 + $0x2658] sm:$0xff] }
 0x13d   :  { %4323 = vmatpush1.bf16.msra.mxu0 %v4322_v49  ;;  %v1185_v49 = vld [vmem:[#allocation3 + $0x2048] sm:$0xff]  ;;  %v4614_v46 = vpack.c.bf16 %v1270_v39, %v1258_v36  ;;  %v1391_v36 = vld [vmem:[#allocation3 + $0x26b8] sm:$0xff] }
 0x13e   :  { %4579 = vmatpush1.bf16.msra.mxu1 %v4578_v50  ;;  %4325 = vmatprep.subr.bf16.mxu0 %v4324_v52  ;;  %v1197_v50 = vld [vmem:[#allocation3 + $0x20a8] sm:$0xff]  ;;  %v1187_v52 = vld [vmem:[#allocation3 + $0x2058] sm:$0xff] }
 0x13f   :  { %4581 = vmatprep.subr.bf16.mxu1 %v4580_v56  ;;  %v4344_v56 = vpack.c.bf16 %v1197_v50, %v1185_v49  ;;  %v4600_v61 = vpack.c.bf16 %v1199_v53, %v1187_v52  ;;  %v1292_v49 = vld [vmem:[#allocation3 + $0x23a0] sm:$0xff]  ;;  %v1282_v50 = vld [vmem:[#allocation3 + $0x2350] sm:$0xff] }
 0x140   :  { %v1294_v53 = vld [vmem:[#allocation3 + $0x23b0] sm:$0xff]  ;;  %v4362_v60 = vpack.c.bf16 %v1292_v49, %v1280_v48  ;;  %v1413_v48 = vld [vmem:[#allocation3 + $0x2768] sm:$0xff]  ;;  %v1403_v49 = vld [vmem:[#allocation3 + $0x2718] sm:$0xff] }
 0x141   :  { %4327 = vmatpush1.bf16.msra.mxu0 %v4326_v63  ;;  %v1209_v63 = vld [vmem:[#allocation3 + $0x2108] sm:$0xff] }
 0x142   :  { %4583 = vmatpush1.bf16.msra.mxu1 %v4582_v0  ;;  %4329 = vmatprep.subr.bf16.mxu0 %v4328_v1  ;;  %v1221_v0 = vld [vmem:[#allocation3 + $0x2168] sm:$0xff]  ;;  %v1211_v1 = vld [vmem:[#allocation3 + $0x2118] sm:$0xff] }
 0x143   :  { %4585 = vmatprep.subr.bf16.mxu1 %v4584_v5  ;;  %v4348_v5 = vpack.c.bf16 %v1221_v0, %v1209_v63  ;;  %v4604_v9 = vpack.c.bf16 %v1223_v2, %v1211_v1  ;;  %v1304_v63 = vld [vmem:[#allocation3 + $0x2400] sm:$0xff]  ;;  %v1306_v1 = vld [vmem:[#allocation3 + $0x2410] sm:$0xff]  ;;  %v4620_v2 = vpack.c.bf16 %v1319_v59, %v1307_v57 }
 0x144   :  { %v1316_v0 = vld [vmem:[#allocation3 + $0x2460] sm:$0xff]  ;;  %v1402_v57 = vld [vmem:[#allocation3 + $0x2710] sm:$0xff] }
 0x145   :  { %4331 = vmatpush1.bf16.msra.mxu0 %v4330_v12  ;;  %v1233_v12 = vld [vmem:[#allocation3 + $0x21c8] sm:$0xff]  ;;  %v4366_v8 = vpack.c.bf16 %v1316_v0, %v1304_v63  ;;  %v1427_v63 = vld [vmem:[#allocation3 + $0x27d8] sm:$0xff] }
 0x146   :  { %4587 = vmatpush1.bf16.msra.mxu1 %v4586_v13  ;;  %4333 = vmatprep.subr.bf16.mxu0 %v4332_v14  ;;  %v1245_v13 = vld [vmem:[#allocation3 + $0x2228] sm:$0xff]  ;;  %v1235_v14 = vld [vmem:[#allocation3 + $0x21d8] sm:$0xff] }
 0x147   :  { %4589 = vmatprep.subr.bf16.mxu1 %v4588_v18  ;;  %v4352_v18 = vpack.c.bf16 %v1245_v13, %v1233_v12  ;;  %v4608_v23 = vpack.c.bf16 %v1247_v15, %v1235_v14  ;;  %v1328_v12 = vld [vmem:[#allocation3 + $0x24c0] sm:$0xff]  ;;  %v1330_v14 = vld [vmem:[#allocation3 + $0x24d0] sm:$0xff]  ;;  %v1439_v0 = vld [vmem:[#allocation3 + $0x2838] sm:$0xff] }
 0x148   :  { %v1340_v13 = vld [vmem:[#allocation3 + $0x2520] sm:$0xff] }
 0x149   :  { %4335 = vmatpush1.bf16.msra.mxu0 %v4334_v26  ;;  %v1257_v26 = vld [vmem:[#allocation3 + $0x2288] sm:$0xff] }
 0x14a   :  { %4591 = vmatpush1.bf16.msra.mxu1 %v4590_v27  ;;  %4337 = vmatprep.subr.bf16.mxu0 %v4336_v28  ;;  %v1269_v27 = vld [vmem:[#allocation3 + $0x22e8] sm:$0xff]  ;;  %v1259_v28 = vld [vmem:[#allocation3 + $0x2298] sm:$0xff] }
 0x14b   :  { %4593 = vmatprep.subr.bf16.mxu1 %v4592_v33  ;;  %v4356_v33 = vpack.c.bf16 %v1269_v27, %v1257_v26  ;;  %v4612_v37 = vpack.c.bf16 %v1271_v29, %v1259_v28  ;;  %v1352_v27 = vld [vmem:[#allocation3 + $0x2580] sm:$0xff]  ;;  %v1354_v29 = vld [vmem:[#allocation3 + $0x2590] sm:$0xff] }
 0x14c   :  { %v1364_v28 = vld [vmem:[#allocation3 + $0x25e0] sm:$0xff] }
 0x14d   :  { %4339 = vmatpush1.bf16.msra.mxu0 %v4338_v40  ;;  %v1281_v40 = vld [vmem:[#allocation3 + $0x2348] sm:$0xff] }
 0x14e   :  { %4595 = vmatpush1.bf16.msra.mxu1 %v4594_v41  ;;  %4341 = vmatprep.subr.bf16.mxu0 %v4340_v42  ;;  %v1293_v41 = vld [vmem:[#allocation3 + $0x23a8] sm:$0xff]  ;;  %v1283_v42 = vld [vmem:[#allocation3 + $0x2358] sm:$0xff] }
 0x14f   :  { %4597 = vmatprep.subr.bf16.mxu1 %v4596_v47  ;;  %v4360_v47 = vpack.c.bf16 %v1293_v41, %v1281_v40  ;;  %v4616_v52 = vpack.c.bf16 %v1295_v43, %v1283_v42  ;;  %v1376_v41 = vld [vmem:[#allocation3 + $0x2640] sm:$0xff]  ;;  %v1378_v43 = vld [vmem:[#allocation3 + $0x2650] sm:$0xff] }
 0x150   :  { %v1388_v42 = vld [vmem:[#allocation3 + $0x26a0] sm:$0xff] }
 0x151   :  { %4343 = vmatpush1.bf16.msra.mxu0 %v4342_v54  ;;  %v1305_v54 = vld [vmem:[#allocation3 + $0x2408] sm:$0xff] }
 0x152   :  { %4599 = vmatpush1.bf16.msra.mxu1 %v4598_v55  ;;  %4345 = vmatprep.subr.bf16.mxu0 %v4344_v56  ;;  %v1317_v55 = vld [vmem:[#allocation3 + $0x2468] sm:$0xff]  ;;  %v1707_v56 = vcombine.high %v6305_v45, %v6305_v45  ;;  %v1331_v45 = vld [vmem:[#allocation3 + $0x24d8] sm:$0xff] }
 0x153   :  { %4601 = vmatprep.subr.bf16.mxu1 %v4600_v61  ;;  %v4618_v61 = vpack.c.bf16 %v1294_v53, %v1282_v50  ;;  %v4364_v62 = vpack.c.bf16 %v1317_v55, %v1305_v54  ;;  %v4624_v15 = vpack.c.bf16 %v1343_v7, %v1331_v45  ;;  %v1415_v50 = vld [vmem:[#allocation3 + $0x2778] sm:$0xff]  ;;  %v1400_v55 = vld [vmem:[#allocation3 + $0x2700] sm:$0xff]  ;;  %v1426_v45 = vld [vmem:[#allocation3 + $0x27d0] sm:$0xff]  ;;  %v4640_v7 = vpack.c.bf16 %v1439_v0, %v1427_v63 }
 0x154   :  { %v6322_v6 = vrot.slane %v1707_v56, %v6272_v11  ;;  %v1412_v56 = vld [vmem:[#allocation3 + $0x2760] sm:$0xff]  ;;  %v4636_v59 = vpack.c.bf16 %v1415_v50, %v1403_v49  ;;  %v1498_v49 = vld [vmem:[#allocation3 + $0x2a10] sm:$0xff] }
 0x155   :  { %4347 = vmatpush1.bf16.msra.mxu0 %v4346_v3  ;;  %v1318_v3 = vld [vmem:[#allocation3 + $0x2470] sm:$0xff] }
 0x156   :  { %4603 = vmatpush1.bf16.msra.mxu1 %v4602_v4  ;;  %4349 = vmatprep.subr.bf16.mxu0 %v4348_v5  ;;  %v1329_v4 = vld [vmem:[#allocation3 + $0x24c8] sm:$0xff]  ;;  %v6326_v19 = vcombine.high %v6322_v6, %v6322_v6  ;;  %v1522_v63 = vld [vmem:[#allocation3 + $0x2ad0] sm:$0xff] }
 0x157   :  { %4605 = vmatprep.subr.bf16.mxu1 %v4604_v9  ;;  %v1341_v5 = vld [vmem:[#allocation3 + $0x2528] sm:$0xff]  ;;  %v4622_v9 = vpack.c.bf16 %v1318_v3, %v1306_v1  ;;  %v4382_v1 = vpack.c.bf16 %v1412_v56, %v1400_v55  ;;  %v1523_v55 = vld [vmem:[#allocation3 + $0x2ad8] sm:$0xff] }
 0x158   :  { %v4368_v10 = vpack.c.bf16 %v1341_v5, %v1329_v4  ;;  %v1424_v4 = vld [vmem:[#allocation3 + $0x27c0] sm:$0xff]  ;;  %v1535_v56 = vld [vmem:[#allocation3 + $0x2b38] sm:$0xff] }
 0x159   :  { %4351 = vmatpush1.bf16.msra.mxu0 %v4350_v16  ;;  %v1342_v16 = vld [vmem:[#allocation3 + $0x2530] sm:$0xff]  ;;  %v1436_v5 = vld [vmem:[#allocation3 + $0x2820] sm:$0xff]  ;;  %v4656_v0 = vpack.c.bf16 %v1535_v56, %v1523_v55 }
 0x15a   :  { %4607 = vmatpush1.bf16.msra.mxu1 %v4606_v17  ;;  %4353 = vmatprep.subr.bf16.mxu0 %v4352_v18  ;;  %v1353_v17 = vld [vmem:[#allocation3 + $0x2588] sm:$0xff]  ;;  %v4626_v22 = vpack.c.bf16 %v1342_v16, %v1330_v14  ;;  %v4386_v14 = vpack.c.bf16 %v1436_v5, %v1424_v4  ;;  %v1547_v4 = vld [vmem:[#allocation3 + $0x2b98] sm:$0xff]  ;;  %v1618_v55 = vld [vmem:[#allocation3 + $0x2dd0] sm:$0xff] }
 0x15b   :  { %4609 = vmatprep.subr.bf16.mxu1 %v4608_v23  ;;  %v1365_v18 = vld [vmem:[#allocation3 + $0x25e8] sm:$0xff]  ;;  %v4370_v23 = vpack.c.bf16 %v1340_v13, %v1328_v12  ;;  %v1451_v12 = vld [vmem:[#allocation3 + $0x2898] sm:$0xff] }
 0x15c   :  { %v4372_v26 = vpack.c.bf16 %v1365_v18, %v1353_v17  ;;  %v1463_v13 = vld [vmem:[#allocation3 + $0x28f8] sm:$0xff]  ;;  %v1448_v17 = vld [vmem:[#allocation3 + $0x2880] sm:$0xff] }
 0x15d   :  { %4355 = vmatpush1.bf16.msra.mxu0 %v4354_v30  ;;  %v4628_v30 = vpack.c.bf16 %v1367_v21, %v1355_v20  ;;  %v1460_v18 = vld [vmem:[#allocation3 + $0x28e0] sm:$0xff]  ;;  %v1450_v20 = vld [vmem:[#allocation3 + $0x2890] sm:$0xff]  ;;  %v4644_v21 = vpack.c.bf16 %v1463_v13, %v1451_v12  ;;  %v1559_v5 = vld [vmem:[#allocation3 + $0x2bf8] sm:$0xff] }
 0x15e   :  { %4611 = vmatpush1.bf16.msra.mxu1 %v4610_v31  ;;  %4357 = vmatprep.subr.bf16.mxu0 %v4356_v33  ;;  %v1366_v31 = vld [vmem:[#allocation3 + $0x25f0] sm:$0xff]  ;;  %v1377_v33 = vld [vmem:[#allocation3 + $0x2648] sm:$0xff]  ;;  %v4660_v13 = vpack.c.bf16 %v1559_v5, %v1547_v4 }
 0x15f   :  { %4613 = vmatprep.subr.bf16.mxu1 %v4612_v37  ;;  %v4374_v37 = vpack.c.bf16 %v1364_v28, %v1352_v27  ;;  %v4630_v39 = vpack.c.bf16 %v1366_v31, %v1354_v29  ;;  %v4376_v40 = vpack.c.bf16 %v1389_v34, %v1377_v33  ;;  %v1475_v27 = vld [vmem:[#allocation3 + $0x2958] sm:$0xff]  ;;  %v4390_v29 = vpack.c.bf16 %v1460_v18, %v1448_v17  ;;  %v1472_v33 = vld [vmem:[#allocation3 + $0x2940] sm:$0xff]  ;;  %v1546_v12 = vld [vmem:[#allocation3 + $0x2b90] sm:$0xff] }
 0x160   :  { %v1487_v28 = vld [vmem:[#allocation3 + $0x29b8] sm:$0xff]  ;;  %v1484_v34 = vld [vmem:[#allocation3 + $0x29a0] sm:$0xff]  ;;  %v1642_v4 = vld [vmem:[#allocation3 + $0x2e90] sm:$0xff] }
 0x161   :  { %4359 = vmatpush1.bf16.msra.mxu0 %v4358_v44  ;;  %v4632_v44 = vpack.c.bf16 %v1391_v36, %v1379_v35  ;;  %v1474_v35 = vld [vmem:[#allocation3 + $0x2950] sm:$0xff]  ;;  %v4648_v36 = vpack.c.bf16 %v1487_v28, %v1475_v27  ;;  %v1571_v17 = vld [vmem:[#allocation3 + $0x2c58] sm:$0xff] }
 0x162   :  { %4615 = vmatpush1.bf16.msra.mxu1 %v4614_v46  ;;  %4361 = vmatprep.subr.bf16.mxu0 %v4360_v47  ;;  %v1390_v46 = vld [vmem:[#allocation3 + $0x26b0] sm:$0xff]  ;;  %v1401_v47 = vld [vmem:[#allocation3 + $0x2708] sm:$0xff]  ;;  %v1583_v18 = vld [vmem:[#allocation3 + $0x2cb8] sm:$0xff] }
 0x163   :  { %4617 = vmatprep.subr.bf16.mxu1 %v4616_v52  ;;  %v4378_v52 = vpack.c.bf16 %v1388_v42, %v1376_v41  ;;  %v4634_v53 = vpack.c.bf16 %v1390_v46, %v1378_v43  ;;  %v4380_v54 = vpack.c.bf16 %v1413_v48, %v1401_v47  ;;  %v1499_v41 = vld [vmem:[#allocation3 + $0x2a18] sm:$0xff]  ;;  %v4394_v43 = vpack.c.bf16 %v1484_v34, %v1472_v33  ;;  %v1496_v47 = vld [vmem:[#allocation3 + $0x2a00] sm:$0xff]  ;;  %v1570_v27 = vld [vmem:[#allocation3 + $0x2c50] sm:$0xff] }
 0x164   :  { %v1511_v42 = vld [vmem:[#allocation3 + $0x2a78] sm:$0xff]  ;;  %v1508_v48 = vld [vmem:[#allocation3 + $0x2a60] sm:$0xff]  ;;  %v4664_v28 = vpack.c.bf16 %v1583_v18, %v1571_v17  ;;  %v1666_v17 = vld [vmem:[#allocation3 + $0x2f50] sm:$0xff] }
 0x165   :  { %4363 = vmatpush1.bf16.msra.mxu0 %v4362_v60  ;;  %v1414_v60 = vld [vmem:[#allocation3 + $0x2770] sm:$0xff]  ;;  %v4652_v50 = vpack.c.bf16 %v1511_v42, %v1499_v41  ;;  %v1595_v33 = vld [vmem:[#allocation3 + $0x2d18] sm:$0xff] }
 0x166   :  { %4619 = vmatpush1.bf16.msra.mxu1 %v4618_v61  ;;  %4365 = vmatprep.subr.bf16.mxu0 %v4364_v62  ;;  %v1425_v61 = vld [vmem:[#allocation3 + $0x27c8] sm:$0xff]  ;;  %v1607_v34 = vld [vmem:[#allocation3 + $0x2d78] sm:$0xff]  ;;  %v1594_v41 = vld [vmem:[#allocation3 + $0x2d10] sm:$0xff] }
 0x167   :  { %4621 = vmatprep.subr.bf16.mxu1 %v4620_v2  ;;  %v1437_v62 = vld [vmem:[#allocation3 + $0x2828] sm:$0xff]  ;;  %v4638_v2 = vpack.c.bf16 %v1414_v60, %v1402_v57  ;;  %v4398_v57 = vpack.c.bf16 %v1508_v48, %v1496_v47  ;;  %v4668_v42 = vpack.c.bf16 %v1607_v34, %v1595_v33  ;;  %v1619_v47 = vld [vmem:[#allocation3 + $0x2dd8] sm:$0xff]  ;;  %v158_v33 = vld [vmem:[#allocation3 + $0x30] sm:$0xff] }
 0x168   :  { %1939 = vmatmul.mubr.f32.vlgmr.msra.gmra.mrb[0].mxu0 %v6309_v51  ;;  %v4384_v3 = vpack.c.bf16 %v1437_v62, %v1425_v61  ;;  %v1520_v61 = vld [vmem:[#allocation3 + $0x2ac0] sm:$0xff]  ;;  %v1631_v48 = vld [vmem:[#allocation3 + $0x2e38] sm:$0xff] }
 0x169   :  { %4367 = vmatpush1.bf16.msra.mxu0 %v4366_v8  ;;  %2223 = vmatmul.mubr.f32.vlgmr.msra.gmra.mrb[0].mxu1 %v6309_v51  ;;  %v1438_v8 = vld [vmem:[#allocation3 + $0x2830] sm:$0xff]  ;;  %v1532_v62 = vld [vmem:[#allocation3 + $0x2b20] sm:$0xff]  ;;  %v4672_v56 = vpack.c.bf16 %v1631_v48, %v1619_v47 }
 0x16a   :  { %4623 = vmatpush1.bf16.msra.mxu1 %v4622_v9  ;;  %4369 = vmatprep.subr.bf16.mxu0 %v4368_v10  ;;  %v1449_v9 = vld [vmem:[#allocation3 + $0x2888] sm:$0xff]  ;;  %v182_v47 = vld [vmem:[#allocation3 + $0xf0] sm:$0xff] }
 0x16b   :  { %4625 = vmatprep.subr.bf16.mxu1 %v4624_v15  ;;  %2009 = vmatprep.mubr.f32.mxu0 %v6326_v19  ;;  %v1461_v10 = vld [vmem:[#allocation3 + $0x28e8] sm:$0xff]  ;;  %v4642_v15 = vpack.c.bf16 %v1438_v8, %v1426_v45  ;;  %v4402_v45 = vpack.c.bf16 %v1532_v62, %v1520_v61  ;;  %v1643_v61 = vld [vmem:[#allocation3 + $0x2e98] sm:$0xff] }
 0x16c   :  { %2293 = vmatprep.mubr.f32.mxu1 %v6326_v19  ;;  %v4388_v16 = vpack.c.bf16 %v1461_v10, %v1449_v9  ;;  %v1544_v9 = vld [vmem:[#allocation3 + $0x2b80] sm:$0xff]  ;;  %v1655_v62 = vld [vmem:[#allocation3 + $0x2ef8] sm:$0xff] }
 0x16d   :  { %4371 = vmatpush1.bf16.msra.mxu0 %v4370_v23  ;;  %v1462_v23 = vld [vmem:[#allocation3 + $0x28f0] sm:$0xff]  ;;  %v1556_v10 = vld [vmem:[#allocation3 + $0x2be0] sm:$0xff]  ;;  %v4676_v5 = vpack.c.bf16 %v1655_v62, %v1643_v61 }
 0x16e   :  { %4627 = vmatpush1.bf16.msra.mxu1 %v4626_v22  ;;  %4373 = vmatprep.subr.bf16.mxu0 %v4372_v26  ;;  %v1473_v22 = vld [vmem:[#allocation3 + $0x2948] sm:$0xff]  ;;  %v206_v61 = vld [vmem:[#allocation3 + $0x1b0] sm:$0xff] }
 0x16f   :  { %4629 = vmatprep.subr.bf16.mxu1 %v4628_v30  ;;  %v1485_v26 = vld [vmem:[#allocation3 + $0x29a8] sm:$0xff]  ;;  %v4646_v30 = vpack.c.bf16 %v1462_v23, %v1450_v20  ;;  %v4406_v20 = vpack.c.bf16 %v1556_v10, %v1544_v9  ;;  %v1667_v9 = vld [vmem:[#allocation3 + $0x2f58] sm:$0xff] }
 0x170   :  { %v4392_v31 = vpack.c.bf16 %v1485_v26, %v1473_v22  ;;  %v1568_v22 = vld [vmem:[#allocation3 + $0x2c40] sm:$0xff]  ;;  %v1679_v10 = vld [vmem:[#allocation3 + $0x2fb8] sm:$0xff] }
 0x171   :  { %4375 = vmatpush1.bf16.msra.mxu0 %v4374_v37  ;;  %v1486_v37 = vld [vmem:[#allocation3 + $0x29b0] sm:$0xff]  ;;  %v1580_v26 = vld [vmem:[#allocation3 + $0x2ca0] sm:$0xff]  ;;  %v4680_v18 = vpack.c.bf16 %v1679_v10, %v1667_v9 }
 0x172   :  { %4631 = vmatpush1.bf16.msra.mxu1 %v4630_v39  ;;  %4377 = vmatprep.subr.bf16.mxu0 %v4376_v40  ;;  %v1497_v39 = vld [vmem:[#allocation3 + $0x2a08] sm:$0xff]  ;;  %v230_v9 = vld [vmem:[#allocation3 + $0x270] sm:$0xff] }
 0x173   :  { %4633 = vmatprep.subr.bf16.mxu1 %v4632_v44  ;;  %v1509_v40 = vld [vmem:[#allocation3 + $0x2a68] sm:$0xff]  ;;  %v4650_v44 = vpack.c.bf16 %v1486_v37, %v1474_v35  ;;  %v4410_v35 = vpack.c.bf16 %v1580_v26, %v1568_v22  ;;  %v159_v22 = vld [vmem:[#allocation3 + $0x38] sm:$0xff] }
 0x174   :  { %v4396_v46 = vpack.c.bf16 %v1509_v40, %v1497_v39  ;;  %v1592_v39 = vld [vmem:[#allocation3 + $0x2d00] sm:$0xff]  ;;  %v171_v26 = vld [vmem:[#allocation3 + $0x98] sm:$0xff] }
 0x175   :  { %4379 = vmatpush1.bf16.msra.mxu0 %v4378_v52  ;;  %v1510_v52 = vld [vmem:[#allocation3 + $0x2a70] sm:$0xff]  ;;  %v1604_v40 = vld [vmem:[#allocation3 + $0x2d60] sm:$0xff]  ;;  %v4940_v34 = vpack.c.bf16 %v171_v26, %v159_v22 }
 0x176   :  { %4635 = vmatpush1.bf16.msra.mxu1 %v4634_v53  ;;  %4381 = vmatprep.subr.bf16.mxu0 %v4380_v54  ;;  %v1521_v53 = vld [vmem:[#allocation3 + $0x2ac8] sm:$0xff]  ;;  %v254_v22 = vld [vmem:[#allocation3 + $0x330] sm:$0xff] }
 0x177   :  { %4637 = vmatprep.subr.bf16.mxu1 %v4636_v59  ;;  %v1533_v54 = vld [vmem:[#allocation3 + $0x2b28] sm:$0xff]  ;;  %v4654_v59 = vpack.c.bf16 %v1510_v52, %v1498_v49  ;;  %v4414_v49 = vpack.c.bf16 %v1604_v40, %v1592_v39  ;;  %v183_v39 = vld [vmem:[#allocation3 + $0xf8] sm:$0xff] }
 0x178   :  { %v4400_v60 = vpack.c.bf16 %v1533_v54, %v1521_v53  ;;  %v1616_v53 = vld [vmem:[#allocation3 + $0x2dc0] sm:$0xff]  ;;  %v195_v40 = vld [vmem:[#allocation3 + $0x158] sm:$0xff] }
 0x179   :  { %4383 = vmatpush1.bf16.msra.mxu0 %v4382_v1  ;;  %v1534_v1 = vld [vmem:[#allocation3 + $0x2b30] sm:$0xff]  ;;  %v1628_v54 = vld [vmem:[#allocation3 + $0x2e20] sm:$0xff]  ;;  %v4944_v48 = vpack.c.bf16 %v195_v40, %v183_v39 }
 0x17a   :  { %4639 = vmatpush1.bf16.msra.mxu1 %v4638_v2  ;;  %4385 = vmatprep.subr.bf16.mxu0 %v4384_v3  ;;  %v1545_v2 = vld [vmem:[#allocation3 + $0x2b88] sm:$0xff]  ;;  %v278_v39 = vld [vmem:[#allocation3 + $0x3f0] sm:$0xff] }
 0x17b   :  { %4641 = vmatprep.subr.bf16.mxu1 %v4640_v7  ;;  %v1557_v3 = vld [vmem:[#allocation3 + $0x2be8] sm:$0xff]  ;;  %v4658_v7 = vpack.c.bf16 %v1534_v1, %v1522_v63  ;;  %v4418_v63 = vpack.c.bf16 %v1628_v54, %v1616_v53  ;;  %v207_v53 = vld [vmem:[#allocation3 + $0x1b8] sm:$0xff] }
 0x17c   :  { %v4404_v8 = vpack.c.bf16 %v1557_v3, %v1545_v2  ;;  %v1640_v2 = vld [vmem:[#allocation3 + $0x2e80] sm:$0xff]  ;;  %v219_v54 = vld [vmem:[#allocation3 + $0x218] sm:$0xff] }
 0x17d   :  { %4387 = vmatpush1.bf16.msra.mxu0 %v4386_v14  ;;  %v1558_v14 = vld [vmem:[#allocation3 + $0x2bf0] sm:$0xff]  ;;  %v1652_v3 = vld [vmem:[#allocation3 + $0x2ee0] sm:$0xff]  ;;  %v4948_v62 = vpack.c.bf16 %v219_v54, %v207_v53 }
 0x17e   :  { %4643 = vmatpush1.bf16.msra.mxu1 %v4642_v15  ;;  %4389 = vmatprep.subr.bf16.mxu0 %v4388_v16  ;;  %v1569_v15 = vld [vmem:[#allocation3 + $0x2c48] sm:$0xff]  ;;  %v302_v53 = vld [vmem:[#allocation3 + $0x4b0] sm:$0xff] }
 0x17f   :  { %4645 = vmatprep.subr.bf16.mxu1 %v4644_v21  ;;  %v1581_v16 = vld [vmem:[#allocation3 + $0x2ca8] sm:$0xff]  ;;  %v4662_v21 = vpack.c.bf16 %v1558_v14, %v1546_v12  ;;  %v4422_v12 = vpack.c.bf16 %v1652_v3, %v1640_v2  ;;  %v231_v2 = vld [vmem:[#allocation3 + $0x278] sm:$0xff] }
 0x180   :  { %v4408_v23 = vpack.c.bf16 %v1581_v16, %v1569_v15  ;;  %v1664_v15 = vld [vmem:[#allocation3 + $0x2f40] sm:$0xff]  ;;  %v243_v3 = vld [vmem:[#allocation3 + $0x2d8] sm:$0xff] }
 0x181   :  { %4391 = vmatpush1.bf16.msra.mxu0 %v4390_v29  ;;  %v1582_v29 = vld [vmem:[#allocation3 + $0x2cb0] sm:$0xff]  ;;  %v1676_v16 = vld [vmem:[#allocation3 + $0x2fa0] sm:$0xff]  ;;  %v4952_v10 = vpack.c.bf16 %v243_v3, %v231_v2 }
 0x182   :  { %4647 = vmatpush1.bf16.msra.mxu1 %v4646_v30  ;;  %4393 = vmatprep.subr.bf16.mxu0 %v4392_v31  ;;  %v1593_v30 = vld [vmem:[#allocation3 + $0x2d08] sm:$0xff]  ;;  %v326_v2 = vld [vmem:[#allocation3 + $0x570] sm:$0xff] }
 0x183   :  { %4649 = vmatprep.subr.bf16.mxu1 %v4648_v36  ;;  %v1605_v31 = vld [vmem:[#allocation3 + $0x2d68] sm:$0xff]  ;;  %v4666_v36 = vpack.c.bf16 %v1582_v29, %v1570_v27  ;;  %v4426_v27 = vpack.c.bf16 %v1676_v16, %v1664_v15  ;;  %v255_v15 = vld [vmem:[#allocation3 + $0x338] sm:$0xff] }
 0x184   :  { %v4412_v37 = vpack.c.bf16 %v1605_v31, %v1593_v30  ;;  %v156_v30 = vld [vmem:[#allocation3 + $0x20] sm:$0xff]  ;;  %v267_v16 = vld [vmem:[#allocation3 + $0x398] sm:$0xff] }
 0x185   :  { %4395 = vmatpush1.bf16.msra.mxu0 %v4394_v43  ;;  %v1606_v43 = vld [vmem:[#allocation3 + $0x2d70] sm:$0xff]  ;;  %v168_v31 = vld [vmem:[#allocation3 + $0x80] sm:$0xff]  ;;  %v4956_v26 = vpack.c.bf16 %v267_v16, %v255_v15 }
 0x186   :  { %4651 = vmatpush1.bf16.msra.mxu1 %v4650_v44  ;;  %4397 = vmatprep.subr.bf16.mxu0 %v4396_v46  ;;  %v1617_v44 = vld [vmem:[#allocation3 + $0x2dc8] sm:$0xff]  ;;  %v350_v15 = vld [vmem:[#allocation3 + $0x630] sm:$0xff] }
 0x187   :  { %4653 = vmatprep.subr.bf16.mxu1 %v4652_v50  ;;  %v1629_v46 = vld [vmem:[#allocation3 + $0x2e28] sm:$0xff]  ;;  %v4670_v50 = vpack.c.bf16 %v1606_v43, %v1594_v41  ;;  %v4686_v41 = vpack.c.bf16 %v168_v31, %v156_v30  ;;  %v279_v30 = vld [vmem:[#allocation3 + $0x3f8] sm:$0xff] }
 0x188   :  { %v4416_v52 = vpack.c.bf16 %v1629_v46, %v1617_v44  ;;  %v180_v44 = vld [vmem:[#allocation3 + $0xe0] sm:$0xff]  ;;  %v291_v31 = vld [vmem:[#allocation3 + $0x458] sm:$0xff] }
 0x189   :  { %4399 = vmatpush1.bf16.msra.mxu0 %v4398_v57  ;;  %v1630_v57 = vld [vmem:[#allocation3 + $0x2e30] sm:$0xff]  ;;  %v192_v46 = vld [vmem:[#allocation3 + $0x140] sm:$0xff]  ;;  %v4960_v40 = vpack.c.bf16 %v291_v31, %v279_v30 }
 0x18a   :  { %4655 = vmatpush1.bf16.msra.mxu1 %v4654_v59  ;;  %4401 = vmatprep.subr.bf16.mxu0 %v4400_v60  ;;  %v1641_v59 = vld [vmem:[#allocation3 + $0x2e88] sm:$0xff]  ;;  %v374_v30 = vld [vmem:[#allocation3 + $0x6f0] sm:$0xff] }
 0x18b   :  { %4657 = vmatprep.subr.bf16.mxu1 %v4656_v0  ;;  %v1653_v60 = vld [vmem:[#allocation3 + $0x2ee8] sm:$0xff]  ;;  %v4674_v0 = vpack.c.bf16 %v1630_v57, %v1618_v55  ;;  %v4690_v55 = vpack.c.bf16 %v192_v46, %v180_v44  ;;  %v303_v44 = vld [vmem:[#allocation3 + $0x4b8] sm:$0xff] }
 0x18c   :  { %v4420_v1 = vpack.c.bf16 %v1653_v60, %v1641_v59  ;;  %v204_v59 = vld [vmem:[#allocation3 + $0x1a0] sm:$0xff]  ;;  %v315_v46 = vld [vmem:[#allocation3 + $0x518] sm:$0xff] }
 0x18d   :  { %4403 = vmatpush1.bf16.msra.mxu0 %v4402_v45  ;;  %v1654_v45 = vld [vmem:[#allocation3 + $0x2ef0] sm:$0xff]  ;;  %v216_v60 = vld [vmem:[#allocation3 + $0x200] sm:$0xff]  ;;  %v4964_v54 = vpack.c.bf16 %v315_v46, %v303_v44 }
 0x18e   :  { %4659 = vmatpush1.bf16.msra.mxu1 %v4658_v7  ;;  %4405 = vmatprep.subr.bf16.mxu0 %v4404_v8  ;;  %v1665_v7 = vld [vmem:[#allocation3 + $0x2f48] sm:$0xff]  ;;  %v398_v44 = vld [vmem:[#allocation3 + $0x7b0] sm:$0xff] }
 0x18f   :  { %4661 = vmatprep.subr.bf16.mxu1 %v4660_v13  ;;  %v1677_v8 = vld [vmem:[#allocation3 + $0x2fa8] sm:$0xff]  ;;  %v4678_v13 = vpack.c.bf16 %v1654_v45, %v1642_v4  ;;  %v4694_v4 = vpack.c.bf16 %v216_v60, %v204_v59  ;;  %v327_v59 = vld [vmem:[#allocation3 + $0x578] sm:$0xff] }
 0x190   :  { %v4424_v14 = vpack.c.bf16 %v1677_v8, %v1665_v7  ;;  %v228_v7 = vld [vmem:[#allocation3 + $0x260] sm:$0xff]  ;;  %v339_v60 = vld [vmem:[#allocation3 + $0x5d8] sm:$0xff] }
 0x191   :  { %4407 = vmatpush1.bf16.msra.mxu0 %v4406_v20  ;;  %v1678_v20 = vld [vmem:[#allocation3 + $0x2fb0] sm:$0xff]  ;;  %v240_v8 = vld [vmem:[#allocation3 + $0x2c0] sm:$0xff]  ;;  %v4968_v3 = vpack.c.bf16 %v339_v60, %v327_v59 }
 0x192   :  { %4663 = vmatpush1.bf16.msra.mxu1 %v4662_v21  ;;  %4409 = vmatprep.subr.bf16.mxu0 %v4408_v23  ;;  %v157_v21 = vld [vmem:[#allocation3 + $0x28] sm:$0xff]  ;;  %v422_v59 = vld [vmem:[#allocation3 + $0x870] sm:$0xff] }
 0x193   :  { %4665 = vmatprep.subr.bf16.mxu1 %v4664_v28  ;;  %v169_v23 = vld [vmem:[#allocation3 + $0x88] sm:$0xff]  ;;  %v4682_v28 = vpack.c.bf16 %v1678_v20, %v1666_v17  ;;  %v4698_v17 = vpack.c.bf16 %v240_v8, %v228_v7  ;;  %v351_v7 = vld [vmem:[#allocation3 + $0x638] sm:$0xff] }
 0x194   :  { %v4684_v29 = vpack.c.bf16 %v169_v23, %v157_v21  ;;  %v252_v21 = vld [vmem:[#allocation3 + $0x320] sm:$0xff]  ;;  %v363_v8 = vld [vmem:[#allocation3 + $0x698] sm:$0xff] }
 0x195   :  { %4411 = vmatpush1.bf16.msra.mxu0 %v4410_v35  ;;  %v170_v35 = vld [vmem:[#allocation3 + $0x90] sm:$0xff]  ;;  %v264_v23 = vld [vmem:[#allocation3 + $0x380] sm:$0xff]  ;;  %v4972_v16 = vpack.c.bf16 %v363_v8, %v351_v7 }
 0x196   :  { %4667 = vmatpush1.bf16.msra.mxu1 %v4666_v36  ;;  %4413 = vmatprep.subr.bf16.mxu0 %v4412_v37  ;;  %v181_v36 = vld [vmem:[#allocation3 + $0xe8] sm:$0xff]  ;;  %v446_v7 = vld [vmem:[#allocation3 + $0x930] sm:$0xff] }
 0x197   :  { %4669 = vmatprep.subr.bf16.mxu1 %v4668_v42  ;;  %v193_v37 = vld [vmem:[#allocation3 + $0x148] sm:$0xff]  ;;  %v4942_v42 = vpack.c.bf16 %v170_v35, %v158_v33  ;;  %v4702_v33 = vpack.c.bf16 %v264_v23, %v252_v21  ;;  %v375_v21 = vld [vmem:[#allocation3 + $0x6f8] sm:$0xff] }
 0x198   :  { %v4688_v43 = vpack.c.bf16 %v193_v37, %v181_v36  ;;  %v276_v36 = vld [vmem:[#allocation3 + $0x3e0] sm:$0xff]  ;;  %v387_v23 = vld [vmem:[#allocation3 + $0x758] sm:$0xff] }
 0x199   :  { %4415 = vmatpush1.bf16.msra.mxu0 %v4414_v49  ;;  %v194_v49 = vld [vmem:[#allocation3 + $0x150] sm:$0xff]  ;;  %v288_v37 = vld [vmem:[#allocation3 + $0x440] sm:$0xff]  ;;  %v4976_v31 = vpack.c.bf16 %v387_v23, %v375_v21 }
 0x19a   :  { %4671 = vmatpush1.bf16.msra.mxu1 %v4670_v50  ;;  %4417 = vmatprep.subr.bf16.mxu0 %v4416_v52  ;;  %v205_v50 = vld [vmem:[#allocation3 + $0x1a8] sm:$0xff]  ;;  %v470_v21 = vld [vmem:[#allocation3 + $0x9f0] sm:$0xff] }
 0x19b   :  { %4673 = vmatprep.subr.bf16.mxu1 %v4672_v56  ;;  %v217_v52 = vld [vmem:[#allocation3 + $0x208] sm:$0xff]  ;;  %v4946_v56 = vpack.c.bf16 %v194_v49, %v182_v47  ;;  %v4706_v47 = vpack.c.bf16 %v288_v37, %v276_v36  ;;  %v399_v36 = vld [vmem:[#allocation3 + $0x7b8] sm:$0xff] }
 0x19c   :  { %v4692_v57 = vpack.c.bf16 %v217_v52, %v205_v50  ;;  %v300_v50 = vld [vmem:[#allocation3 + $0x4a0] sm:$0xff]  ;;  %v411_v37 = vld [vmem:[#allocation3 + $0x818] sm:$0xff] }
 0x19d   :  { %4419 = vmatpush1.bf16.msra.mxu0 %v4418_v63  ;;  %v218_v63 = vld [vmem:[#allocation3 + $0x210] sm:$0xff]  ;;  %v312_v52 = vld [vmem:[#allocation3 + $0x500] sm:$0xff]  ;;  %v4980_v46 = vpack.c.bf16 %v411_v37, %v399_v36 }
 0x19e   :  { %4675 = vmatpush1.bf16.msra.mxu1 %v4674_v0  ;;  %4421 = vmatprep.subr.bf16.mxu0 %v4420_v1  ;;  %v229_v0 = vld [vmem:[#allocation3 + $0x268] sm:$0xff]  ;;  %v494_v36 = vld [vmem:[#allocation3 + $0xab0] sm:$0xff] }
 0x19f   :  { %4677 = vmatprep.subr.bf16.mxu1 %v4676_v5  ;;  %v241_v1 = vld [vmem:[#allocation3 + $0x2c8] sm:$0xff]  ;;  %v4950_v5 = vpack.c.bf16 %v218_v63, %v206_v61  ;;  %v4710_v61 = vpack.c.bf16 %v312_v52, %v300_v50  ;;  %v423_v50 = vld [vmem:[#allocation3 + $0x878] sm:$0xff] }
 0x1a0   :  { %v4696_v45 = vpack.c.bf16 %v241_v1, %v229_v0  ;;  %v324_v0 = vld [vmem:[#allocation3 + $0x560] sm:$0xff]  ;;  %v435_v52 = vld [vmem:[#allocation3 + $0x8d8] sm:$0xff] }
 0x1a1   :  { %4423 = vmatpush1.bf16.msra.mxu0 %v4422_v12  ;;  %v242_v12 = vld [vmem:[#allocation3 + $0x2d0] sm:$0xff]  ;;  %v336_v1 = vld [vmem:[#allocation3 + $0x5c0] sm:$0xff]  ;;  %v4984_v60 = vpack.c.bf16 %v435_v52, %v423_v50 }
 0x1a2   :  { %4679 = vmatpush1.bf16.msra.mxu1 %v4678_v13  ;;  %4425 = vmatprep.subr.bf16.mxu0 %v4424_v14  ;;  %v253_v13 = vld [vmem:[#allocation3 + $0x328] sm:$0xff]  ;;  %v518_v50 = vld [vmem:[#allocation3 + $0xb70] sm:$0xff] }
 0x1a3   :  { %4681 = vmatprep.subr.bf16.mxu1 %v4680_v18  ;;  %v265_v14 = vld [vmem:[#allocation3 + $0x388] sm:$0xff]  ;;  %v4954_v18 = vpack.c.bf16 %v242_v12, %v230_v9  ;;  %v4714_v9 = vpack.c.bf16 %v336_v1, %v324_v0  ;;  %v447_v0 = vld [vmem:[#allocation3 + $0x938] sm:$0xff] }
 0x1a4   :  { %v4700_v20 = vpack.c.bf16 %v265_v14, %v253_v13  ;;  %v348_v13 = vld [vmem:[#allocation3 + $0x620] sm:$0xff]  ;;  %v459_v1 = vld [vmem:[#allocation3 + $0x998] sm:$0xff] }
 0x1a5   :  { %4427 = vmatpush1.bf16.msra.mxu0 %v4426_v27  ;;  %v266_v27 = vld [vmem:[#allocation3 + $0x390] sm:$0xff]  ;;  %v360_v14 = vld [vmem:[#allocation3 + $0x680] sm:$0xff]  ;;  %v4988_v8 = vpack.c.bf16 %v459_v1, %v447_v0 }
 0x1a6   :  { %4683 = vmatpush1.bf16.msra.mxu1 %v4682_v28  ;;  %4685 = vmatprep.subr.bf16.mxu0 %v4684_v29  ;;  %v277_v28 = vld [vmem:[#allocation3 + $0x3e8] sm:$0xff]  ;;  %v542_v0 = vld [vmem:[#allocation3 + $0xc30] sm:$0xff] }
 0x1a7   :  { %4941 = vmatprep.subr.bf16.mxu1 %v4940_v34  ;;  %v289_v29 = vld [vmem:[#allocation3 + $0x448] sm:$0xff]  ;;  %v4958_v34 = vpack.c.bf16 %v266_v27, %v254_v22  ;;  %v4718_v22 = vpack.c.bf16 %v360_v14, %v348_v13  ;;  %v471_v13 = vld [vmem:[#allocation3 + $0x9f8] sm:$0xff] }
 0x1a8   :  { %2010 = vmatmul.mubr.f32.vlgmr.msra.gmra.mrb[0].mxu0 %v6322_v6  ;;  %v4704_v35 = vpack.c.bf16 %v289_v29, %v277_v28  ;;  %v372_v28 = vld [vmem:[#allocation3 + $0x6e0] sm:$0xff]  ;;  %v483_v14 = vld [vmem:[#allocation3 + $0xa58] sm:$0xff] }
 0x1a9   :  { %2294 = vmatmul.mubr.f32.vlgmr.msra.gmra.mrb[0].mxu1 %v6322_v6  ;;  %4687 = vmatpush1.bf16.msra.mxu0 %v4686_v41  ;;  %v290_v41 = vld [vmem:[#allocation3 + $0x450] sm:$0xff]  ;;  %v384_v29 = vld [vmem:[#allocation3 + $0x740] sm:$0xff]  ;;  %v4992_v23 = vpack.c.bf16 %v483_v14, %v471_v13 }
 0x1aa   :  { %4943 = vmatpush1.bf16.msra.mxu1 %v4942_v42  ;;  %4689 = vmatprep.subr.bf16.mxu0 %v4688_v43  ;;  %v301_v42 = vld [vmem:[#allocation3 + $0x4a8] sm:$0xff]  ;;  %v566_v13 = vld [vmem:[#allocation3 + $0xcf0] sm:$0xff] }
 0x1ab   :  { %4945 = vmatprep.subr.bf16.mxu1 %v4944_v48  ;;  %2364 = vmatprep.mubr.f32.mxu0 %v6285_v32  ;;  %v313_v43 = vld [vmem:[#allocation3 + $0x508] sm:$0xff]  ;;  %v4962_v48 = vpack.c.bf16 %v290_v41, %v278_v39  ;;  %v4722_v39 = vpack.c.bf16 %v384_v29, %v372_v28  ;;  %v495_v28 = vld [vmem:[#allocation3 + $0xab8] sm:$0xff] }
 0x1ac   :  { %2648 = vmatprep.mubr.f32.mxu1 %v6285_v32  ;;  %v4708_v49 = vpack.c.bf16 %v313_v43, %v301_v42  ;;  %v396_v42 = vld [vmem:[#allocation3 + $0x7a0] sm:$0xff]  ;;  %v507_v29 = vld [vmem:[#allocation3 + $0xb18] sm:$0xff] }
 0x1ad   :  { %4691 = vmatpush1.bf16.msra.mxu0 %v4690_v55  ;;  %v314_v55 = vld [vmem:[#allocation3 + $0x510] sm:$0xff]  ;;  %v408_v43 = vld [vmem:[#allocation3 + $0x800] sm:$0xff]  ;;  %v4996_v37 = vpack.c.bf16 %v507_v29, %v495_v28 }
 0x1ae   :  { %4947 = vmatpush1.bf16.msra.mxu1 %v4946_v56  ;;  %4693 = vmatprep.subr.bf16.mxu0 %v4692_v57  ;;  %v325_v56 = vld [vmem:[#allocation3 + $0x568] sm:$0xff]  ;;  %v590_v28 = vld [vmem:[#allocation3 + $0xdb0] sm:$0xff] }
 0x1af   :  { %4949 = vmatprep.subr.bf16.mxu1 %v4948_v62  ;;  %v337_v57 = vld [vmem:[#allocation3 + $0x5c8] sm:$0xff]  ;;  %v4966_v62 = vpack.c.bf16 %v314_v55, %v302_v53  ;;  %v4726_v53 = vpack.c.bf16 %v408_v43, %v396_v42  ;;  %v519_v42 = vld [vmem:[#allocation3 + $0xb78] sm:$0xff] }
 0x1b0   :  { %v4712_v63 = vpack.c.bf16 %v337_v57, %v325_v56  ;;  %v420_v56 = vld [vmem:[#allocation3 + $0x860] sm:$0xff]  ;;  %v531_v43 = vld [vmem:[#allocation3 + $0xbd8] sm:$0xff] }
 0x1b1   :  { %4695 = vmatpush1.bf16.msra.mxu0 %v4694_v4  ;;  %v338_v4 = vld [vmem:[#allocation3 + $0x5d0] sm:$0xff]  ;;  %v432_v57 = vld [vmem:[#allocation3 + $0x8c0] sm:$0xff]  ;;  %v5000_v52 = vpack.c.bf16 %v531_v43, %v519_v42 }
 0x1b2   :  { %4951 = vmatpush1.bf16.msra.mxu1 %v4950_v5  ;;  %4697 = vmatprep.subr.bf16.mxu0 %v4696_v45  ;;  %v349_v5 = vld [vmem:[#allocation3 + $0x628] sm:$0xff]  ;;  %v614_v42 = vld [vmem:[#allocation3 + $0xe70] sm:$0xff] }
 0x1b3   :  { %4953 = vmatprep.subr.bf16.mxu1 %v4952_v10  ;;  %v361_v45 = vld [vmem:[#allocation3 + $0x688] sm:$0xff]  ;;  %v4970_v10 = vpack.c.bf16 %v338_v4, %v326_v2  ;;  %v4730_v2 = vpack.c.bf16 %v432_v57, %v420_v56  ;;  %v543_v56 = vld [vmem:[#allocation3 + $0xc38] sm:$0xff] }
 0x1b4   :  { %v4716_v12 = vpack.c.bf16 %v361_v45, %v349_v5  ;;  %v444_v5 = vld [vmem:[#allocation3 + $0x920] sm:$0xff]  ;;  %v555_v57 = vld [vmem:[#allocation3 + $0xc98] sm:$0xff] }
 0x1b5   :  { %4699 = vmatpush1.bf16.msra.mxu0 %v4698_v17  ;;  %v362_v17 = vld [vmem:[#allocation3 + $0x690] sm:$0xff]  ;;  %v456_v45 = vld [vmem:[#allocation3 + $0x980] sm:$0xff]  ;;  %v5004_v1 = vpack.c.bf16 %v555_v57, %v543_v56 }
 0x1b6   :  { %4955 = vmatpush1.bf16.msra.mxu1 %v4954_v18  ;;  %4701 = vmatprep.subr.bf16.mxu0 %v4700_v20  ;;  %v373_v18 = vld [vmem:[#allocation3 + $0x6e8] sm:$0xff]  ;;  %v638_v56 = vld [vmem:[#allocation3 + $0xf30] sm:$0xff] }
 0x1b7   :  { %4957 = vmatprep.subr.bf16.mxu1 %v4956_v26  ;;  %v385_v20 = vld [vmem:[#allocation3 + $0x748] sm:$0xff]  ;;  %v4974_v26 = vpack.c.bf16 %v362_v17, %v350_v15  ;;  %v4734_v15 = vpack.c.bf16 %v456_v45, %v444_v5  ;;  %v567_v5 = vld [vmem:[#allocation3 + $0xcf8] sm:$0xff] }
 0x1b8   :  { %v4720_v27 = vpack.c.bf16 %v385_v20, %v373_v18  ;;  %v468_v18 = vld [vmem:[#allocation3 + $0x9e0] sm:$0xff]  ;;  %v579_v45 = vld [vmem:[#allocation3 + $0xd58] sm:$0xff] }
 0x1b9   :  { %4703 = vmatpush1.bf16.msra.mxu0 %v4702_v33  ;;  %v386_v33 = vld [vmem:[#allocation3 + $0x750] sm:$0xff]  ;;  %v480_v20 = vld [vmem:[#allocation3 + $0xa40] sm:$0xff]  ;;  %v5008_v14 = vpack.c.bf16 %v579_v45, %v567_v5 }
 0x1ba   :  { %4959 = vmatpush1.bf16.msra.mxu1 %v4958_v34  ;;  %4705 = vmatprep.subr.bf16.mxu0 %v4704_v35  ;;  %v397_v34 = vld [vmem:[#allocation3 + $0x7a8] sm:$0xff]  ;;  %v662_v5 = vld [vmem:[#allocation3 + $0xff0] sm:$0xff] }
 0x1bb   :  { %4961 = vmatprep.subr.bf16.mxu1 %v4960_v40  ;;  %v409_v35 = vld [vmem:[#allocation3 + $0x808] sm:$0xff]  ;;  %v4978_v40 = vpack.c.bf16 %v386_v33, %v374_v30  ;;  %v4738_v30 = vpack.c.bf16 %v480_v20, %v468_v18  ;;  %v591_v18 = vld [vmem:[#allocation3 + $0xdb8] sm:$0xff] }
 0x1bc   :  { %v4724_v41 = vpack.c.bf16 %v409_v35, %v397_v34  ;;  %v492_v34 = vld [vmem:[#allocation3 + $0xaa0] sm:$0xff]  ;;  %v603_v20 = vld [vmem:[#allocation3 + $0xe18] sm:$0xff] }
 0x1bd   :  { %4707 = vmatpush1.bf16.msra.mxu0 %v4706_v47  ;;  %v410_v47 = vld [vmem:[#allocation3 + $0x810] sm:$0xff]  ;;  %v504_v35 = vld [vmem:[#allocation3 + $0xb00] sm:$0xff]  ;;  %v5012_v29 = vpack.c.bf16 %v603_v20, %v591_v18 }
 0x1be   :  { %4963 = vmatpush1.bf16.msra.mxu1 %v4962_v48  ;;  %4709 = vmatprep.subr.bf16.mxu0 %v4708_v49  ;;  %v421_v48 = vld [vmem:[#allocation3 + $0x868] sm:$0xff]  ;;  %v686_v18 = vld [vmem:[#allocation3 + $0x10b0] sm:$0xff] }
 0x1bf   :  { %4965 = vmatprep.subr.bf16.mxu1 %v4964_v54  ;;  %v433_v49 = vld [vmem:[#allocation3 + $0x8c8] sm:$0xff]  ;;  %v4982_v54 = vpack.c.bf16 %v410_v47, %v398_v44  ;;  %v4742_v44 = vpack.c.bf16 %v504_v35, %v492_v34  ;;  %v615_v34 = vld [vmem:[#allocation3 + $0xe78] sm:$0xff] }
 0x1c0   :  { %v4728_v55 = vpack.c.bf16 %v433_v49, %v421_v48  ;;  %v516_v48 = vld [vmem:[#allocation3 + $0xb60] sm:$0xff]  ;;  %v627_v35 = vld [vmem:[#allocation3 + $0xed8] sm:$0xff] }
 0x1c1   :  { %4711 = vmatpush1.bf16.msra.mxu0 %v4710_v61  ;;  %v434_v61 = vld [vmem:[#allocation3 + $0x8d0] sm:$0xff]  ;;  %v528_v49 = vld [vmem:[#allocation3 + $0xbc0] sm:$0xff]  ;;  %v5016_v43 = vpack.c.bf16 %v627_v35, %v615_v34 }
 0x1c2   :  { %4967 = vmatpush1.bf16.msra.mxu1 %v4966_v62  ;;  %4713 = vmatprep.subr.bf16.mxu0 %v4712_v63  ;;  %v445_v62 = vld [vmem:[#allocation3 + $0x928] sm:$0xff]  ;;  %v710_v34 = vld [vmem:[#allocation3 + $0x1170] sm:$0xff] }
 0x1c3   :  { %4969 = vmatprep.subr.bf16.mxu1 %v4968_v3  ;;  %v457_v63 = vld [vmem:[#allocation3 + $0x988] sm:$0xff]  ;;  %v4986_v3 = vpack.c.bf16 %v434_v61, %v422_v59  ;;  %v4746_v59 = vpack.c.bf16 %v528_v49, %v516_v48  ;;  %v639_v48 = vld [vmem:[#allocation3 + $0xf38] sm:$0xff] }
 0x1c4   :  { %v4732_v4 = vpack.c.bf16 %v457_v63, %v445_v62  ;;  %v540_v62 = vld [vmem:[#allocation3 + $0xc20] sm:$0xff]  ;;  %v651_v49 = vld [vmem:[#allocation3 + $0xf98] sm:$0xff] }
 0x1c5   :  { %4715 = vmatpush1.bf16.msra.mxu0 %v4714_v9  ;;  %v458_v9 = vld [vmem:[#allocation3 + $0x990] sm:$0xff]  ;;  %v552_v63 = vld [vmem:[#allocation3 + $0xc80] sm:$0xff]  ;;  %v5020_v57 = vpack.c.bf16 %v651_v49, %v639_v48 }
 0x1c6   :  { %4971 = vmatpush1.bf16.msra.mxu1 %v4970_v10  ;;  %4717 = vmatprep.subr.bf16.mxu0 %v4716_v12  ;;  %v469_v10 = vld [vmem:[#allocation3 + $0x9e8] sm:$0xff]  ;;  %v734_v48 = vld [vmem:[#allocation3 + $0x1230] sm:$0xff] }
 0x1c7   :  { %4973 = vmatprep.subr.bf16.mxu1 %v4972_v16  ;;  %v481_v12 = vld [vmem:[#allocation3 + $0xa48] sm:$0xff]  ;;  %v4990_v16 = vpack.c.bf16 %v458_v9, %v446_v7  ;;  %v4750_v7 = vpack.c.bf16 %v552_v63, %v540_v62  ;;  %v663_v62 = vld [vmem:[#allocation3 + $0xff8] sm:$0xff] }
 0x1c8   :  { %v4736_v17 = vpack.c.bf16 %v481_v12, %v469_v10  ;;  %v564_v10 = vld [vmem:[#allocation3 + $0xce0] sm:$0xff]  ;;  %v675_v63 = vld [vmem:[#allocation3 + $0x1058] sm:$0xff] }
 0x1c9   :  { %4719 = vmatpush1.bf16.msra.mxu0 %v4718_v22  ;;  %v482_v22 = vld [vmem:[#allocation3 + $0xa50] sm:$0xff]  ;;  %v576_v12 = vld [vmem:[#allocation3 + $0xd40] sm:$0xff]  ;;  %v5024_v45 = vpack.c.bf16 %v675_v63, %v663_v62 }
 0x1ca   :  { %4975 = vmatpush1.bf16.msra.mxu1 %v4974_v26  ;;  %4721 = vmatprep.subr.bf16.mxu0 %v4720_v27  ;;  %v493_v26 = vld [vmem:[#allocation3 + $0xaa8] sm:$0xff]  ;;  %v758_v62 = vld [vmem:[#allocation3 + $0x12f0] sm:$0xff] }
 0x1cb   :  { %4977 = vmatprep.subr.bf16.mxu1 %v4976_v31  ;;  %v505_v27 = vld [vmem:[#allocation3 + $0xb08] sm:$0xff]  ;;  %v4994_v31 = vpack.c.bf16 %v482_v22, %v470_v21  ;;  %v4754_v21 = vpack.c.bf16 %v576_v12, %v564_v10  ;;  %v687_v10 = vld [vmem:[#allocation3 + $0x10b8] sm:$0xff] }
 0x1cc   :  { %v4740_v33 = vpack.c.bf16 %v505_v27, %v493_v26  ;;  %v588_v26 = vld [vmem:[#allocation3 + $0xda0] sm:$0xff]  ;;  %v699_v12 = vld [vmem:[#allocation3 + $0x1118] sm:$0xff] }
 0x1cd   :  { %4723 = vmatpush1.bf16.msra.mxu0 %v4722_v39  ;;  %v506_v39 = vld [vmem:[#allocation3 + $0xb10] sm:$0xff]  ;;  %v600_v27 = vld [vmem:[#allocation3 + $0xe00] sm:$0xff]  ;;  %v5028_v20 = vpack.c.bf16 %v699_v12, %v687_v10 }
 0x1ce   :  { %4979 = vmatpush1.bf16.msra.mxu1 %v4978_v40  ;;  %4725 = vmatprep.subr.bf16.mxu0 %v4724_v41  ;;  %v517_v40 = vld [vmem:[#allocation3 + $0xb68] sm:$0xff]  ;;  %v782_v10 = vld [vmem:[#allocation3 + $0x13b0] sm:$0xff] }
 0x1cf   :  { %4981 = vmatprep.subr.bf16.mxu1 %v4980_v46  ;;  %v529_v41 = vld [vmem:[#allocation3 + $0xbc8] sm:$0xff]  ;;  %v4998_v46 = vpack.c.bf16 %v506_v39, %v494_v36  ;;  %v4758_v36 = vpack.c.bf16 %v600_v27, %v588_v26  ;;  %v711_v26 = vld [vmem:[#allocation3 + $0x1178] sm:$0xff] }
 0x1d0   :  { %v4744_v47 = vpack.c.bf16 %v529_v41, %v517_v40  ;;  %v612_v40 = vld [vmem:[#allocation3 + $0xe60] sm:$0xff]  ;;  %v723_v27 = vld [vmem:[#allocation3 + $0x11d8] sm:$0xff] }
 0x1d1   :  { %4727 = vmatpush1.bf16.msra.mxu0 %v4726_v53  ;;  %v530_v53 = vld [vmem:[#allocation3 + $0xbd0] sm:$0xff]  ;;  %v624_v41 = vld [vmem:[#allocation3 + $0xec0] sm:$0xff]  ;;  %v5032_v35 = vpack.c.bf16 %v723_v27, %v711_v26 }
 0x1d2   :  { %4983 = vmatpush1.bf16.msra.mxu1 %v4982_v54  ;;  %4729 = vmatprep.subr.bf16.mxu0 %v4728_v55  ;;  %v541_v54 = vld [vmem:[#allocation3 + $0xc28] sm:$0xff]  ;;  %v806_v26 = vld [vmem:[#allocation3 + $0x1470] sm:$0xff] }
 0x1d3   :  { %4985 = vmatprep.subr.bf16.mxu1 %v4984_v60  ;;  %v553_v55 = vld [vmem:[#allocation3 + $0xc88] sm:$0xff]  ;;  %v5002_v60 = vpack.c.bf16 %v530_v53, %v518_v50  ;;  %v4762_v50 = vpack.c.bf16 %v624_v41, %v612_v40  ;;  %v735_v40 = vld [vmem:[#allocation3 + $0x1238] sm:$0xff] }
 0x1d4   :  { %v4748_v61 = vpack.c.bf16 %v553_v55, %v541_v54  ;;  %v636_v54 = vld [vmem:[#allocation3 + $0xf20] sm:$0xff]  ;;  %v747_v41 = vld [vmem:[#allocation3 + $0x1298] sm:$0xff] }
 0x1d5   :  { %4731 = vmatpush1.bf16.msra.mxu0 %v4730_v2  ;;  %v554_v2 = vld [vmem:[#allocation3 + $0xc90] sm:$0xff]  ;;  %v648_v55 = vld [vmem:[#allocation3 + $0xf80] sm:$0xff]  ;;  %v5036_v49 = vpack.c.bf16 %v747_v41, %v735_v40 }
 0x1d6   :  { %4987 = vmatpush1.bf16.msra.mxu1 %v4986_v3  ;;  %4733 = vmatprep.subr.bf16.mxu0 %v4732_v4  ;;  %v565_v3 = vld [vmem:[#allocation3 + $0xce8] sm:$0xff]  ;;  %v830_v40 = vld [vmem:[#allocation3 + $0x1530] sm:$0xff] }
 0x1d7   :  { %4989 = vmatprep.subr.bf16.mxu1 %v4988_v8  ;;  %v577_v4 = vld [vmem:[#allocation3 + $0xd48] sm:$0xff]  ;;  %v5006_v8 = vpack.c.bf16 %v554_v2, %v542_v0  ;;  %v4766_v0 = vpack.c.bf16 %v648_v55, %v636_v54  ;;  %v759_v54 = vld [vmem:[#allocation3 + $0x12f8] sm:$0xff] }
 0x1d8   :  { %v4752_v9 = vpack.c.bf16 %v577_v4, %v565_v3  ;;  %v660_v3 = vld [vmem:[#allocation3 + $0xfe0] sm:$0xff]  ;;  %v771_v55 = vld [vmem:[#allocation3 + $0x1358] sm:$0xff] }
 0x1d9   :  { %4735 = vmatpush1.bf16.msra.mxu0 %v4734_v15  ;;  %v578_v15 = vld [vmem:[#allocation3 + $0xd50] sm:$0xff]  ;;  %v672_v4 = vld [vmem:[#allocation3 + $0x1040] sm:$0xff]  ;;  %v5040_v63 = vpack.c.bf16 %v771_v55, %v759_v54 }
 0x1da   :  { %4991 = vmatpush1.bf16.msra.mxu1 %v4990_v16  ;;  %4737 = vmatprep.subr.bf16.mxu0 %v4736_v17  ;;  %v589_v16 = vld [vmem:[#allocation3 + $0xda8] sm:$0xff]  ;;  %v854_v54 = vld [vmem:[#allocation3 + $0x15f0] sm:$0xff] }
 0x1db   :  { %4993 = vmatprep.subr.bf16.mxu1 %v4992_v23  ;;  %v601_v17 = vld [vmem:[#allocation3 + $0xe08] sm:$0xff]  ;;  %v5010_v23 = vpack.c.bf16 %v578_v15, %v566_v13  ;;  %v4770_v13 = vpack.c.bf16 %v672_v4, %v660_v3  ;;  %v783_v3 = vld [vmem:[#allocation3 + $0x13b8] sm:$0xff] }
 0x1dc   :  { %v4756_v22 = vpack.c.bf16 %v601_v17, %v589_v16  ;;  %v684_v16 = vld [vmem:[#allocation3 + $0x10a0] sm:$0xff]  ;;  %v795_v4 = vld [vmem:[#allocation3 + $0x1418] sm:$0xff] }
 0x1dd   :  { %4739 = vmatpush1.bf16.msra.mxu0 %v4738_v30  ;;  %v602_v30 = vld [vmem:[#allocation3 + $0xe10] sm:$0xff]  ;;  %v696_v17 = vld [vmem:[#allocation3 + $0x1100] sm:$0xff]  ;;  %v5044_v12 = vpack.c.bf16 %v795_v4, %v783_v3 }
 0x1de   :  { %4995 = vmatpush1.bf16.msra.mxu1 %v4994_v31  ;;  %4741 = vmatprep.subr.bf16.mxu0 %v4740_v33  ;;  %v613_v31 = vld [vmem:[#allocation3 + $0xe68] sm:$0xff]  ;;  %v878_v3 = vld [vmem:[#allocation3 + $0x16b0] sm:$0xff] }
 0x1df   :  { %4997 = vmatprep.subr.bf16.mxu1 %v4996_v37  ;;  %v625_v33 = vld [vmem:[#allocation3 + $0xec8] sm:$0xff]  ;;  %v5014_v37 = vpack.c.bf16 %v602_v30, %v590_v28  ;;  %v4774_v28 = vpack.c.bf16 %v696_v17, %v684_v16  ;;  %v807_v16 = vld [vmem:[#allocation3 + $0x1478] sm:$0xff] }
 0x1e0   :  { %v4760_v39 = vpack.c.bf16 %v625_v33, %v613_v31  ;;  %v708_v31 = vld [vmem:[#allocation3 + $0x1160] sm:$0xff]  ;;  %v819_v17 = vld [vmem:[#allocation3 + $0x14d8] sm:$0xff] }
 0x1e1   :  { %4743 = vmatpush1.bf16.msra.mxu0 %v4742_v44  ;;  %v626_v44 = vld [vmem:[#allocation3 + $0xed0] sm:$0xff]  ;;  %v720_v33 = vld [vmem:[#allocation3 + $0x11c0] sm:$0xff]  ;;  %v5048_v27 = vpack.c.bf16 %v819_v17, %v807_v16 }
 0x1e2   :  { %4999 = vmatpush1.bf16.msra.mxu1 %v4998_v46  ;;  %4745 = vmatprep.subr.bf16.mxu0 %v4744_v47  ;;  %v637_v46 = vld [vmem:[#allocation3 + $0xf28] sm:$0xff]  ;;  %v902_v16 = vld [vmem:[#allocation3 + $0x1770] sm:$0xff] }
 0x1e3   :  { %5001 = vmatprep.subr.bf16.mxu1 %v5000_v52  ;;  %v649_v47 = vld [vmem:[#allocation3 + $0xf88] sm:$0xff]  ;;  %v5018_v52 = vpack.c.bf16 %v626_v44, %v614_v42  ;;  %v4778_v42 = vpack.c.bf16 %v720_v33, %v708_v31  ;;  %v831_v31 = vld [vmem:[#allocation3 + $0x1538] sm:$0xff] }
 0x1e4   :  { %v4764_v53 = vpack.c.bf16 %v649_v47, %v637_v46  ;;  %v732_v46 = vld [vmem:[#allocation3 + $0x1220] sm:$0xff]  ;;  %v843_v33 = vld [vmem:[#allocation3 + $0x1598] sm:$0xff] }
 0x1e5   :  { %4747 = vmatpush1.bf16.msra.mxu0 %v4746_v59  ;;  %v650_v59 = vld [vmem:[#allocation3 + $0xf90] sm:$0xff]  ;;  %v744_v47 = vld [vmem:[#allocation3 + $0x1280] sm:$0xff]  ;;  %v5052_v41 = vpack.c.bf16 %v843_v33, %v831_v31 }
 0x1e6   :  { %5003 = vmatpush1.bf16.msra.mxu1 %v5002_v60  ;;  %4749 = vmatprep.subr.bf16.mxu0 %v4748_v61  ;;  %v661_v60 = vld [vmem:[#allocation3 + $0xfe8] sm:$0xff]  ;;  %v926_v31 = vld [vmem:[#allocation3 + $0x1830] sm:$0xff] }
 0x1e7   :  { %5005 = vmatprep.subr.bf16.mxu1 %v5004_v1  ;;  %v673_v61 = vld [vmem:[#allocation3 + $0x1048] sm:$0xff]  ;;  %v5022_v1 = vpack.c.bf16 %v650_v59, %v638_v56  ;;  %v4782_v56 = vpack.c.bf16 %v744_v47, %v732_v46  ;;  %v855_v46 = vld [vmem:[#allocation3 + $0x15f8] sm:$0xff] }
 0x1e8   :  { %2365 = vmatmul.mubr.f32.vlgmr.msra.gmra.mrb[2].mxu0 %v6281_v25  ;;  %v4768_v2 = vpack.c.bf16 %v673_v61, %v661_v60  ;;  %v756_v60 = vld [vmem:[#allocation3 + $0x12e0] sm:$0xff]  ;;  %v867_v47 = vld [vmem:[#allocation3 + $0x1658] sm:$0xff] }
 0x1e9   :  { %4751 = vmatpush1.bf16.msra.mxu0 %v4750_v7  ;;  %2649 = vmatmul.mubr.f32.vlgmr.msra.gmra.mrb[2].mxu1 %v6281_v25  ;;  %v674_v7 = vld [vmem:[#allocation3 + $0x1050] sm:$0xff]  ;;  %v768_v61 = vld [vmem:[#allocation3 + $0x1340] sm:$0xff]  ;;  %v5056_v55 = vpack.c.bf16 %v867_v47, %v855_v46 }
 0x1ea   :  { %5007 = vmatpush1.bf16.msra.mxu1 %v5006_v8  ;;  %4753 = vmatprep.subr.bf16.mxu0 %v4752_v9  ;;  %v685_v8 = vld [vmem:[#allocation3 + $0x10a8] sm:$0xff]  ;;  %v950_v46 = vld [vmem:[#allocation3 + $0x18f0] sm:$0xff] }
 0x1eb   :  { %5009 = vmatprep.subr.bf16.mxu1 %v5008_v14  ;;  %2435 = vmatprep.mubr.f32.mxu0 %v6296_v38  ;;  %v697_v9 = vld [vmem:[#allocation3 + $0x1108] sm:$0xff]  ;;  %v5026_v14 = vpack.c.bf16 %v674_v7, %v662_v5  ;;  %v4786_v5 = vpack.c.bf16 %v768_v61, %v756_v60  ;;  %v879_v60 = vld [vmem:[#allocation3 + $0x16b8] sm:$0xff] }
 0x1ec   :  { %2719 = vmatprep.mubr.f32.mxu1 %v6296_v38  ;;  %v4772_v15 = vpack.c.bf16 %v697_v9, %v685_v8  ;;  %v780_v8 = vld [vmem:[#allocation3 + $0x13a0] sm:$0xff]  ;;  %v891_v61 = vld [vmem:[#allocation3 + $0x1718] sm:$0xff] }
 0x1ed   :  { %4755 = vmatpush1.bf16.msra.mxu0 %v4754_v21  ;;  %v698_v21 = vld [vmem:[#allocation3 + $0x1110] sm:$0xff]  ;;  %v792_v9 = vld [vmem:[#allocation3 + $0x1400] sm:$0xff]  ;;  %v5060_v4 = vpack.c.bf16 %v891_v61, %v879_v60 }
 0x1ee   :  { %5011 = vmatpush1.bf16.msra.mxu1 %v5010_v23  ;;  %4757 = vmatprep.subr.bf16.mxu0 %v4756_v22  ;;  %v709_v23 = vld [vmem:[#allocation3 + $0x1168] sm:$0xff]  ;;  %v974_v60 = vld [vmem:[#allocation3 + $0x19b0] sm:$0xff] }
 0x1ef   :  { %5013 = vmatprep.subr.bf16.mxu1 %v5012_v29  ;;  %v721_v22 = vld [vmem:[#allocation3 + $0x11c8] sm:$0xff]  ;;  %v5030_v29 = vpack.c.bf16 %v698_v21, %v686_v18  ;;  %v4790_v18 = vpack.c.bf16 %v792_v9, %v780_v8  ;;  %v903_v8 = vld [vmem:[#allocation3 + $0x1778] sm:$0xff] }
 0x1f0   :  { %v4776_v30 = vpack.c.bf16 %v721_v22, %v709_v23  ;;  %v804_v23 = vld [vmem:[#allocation3 + $0x1460] sm:$0xff]  ;;  %v915_v9 = vld [vmem:[#allocation3 + $0x17d8] sm:$0xff] }
 0x1f1   :  { %4759 = vmatpush1.bf16.msra.mxu0 %v4758_v36  ;;  %v722_v36 = vld [vmem:[#allocation3 + $0x11d0] sm:$0xff]  ;;  %v816_v22 = vld [vmem:[#allocation3 + $0x14c0] sm:$0xff]  ;;  %v5064_v17 = vpack.c.bf16 %v915_v9, %v903_v8 }
 0x1f2   :  { %5015 = vmatpush1.bf16.msra.mxu1 %v5014_v37  ;;  %4761 = vmatprep.subr.bf16.mxu0 %v4760_v39  ;;  %v733_v37 = vld [vmem:[#allocation3 + $0x1228] sm:$0xff]  ;;  %v998_v8 = vld [vmem:[#allocation3 + $0x1a70] sm:$0xff] }
 0x1f3   :  { %5017 = vmatprep.subr.bf16.mxu1 %v5016_v43  ;;  %v745_v39 = vld [vmem:[#allocation3 + $0x1288] sm:$0xff]  ;;  %v5034_v43 = vpack.c.bf16 %v722_v36, %v710_v34  ;;  %v4794_v34 = vpack.c.bf16 %v816_v22, %v804_v23  ;;  %v927_v23 = vld [vmem:[#allocation3 + $0x1838] sm:$0xff] }
 0x1f4   :  { %v4780_v44 = vpack.c.bf16 %v745_v39, %v733_v37  ;;  %v828_v37 = vld [vmem:[#allocation3 + $0x1520] sm:$0xff]  ;;  %v939_v22 = vld [vmem:[#allocation3 + $0x1898] sm:$0xff] }
 0x1f5   :  { %4763 = vmatpush1.bf16.msra.mxu0 %v4762_v50  ;;  %v746_v50 = vld [vmem:[#allocation3 + $0x1290] sm:$0xff]  ;;  %v840_v39 = vld [vmem:[#allocation3 + $0x1580] sm:$0xff]  ;;  %v5068_v33 = vpack.c.bf16 %v939_v22, %v927_v23 }
 0x1f6   :  { %5019 = vmatpush1.bf16.msra.mxu1 %v5018_v52  ;;  %4765 = vmatprep.subr.bf16.mxu0 %v4764_v53  ;;  %v757_v52 = vld [vmem:[#allocation3 + $0x12e8] sm:$0xff]  ;;  %v1022_v23 = vld [vmem:[#allocation3 + $0x1b30] sm:$0xff] }
 0x1f7   :  { %5021 = vmatprep.subr.bf16.mxu1 %v5020_v57  ;;  %v769_v53 = vld [vmem:[#allocation3 + $0x1348] sm:$0xff]  ;;  %v5038_v57 = vpack.c.bf16 %v746_v50, %v734_v48  ;;  %v4798_v48 = vpack.c.bf16 %v840_v39, %v828_v37  ;;  %v951_v37 = vld [vmem:[#allocation3 + $0x18f8] sm:$0xff] }
 0x1f8   :  { %v4784_v59 = vpack.c.bf16 %v769_v53, %v757_v52  ;;  %v852_v52 = vld [vmem:[#allocation3 + $0x15e0] sm:$0xff]  ;;  %v963_v39 = vld [vmem:[#allocation3 + $0x1958] sm:$0xff] }
 0x1f9   :  { %4767 = vmatpush1.bf16.msra.mxu0 %v4766_v0  ;;  %v770_v0 = vld [vmem:[#allocation3 + $0x1350] sm:$0xff]  ;;  %v864_v53 = vld [vmem:[#allocation3 + $0x1640] sm:$0xff]  ;;  %v5072_v47 = vpack.c.bf16 %v963_v39, %v951_v37 }
 0x1fa   :  { %5023 = vmatpush1.bf16.msra.mxu1 %v5022_v1  ;;  %4769 = vmatprep.subr.bf16.mxu0 %v4768_v2  ;;  %v781_v1 = vld [vmem:[#allocation3 + $0x13a8] sm:$0xff]  ;;  %v1046_v37 = vld [vmem:[#allocation3 + $0x1bf0] sm:$0xff] }
 0x1fb   :  { %5025 = vmatprep.subr.bf16.mxu1 %v5024_v45  ;;  %v793_v2 = vld [vmem:[#allocation3 + $0x1408] sm:$0xff]  ;;  %v5042_v45 = vpack.c.bf16 %v770_v0, %v758_v62  ;;  %v4802_v62 = vpack.c.bf16 %v864_v53, %v852_v52  ;;  %v975_v52 = vld [vmem:[#allocation3 + $0x19b8] sm:$0xff] }
 0x1fc   :  { %v4788_v7 = vpack.c.bf16 %v793_v2, %v781_v1  ;;  %v876_v1 = vld [vmem:[#allocation3 + $0x16a0] sm:$0xff]  ;;  %v987_v53 = vld [vmem:[#allocation3 + $0x1a18] sm:$0xff] }
 0x1fd   :  { %4771 = vmatpush1.bf16.msra.mxu0 %v4770_v13  ;;  %v794_v13 = vld [vmem:[#allocation3 + $0x1410] sm:$0xff]  ;;  %v888_v2 = vld [vmem:[#allocation3 + $0x1700] sm:$0xff]  ;;  %v5076_v61 = vpack.c.bf16 %v987_v53, %v975_v52 }
 0x1fe   :  { %5027 = vmatpush1.bf16.msra.mxu1 %v5026_v14  ;;  %4773 = vmatprep.subr.bf16.mxu0 %v4772_v15  ;;  %v805_v14 = vld [vmem:[#allocation3 + $0x1468] sm:$0xff]  ;;  %v1070_v52 = vld [vmem:[#allocation3 + $0x1cb0] sm:$0xff] }
 0x1ff   :  { %5029 = vmatprep.subr.bf16.mxu1 %v5028_v20  ;;  %v817_v15 = vld [vmem:[#allocation3 + $0x14c8] sm:$0xff]  ;;  %v5046_v20 = vpack.c.bf16 %v794_v13, %v782_v10  ;;  %v4806_v10 = vpack.c.bf16 %v888_v2, %v876_v1  ;;  %v999_v1 = vld [vmem:[#allocation3 + $0x1a78] sm:$0xff] }
 0x200   :  { %v4792_v21 = vpack.c.bf16 %v817_v15, %v805_v14  ;;  %v900_v14 = vld [vmem:[#allocation3 + $0x1760] sm:$0xff]  ;;  %v1011_v2 = vld [vmem:[#allocation3 + $0x1ad8] sm:$0xff] }
 0x201   :  { %4775 = vmatpush1.bf16.msra.mxu0 %v4774_v28  ;;  %v818_v28 = vld [vmem:[#allocation3 + $0x14d0] sm:$0xff]  ;;  %v912_v15 = vld [vmem:[#allocation3 + $0x17c0] sm:$0xff]  ;;  %v5080_v9 = vpack.c.bf16 %v1011_v2, %v999_v1 }
 0x202   :  { %5031 = vmatpush1.bf16.msra.mxu1 %v5030_v29  ;;  %4777 = vmatprep.subr.bf16.mxu0 %v4776_v30  ;;  %v829_v29 = vld [vmem:[#allocation3 + $0x1528] sm:$0xff]  ;;  %v1094_v1 = vld [vmem:[#allocation3 + $0x1d70] sm:$0xff] }
 0x203   :  { %5033 = vmatprep.subr.bf16.mxu1 %v5032_v35  ;;  %v841_v30 = vld [vmem:[#allocation3 + $0x1588] sm:$0xff]  ;;  %v5050_v35 = vpack.c.bf16 %v818_v28, %v806_v26  ;;  %v4810_v26 = vpack.c.bf16 %v912_v15, %v900_v14  ;;  %v1023_v14 = vld [vmem:[#allocation3 + $0x1b38] sm:$0xff] }
 0x204   :  { %v4796_v36 = vpack.c.bf16 %v841_v30, %v829_v29  ;;  %v924_v29 = vld [vmem:[#allocation3 + $0x1820] sm:$0xff]  ;;  %v1035_v15 = vld [vmem:[#allocation3 + $0x1b98] sm:$0xff] }
 0x205   :  { %4779 = vmatpush1.bf16.msra.mxu0 %v4778_v42  ;;  %v842_v42 = vld [vmem:[#allocation3 + $0x1590] sm:$0xff]  ;;  %v936_v30 = vld [vmem:[#allocation3 + $0x1880] sm:$0xff]  ;;  %v5084_v22 = vpack.c.bf16 %v1035_v15, %v1023_v14 }
 0x206   :  { %5035 = vmatpush1.bf16.msra.mxu1 %v5034_v43  ;;  %4781 = vmatprep.subr.bf16.mxu0 %v4780_v44  ;;  %v853_v43 = vld [vmem:[#allocation3 + $0x15e8] sm:$0xff]  ;;  %v1118_v14 = vld [vmem:[#allocation3 + $0x1e30] sm:$0xff] }
 0x207   :  { %5037 = vmatprep.subr.bf16.mxu1 %v5036_v49  ;;  %v865_v44 = vld [vmem:[#allocation3 + $0x1648] sm:$0xff]  ;;  %v5054_v49 = vpack.c.bf16 %v842_v42, %v830_v40  ;;  %v4814_v40 = vpack.c.bf16 %v936_v30, %v924_v29  ;;  %v1047_v29 = vld [vmem:[#allocation3 + $0x1bf8] sm:$0xff] }
 0x208   :  { %v4800_v50 = vpack.c.bf16 %v865_v44, %v853_v43  ;;  %v948_v43 = vld [vmem:[#allocation3 + $0x18e0] sm:$0xff]  ;;  %v1059_v30 = vld [vmem:[#allocation3 + $0x1c58] sm:$0xff] }
 0x209   :  { %4783 = vmatpush1.bf16.msra.mxu0 %v4782_v56  ;;  %v866_v56 = vld [vmem:[#allocation3 + $0x1650] sm:$0xff]  ;;  %v960_v44 = vld [vmem:[#allocation3 + $0x1940] sm:$0xff]  ;;  %v5088_v39 = vpack.c.bf16 %v1059_v30, %v1047_v29 }
 0x20a   :  { %5039 = vmatpush1.bf16.msra.mxu1 %v5038_v57  ;;  %4785 = vmatprep.subr.bf16.mxu0 %v4784_v59  ;;  %v877_v57 = vld [vmem:[#allocation3 + $0x16a8] sm:$0xff]  ;;  %v1142_v29 = vld [vmem:[#allocation3 + $0x1ef0] sm:$0xff] }
 0x20b   :  { %5041 = vmatprep.subr.bf16.mxu1 %v5040_v63  ;;  %v889_v59 = vld [vmem:[#allocation3 + $0x1708] sm:$0xff]  ;;  %v5058_v63 = vpack.c.bf16 %v866_v56, %v854_v54  ;;  %v4818_v54 = vpack.c.bf16 %v960_v44, %v948_v43  ;;  %v1071_v43 = vld [vmem:[#allocation3 + $0x1cb8] sm:$0xff] }
 0x20c   :  { %v4804_v0 = vpack.c.bf16 %v889_v59, %v877_v57  ;;  %v972_v57 = vld [vmem:[#allocation3 + $0x19a0] sm:$0xff]  ;;  %v1083_v44 = vld [vmem:[#allocation3 + $0x1d18] sm:$0xff] }
 0x20d   :  { %4787 = vmatpush1.bf16.msra.mxu0 %v4786_v5  ;;  %v890_v5 = vld [vmem:[#allocation3 + $0x1710] sm:$0xff]  ;;  %v984_v59 = vld [vmem:[#allocation3 + $0x1a00] sm:$0xff]  ;;  %v5092_v53 = vpack.c.bf16 %v1083_v44, %v1071_v43 }
 0x20e   :  { %5043 = vmatpush1.bf16.msra.mxu1 %v5042_v45  ;;  %4789 = vmatprep.subr.bf16.mxu0 %v4788_v7  ;;  %v901_v45 = vld [vmem:[#allocation3 + $0x1768] sm:$0xff]  ;;  %v1166_v43 = vld [vmem:[#allocation3 + $0x1fb0] sm:$0xff] }
 0x20f   :  { %5045 = vmatprep.subr.bf16.mxu1 %v5044_v12  ;;  %v913_v7 = vld [vmem:[#allocation3 + $0x17c8] sm:$0xff]  ;;  %v5062_v12 = vpack.c.bf16 %v890_v5, %v878_v3  ;;  %v4822_v3 = vpack.c.bf16 %v984_v59, %v972_v57  ;;  %v1095_v57 = vld [vmem:[#allocation3 + $0x1d78] sm:$0xff] }
 0x210   :  { %v4808_v13 = vpack.c.bf16 %v913_v7, %v901_v45  ;;  %v996_v45 = vld [vmem:[#allocation3 + $0x1a60] sm:$0xff]  ;;  %v1107_v59 = vld [vmem:[#allocation3 + $0x1dd8] sm:$0xff] }
 0x211   :  { %4791 = vmatpush1.bf16.msra.mxu0 %v4790_v18  ;;  %v914_v18 = vld [vmem:[#allocation3 + $0x17d0] sm:$0xff]  ;;  %v1008_v7 = vld [vmem:[#allocation3 + $0x1ac0] sm:$0xff]  ;;  %v5096_v2 = vpack.c.bf16 %v1107_v59, %v1095_v57 }
 0x212   :  { %5047 = vmatpush1.bf16.msra.mxu1 %v5046_v20  ;;  %4793 = vmatprep.subr.bf16.mxu0 %v4792_v21  ;;  %v925_v20 = vld [vmem:[#allocation3 + $0x1828] sm:$0xff]  ;;  %v1190_v57 = vld [vmem:[#allocation3 + $0x2070] sm:$0xff] }
 0x213   :  { %5049 = vmatprep.subr.bf16.mxu1 %v5048_v27  ;;  %v937_v21 = vld [vmem:[#allocation3 + $0x1888] sm:$0xff]  ;;  %v5066_v27 = vpack.c.bf16 %v914_v18, %v902_v16  ;;  %v4826_v16 = vpack.c.bf16 %v1008_v7, %v996_v45  ;;  %v1119_v45 = vld [vmem:[#allocation3 + $0x1e38] sm:$0xff] }
 0x214   :  { %v4812_v28 = vpack.c.bf16 %v937_v21, %v925_v20  ;;  %v1020_v20 = vld [vmem:[#allocation3 + $0x1b20] sm:$0xff]  ;;  %v1131_v7 = vld [vmem:[#allocation3 + $0x1e98] sm:$0xff] }
 0x215   :  { %4795 = vmatpush1.bf16.msra.mxu0 %v4794_v34  ;;  %v938_v34 = vld [vmem:[#allocation3 + $0x1890] sm:$0xff]  ;;  %v1032_v21 = vld [vmem:[#allocation3 + $0x1b80] sm:$0xff]  ;;  %v5100_v15 = vpack.c.bf16 %v1131_v7, %v1119_v45 }
 0x216   :  { %5051 = vmatpush1.bf16.msra.mxu1 %v5050_v35  ;;  %4797 = vmatprep.subr.bf16.mxu0 %v4796_v36  ;;  %v949_v35 = vld [vmem:[#allocation3 + $0x18e8] sm:$0xff]  ;;  %v1214_v45 = vld [vmem:[#allocation3 + $0x2130] sm:$0xff] }
 0x217   :  { %5053 = vmatprep.subr.bf16.mxu1 %v5052_v41  ;;  %v961_v36 = vld [vmem:[#allocation3 + $0x1948] sm:$0xff]  ;;  %v5070_v41 = vpack.c.bf16 %v938_v34, %v926_v31  ;;  %v4830_v31 = vpack.c.bf16 %v1032_v21, %v1020_v20  ;;  %v1143_v20 = vld [vmem:[#allocation3 + $0x1ef8] sm:$0xff] }
 0x218   :  { %v4816_v42 = vpack.c.bf16 %v961_v36, %v949_v35  ;;  %v1044_v35 = vld [vmem:[#allocation3 + $0x1be0] sm:$0xff]  ;;  %v1155_v21 = vld [vmem:[#allocation3 + $0x1f58] sm:$0xff] }
 0x219   :  { %4799 = vmatpush1.bf16.msra.mxu0 %v4798_v48  ;;  %v962_v48 = vld [vmem:[#allocation3 + $0x1950] sm:$0xff]  ;;  %v1056_v36 = vld [vmem:[#allocation3 + $0x1c40] sm:$0xff]  ;;  %v5104_v30 = vpack.c.bf16 %v1155_v21, %v1143_v20 }
 0x21a   :  { %5055 = vmatpush1.bf16.msra.mxu1 %v5054_v49  ;;  %4801 = vmatprep.subr.bf16.mxu0 %v4800_v50  ;;  %v973_v49 = vld [vmem:[#allocation3 + $0x19a8] sm:$0xff]  ;;  %v1238_v20 = vld [vmem:[#allocation3 + $0x21f0] sm:$0xff] }
 0x21b   :  { %5057 = vmatprep.subr.bf16.mxu1 %v5056_v55  ;;  %v985_v50 = vld [vmem:[#allocation3 + $0x1a08] sm:$0xff]  ;;  %v5074_v55 = vpack.c.bf16 %v962_v48, %v950_v46  ;;  %v4834_v46 = vpack.c.bf16 %v1056_v36, %v1044_v35  ;;  %v1167_v35 = vld [vmem:[#allocation3 + $0x1fb8] sm:$0xff] }
 0x21c   :  { %v4820_v56 = vpack.c.bf16 %v985_v50, %v973_v49  ;;  %v1068_v49 = vld [vmem:[#allocation3 + $0x1ca0] sm:$0xff]  ;;  %v1179_v36 = vld [vmem:[#allocation3 + $0x2018] sm:$0xff] }
 0x21d   :  { %4803 = vmatpush1.bf16.msra.mxu0 %v4802_v62  ;;  %v986_v62 = vld [vmem:[#allocation3 + $0x1a10] sm:$0xff]  ;;  %v1080_v50 = vld [vmem:[#allocation3 + $0x1d00] sm:$0xff]  ;;  %v5108_v44 = vpack.c.bf16 %v1179_v36, %v1167_v35 }
 0x21e   :  { %5059 = vmatpush1.bf16.msra.mxu1 %v5058_v63  ;;  %4805 = vmatprep.subr.bf16.mxu0 %v4804_v0  ;;  %v997_v63 = vld [vmem:[#allocation3 + $0x1a68] sm:$0xff]  ;;  %v1262_v35 = vld [vmem:[#allocation3 + $0x22b0] sm:$0xff] }
 0x21f   :  { %5061 = vmatprep.subr.bf16.mxu1 %v5060_v4  ;;  %v1009_v0 = vld [vmem:[#allocation3 + $0x1ac8] sm:$0xff]  ;;  %v5078_v4 = vpack.c.bf16 %v986_v62, %v974_v60  ;;  %v4838_v60 = vpack.c.bf16 %v1080_v50, %v1068_v49  ;;  %v1191_v49 = vld [vmem:[#allocation3 + $0x2078] sm:$0xff] }
 0x220   :  { %v4824_v5 = vpack.c.bf16 %v1009_v0, %v997_v63  ;;  %v1092_v63 = vld [vmem:[#allocation3 + $0x1d60] sm:$0xff]  ;;  %v1203_v50 = vld [vmem:[#allocation3 + $0x20d8] sm:$0xff] }
 0x221   :  { %4807 = vmatpush1.bf16.msra.mxu0 %v4806_v10  ;;  %v1010_v10 = vld [vmem:[#allocation3 + $0x1ad0] sm:$0xff]  ;;  %v1104_v0 = vld [vmem:[#allocation3 + $0x1dc0] sm:$0xff]  ;;  %v5112_v59 = vpack.c.bf16 %v1203_v50, %v1191_v49 }
 0x222   :  { %5063 = vmatpush1.bf16.msra.mxu1 %v5062_v12  ;;  %4809 = vmatprep.subr.bf16.mxu0 %v4808_v13  ;;  %v1021_v12 = vld [vmem:[#allocation3 + $0x1b28] sm:$0xff]  ;;  %v1286_v49 = vld [vmem:[#allocation3 + $0x2370] sm:$0xff] }
 0x223   :  { %5065 = vmatprep.subr.bf16.mxu1 %v5064_v17  ;;  %v1033_v13 = vld [vmem:[#allocation3 + $0x1b88] sm:$0xff]  ;;  %v5082_v17 = vpack.c.bf16 %v1010_v10, %v998_v8  ;;  %v4842_v8 = vpack.c.bf16 %v1104_v0, %v1092_v63  ;;  %v1215_v63 = vld [vmem:[#allocation3 + $0x2138] sm:$0xff] }
 0x224   :  { %v4828_v18 = vpack.c.bf16 %v1033_v13, %v1021_v12  ;;  %v1116_v12 = vld [vmem:[#allocation3 + $0x1e20] sm:$0xff]  ;;  %v1227_v0 = vld [vmem:[#allocation3 + $0x2198] sm:$0xff] }
 0x225   :  { %4811 = vmatpush1.bf16.msra.mxu0 %v4810_v26  ;;  %v1034_v26 = vld [vmem:[#allocation3 + $0x1b90] sm:$0xff]  ;;  %v1128_v13 = vld [vmem:[#allocation3 + $0x1e80] sm:$0xff]  ;;  %v5116_v7 = vpack.c.bf16 %v1227_v0, %v1215_v63 }
 0x226   :  { %5067 = vmatpush1.bf16.msra.mxu1 %v5066_v27  ;;  %4813 = vmatprep.subr.bf16.mxu0 %v4812_v28  ;;  %v1045_v27 = vld [vmem:[#allocation3 + $0x1be8] sm:$0xff]  ;;  %v1310_v63 = vld [vmem:[#allocation3 + $0x2430] sm:$0xff] }
 0x227   :  { %5069 = vmatprep.subr.bf16.mxu1 %v5068_v33  ;;  %v1057_v28 = vld [vmem:[#allocation3 + $0x1c48] sm:$0xff]  ;;  %v5086_v33 = vpack.c.bf16 %v1034_v26, %v1022_v23  ;;  %v4846_v23 = vpack.c.bf16 %v1128_v13, %v1116_v12  ;;  %v1239_v12 = vld [vmem:[#allocation3 + $0x21f8] sm:$0xff] }
 0x228   :  { %2436 = vmatmul.mubr.f32.vlgmr.msra.gmra.mrb[2].mxu0 %v6292_v24  ;;  %v4832_v34 = vpack.c.bf16 %v1057_v28, %v1045_v27  ;;  %v1140_v27 = vld [vmem:[#allocation3 + $0x1ee0] sm:$0xff]  ;;  %v1251_v13 = vld [vmem:[#allocation3 + $0x2258] sm:$0xff] }
 0x229   :  { %4815 = vmatpush1.bf16.msra.mxu0 %v4814_v40  ;;  %2720 = vmatmul.mubr.f32.vlgmr.msra.gmra.mrb[2].mxu1 %v6292_v24  ;;  %v1058_v40 = vld [vmem:[#allocation3 + $0x1c50] sm:$0xff]  ;;  %v1152_v28 = vld [vmem:[#allocation3 + $0x1f40] sm:$0xff]  ;;  %v5120_v21 = vpack.c.bf16 %v1251_v13, %v1239_v12 }
 0x22a   :  { %5071 = vmatpush1.bf16.msra.mxu1 %v5070_v41  ;;  %4817 = vmatprep.subr.bf16.mxu0 %v4816_v42  ;;  %v1069_v41 = vld [vmem:[#allocation3 + $0x1ca8] sm:$0xff]  ;;  %v1334_v12 = vld [vmem:[#allocation3 + $0x24f0] sm:$0xff] }
 0x22b   :  { %5073 = vmatprep.subr.bf16.mxu1 %v5072_v47  ;;  %2506 = vmatprep.mubr.f32.mxu0 %v6314_v58  ;;  %v1081_v42 = vld [vmem:[#allocation3 + $0x1d08] sm:$0xff]  ;;  %v5090_v47 = vpack.c.bf16 %v1058_v40, %v1046_v37  ;;  %v4850_v37 = vpack.c.bf16 %v1152_v28, %v1140_v27  ;;  %v1263_v27 = vld [vmem:[#allocation3 + $0x22b8] sm:$0xff] }
 0x22c   :  { %2790 = vmatprep.mubr.f32.mxu1 %v6314_v58  ;;  %v4836_v48 = vpack.c.bf16 %v1081_v42, %v1069_v41  ;;  %v1164_v41 = vld [vmem:[#allocation3 + $0x1fa0] sm:$0xff]  ;;  %v1275_v28 = vld [vmem:[#allocation3 + $0x2318] sm:$0xff] }
 0x22d   :  { %4819 = vmatpush1.bf16.msra.mxu0 %v4818_v54  ;;  %v1082_v54 = vld [vmem:[#allocation3 + $0x1d10] sm:$0xff]  ;;  %v1176_v42 = vld [vmem:[#allocation3 + $0x2000] sm:$0xff]  ;;  %v5124_v36 = vpack.c.bf16 %v1275_v28, %v1263_v27 }
 0x22e   :  { %5075 = vmatpush1.bf16.msra.mxu1 %v5074_v55  ;;  %4821 = vmatprep.subr.bf16.mxu0 %v4820_v56  ;;  %v1093_v55 = vld [vmem:[#allocation3 + $0x1d68] sm:$0xff]  ;;  %v1358_v27 = vld [vmem:[#allocation3 + $0x25b0] sm:$0xff] }
 0x22f   :  { %5077 = vmatprep.subr.bf16.mxu1 %v5076_v61  ;;  %v1105_v56 = vld [vmem:[#allocation3 + $0x1dc8] sm:$0xff]  ;;  %v5094_v61 = vpack.c.bf16 %v1082_v54, %v1070_v52  ;;  %v4854_v52 = vpack.c.bf16 %v1176_v42, %v1164_v41  ;;  %v1287_v41 = vld [vmem:[#allocation3 + $0x2378] sm:$0xff] }
 0x230   :  { %v4840_v62 = vpack.c.bf16 %v1105_v56, %v1093_v55  ;;  %v1188_v55 = vld [vmem:[#allocation3 + $0x2060] sm:$0xff]  ;;  %v1299_v42 = vld [vmem:[#allocation3 + $0x23d8] sm:$0xff] }
 0x231   :  { %4823 = vmatpush1.bf16.msra.mxu0 %v4822_v3  ;;  %v1106_v3 = vld [vmem:[#allocation3 + $0x1dd0] sm:$0xff]  ;;  %v1200_v56 = vld [vmem:[#allocation3 + $0x20c0] sm:$0xff]  ;;  %v5128_v50 = vpack.c.bf16 %v1299_v42, %v1287_v41 }
 0x232   :  { %5079 = vmatpush1.bf16.msra.mxu1 %v5078_v4  ;;  %4825 = vmatprep.subr.bf16.mxu0 %v4824_v5  ;;  %v1117_v4 = vld [vmem:[#allocation3 + $0x1e28] sm:$0xff]  ;;  %v1382_v41 = vld [vmem:[#allocation3 + $0x2670] sm:$0xff] }
 0x233   :  { %5081 = vmatprep.subr.bf16.mxu1 %v5080_v9  ;;  %v1129_v5 = vld [vmem:[#allocation3 + $0x1e88] sm:$0xff]  ;;  %v5098_v9 = vpack.c.bf16 %v1106_v3, %v1094_v1  ;;  %v4858_v1 = vpack.c.bf16 %v1200_v56, %v1188_v55  ;;  %v1311_v55 = vld [vmem:[#allocation3 + $0x2438] sm:$0xff] }
 0x234   :  { %v4844_v10 = vpack.c.bf16 %v1129_v5, %v1117_v4  ;;  %v1212_v4 = vld [vmem:[#allocation3 + $0x2120] sm:$0xff]  ;;  %v1323_v56 = vld [vmem:[#allocation3 + $0x2498] sm:$0xff] }
 0x235   :  { %4827 = vmatpush1.bf16.msra.mxu0 %v4826_v16  ;;  %v1130_v16 = vld [vmem:[#allocation3 + $0x1e90] sm:$0xff]  ;;  %v1224_v5 = vld [vmem:[#allocation3 + $0x2180] sm:$0xff]  ;;  %v5132_v0 = vpack.c.bf16 %v1323_v56, %v1311_v55 }
 0x236   :  { %5083 = vmatpush1.bf16.msra.mxu1 %v5082_v17  ;;  %4829 = vmatprep.subr.bf16.mxu0 %v4828_v18  ;;  %v1141_v17 = vld [vmem:[#allocation3 + $0x1ee8] sm:$0xff]  ;;  %v1406_v55 = vld [vmem:[#allocation3 + $0x2730] sm:$0xff] }
 0x237   :  { %5085 = vmatprep.subr.bf16.mxu1 %v5084_v22  ;;  %v1153_v18 = vld [vmem:[#allocation3 + $0x1f48] sm:$0xff]  ;;  %v5102_v22 = vpack.c.bf16 %v1130_v16, %v1118_v14  ;;  %v4862_v14 = vpack.c.bf16 %v1224_v5, %v1212_v4  ;;  %v1335_v4 = vld [vmem:[#allocation3 + $0x24f8] sm:$0xff] }
 0x238   :  { %v4848_v26 = vpack.c.bf16 %v1153_v18, %v1141_v17  ;;  %v1236_v17 = vld [vmem:[#allocation3 + $0x21e0] sm:$0xff]  ;;  %v1347_v5 = vld [vmem:[#allocation3 + $0x2558] sm:$0xff] }
 0x239   :  { %4831 = vmatpush1.bf16.msra.mxu0 %v4830_v31  ;;  %v1154_v31 = vld [vmem:[#allocation3 + $0x1f50] sm:$0xff]  ;;  %v1248_v18 = vld [vmem:[#allocation3 + $0x2240] sm:$0xff]  ;;  %v5136_v13 = vpack.c.bf16 %v1347_v5, %v1335_v4 }
 0x23a   :  { %5087 = vmatpush1.bf16.msra.mxu1 %v5086_v33  ;;  %4833 = vmatprep.subr.bf16.mxu0 %v4832_v34  ;;  %v1165_v33 = vld [vmem:[#allocation3 + $0x1fa8] sm:$0xff]  ;;  %v1430_v4 = vld [vmem:[#allocation3 + $0x27f0] sm:$0xff] }
 0x23b   :  { %5089 = vmatprep.subr.bf16.mxu1 %v5088_v39  ;;  %v1177_v34 = vld [vmem:[#allocation3 + $0x2008] sm:$0xff]  ;;  %v5106_v39 = vpack.c.bf16 %v1154_v31, %v1142_v29  ;;  %v4866_v29 = vpack.c.bf16 %v1248_v18, %v1236_v17  ;;  %v1359_v17 = vld [vmem:[#allocation3 + $0x25b8] sm:$0xff] }
 0x23c   :  { %v4852_v40 = vpack.c.bf16 %v1177_v34, %v1165_v33  ;;  %v1260_v33 = vld [vmem:[#allocation3 + $0x22a0] sm:$0xff]  ;;  %v1371_v18 = vld [vmem:[#allocation3 + $0x2618] sm:$0xff] }
 0x23d   :  { %4835 = vmatpush1.bf16.msra.mxu0 %v4834_v46  ;;  %v1178_v46 = vld [vmem:[#allocation3 + $0x2010] sm:$0xff]  ;;  %v1272_v34 = vld [vmem:[#allocation3 + $0x2300] sm:$0xff]  ;;  %v5140_v28 = vpack.c.bf16 %v1371_v18, %v1359_v17 }
 0x23e   :  { %5091 = vmatpush1.bf16.msra.mxu1 %v5090_v47  ;;  %4837 = vmatprep.subr.bf16.mxu0 %v4836_v48  ;;  %v1189_v47 = vld [vmem:[#allocation3 + $0x2068] sm:$0xff]  ;;  %v1454_v17 = vld [vmem:[#allocation3 + $0x28b0] sm:$0xff] }
 0x23f   :  { %5093 = vmatprep.subr.bf16.mxu1 %v5092_v53  ;;  %v1201_v48 = vld [vmem:[#allocation3 + $0x20c8] sm:$0xff]  ;;  %v5110_v53 = vpack.c.bf16 %v1178_v46, %v1166_v43  ;;  %v4870_v43 = vpack.c.bf16 %v1272_v34, %v1260_v33  ;;  %v1383_v33 = vld [vmem:[#allocation3 + $0x2678] sm:$0xff] }
 0x240   :  { %v4856_v54 = vpack.c.bf16 %v1201_v48, %v1189_v47  ;;  %v1284_v47 = vld [vmem:[#allocation3 + $0x2360] sm:$0xff]  ;;  %v1395_v34 = vld [vmem:[#allocation3 + $0x26d8] sm:$0xff] }
 0x241   :  { %4839 = vmatpush1.bf16.msra.mxu0 %v4838_v60  ;;  %v1202_v60 = vld [vmem:[#allocation3 + $0x20d0] sm:$0xff]  ;;  %v1296_v48 = vld [vmem:[#allocation3 + $0x23c0] sm:$0xff]  ;;  %v5144_v42 = vpack.c.bf16 %v1395_v34, %v1383_v33 }
 0x242   :  { %5095 = vmatpush1.bf16.msra.mxu1 %v5094_v61  ;;  %4841 = vmatprep.subr.bf16.mxu0 %v4840_v62  ;;  %v1213_v61 = vld [vmem:[#allocation3 + $0x2128] sm:$0xff] }
 0x243   :  { %5097 = vmatprep.subr.bf16.mxu1 %v5096_v2  ;;  %v1225_v62 = vld [vmem:[#allocation3 + $0x2188] sm:$0xff]  ;;  %v5114_v2 = vpack.c.bf16 %v1202_v60, %v1190_v57  ;;  %v4874_v57 = vpack.c.bf16 %v1296_v48, %v1284_v47  ;;  %v1407_v47 = vld [vmem:[#allocation3 + $0x2738] sm:$0xff] }
 0x244   :  { %v4860_v3 = vpack.c.bf16 %v1225_v62, %v1213_v61  ;;  %v1308_v61 = vld [vmem:[#allocation3 + $0x2420] sm:$0xff]  ;;  %v1419_v48 = vld [vmem:[#allocation3 + $0x2798] sm:$0xff] }
 0x245   :  { %4843 = vmatpush1.bf16.msra.mxu0 %v4842_v8  ;;  %v1226_v8 = vld [vmem:[#allocation3 + $0x2190] sm:$0xff]  ;;  %v1320_v62 = vld [vmem:[#allocation3 + $0x2480] sm:$0xff]  ;;  %v5148_v56 = vpack.c.bf16 %v1419_v48, %v1407_v47  ;;  %v1503_v48 = vld [vmem:[#allocation3 + $0x2a38] sm:$0xff] }
 0x246   :  { %5099 = vmatpush1.bf16.msra.mxu1 %v5098_v9  ;;  %4845 = vmatprep.subr.bf16.mxu0 %v4844_v10  ;;  %v1237_v9 = vld [vmem:[#allocation3 + $0x21e8] sm:$0xff] }
 0x247   :  { %5101 = vmatprep.subr.bf16.mxu1 %v5100_v15  ;;  %v1249_v10 = vld [vmem:[#allocation3 + $0x2248] sm:$0xff]  ;;  %v5118_v15 = vpack.c.bf16 %v1226_v8, %v1214_v45  ;;  %v4878_v45 = vpack.c.bf16 %v1320_v62, %v1308_v61  ;;  %v1431_v61 = vld [vmem:[#allocation3 + $0x27f8] sm:$0xff] }
 0x248   :  { %v4864_v16 = vpack.c.bf16 %v1249_v10, %v1237_v9  ;;  %v1332_v9 = vld [vmem:[#allocation3 + $0x24e0] sm:$0xff]  ;;  %v1443_v62 = vld [vmem:[#allocation3 + $0x2858] sm:$0xff] }
 0x249   :  { %4847 = vmatpush1.bf16.msra.mxu0 %v4846_v23  ;;  %v1250_v23 = vld [vmem:[#allocation3 + $0x2250] sm:$0xff]  ;;  %v1344_v10 = vld [vmem:[#allocation3 + $0x2540] sm:$0xff]  ;;  %v5152_v5 = vpack.c.bf16 %v1443_v62, %v1431_v61  ;;  %v1525_v61 = vld [vmem:[#allocation3 + $0x2ae8] sm:$0xff] }
 0x24a   :  { %5103 = vmatpush1.bf16.msra.mxu1 %v5102_v22  ;;  %4849 = vmatprep.subr.bf16.mxu0 %v4848_v26  ;;  %v1261_v22 = vld [vmem:[#allocation3 + $0x22a8] sm:$0xff] }
 0x24b   :  { %5105 = vmatprep.subr.bf16.mxu1 %v5104_v30  ;;  %v1273_v26 = vld [vmem:[#allocation3 + $0x2308] sm:$0xff]  ;;  %v5122_v30 = vpack.c.bf16 %v1250_v23, %v1238_v20  ;;  %v4882_v20 = vpack.c.bf16 %v1344_v10, %v1332_v9  ;;  %v1455_v9 = vld [vmem:[#allocation3 + $0x28b8] sm:$0xff] }
 0x24c   :  { %v4868_v31 = vpack.c.bf16 %v1273_v26, %v1261_v22  ;;  %v1356_v22 = vld [vmem:[#allocation3 + $0x25a0] sm:$0xff]  ;;  %v1467_v10 = vld [vmem:[#allocation3 + $0x2918] sm:$0xff]  ;;  %v1537_v62 = vld [vmem:[#allocation3 + $0x2b48] sm:$0xff] }
 0x24d   :  { %4851 = vmatpush1.bf16.msra.mxu0 %v4850_v37  ;;  %v1274_v37 = vld [vmem:[#allocation3 + $0x2310] sm:$0xff]  ;;  %v1368_v26 = vld [vmem:[#allocation3 + $0x2600] sm:$0xff] }
 0x24e   :  { %5107 = vmatpush1.bf16.msra.mxu1 %v5106_v39  ;;  %4853 = vmatprep.subr.bf16.mxu0 %v4852_v40  ;;  %v1285_v39 = vld [vmem:[#allocation3 + $0x2368] sm:$0xff] }
 0x24f   :  { %5109 = vmatprep.subr.bf16.mxu1 %v5108_v44  ;;  %v1297_v40 = vld [vmem:[#allocation3 + $0x23c8] sm:$0xff]  ;;  %v5126_v44 = vpack.c.bf16 %v1274_v37, %v1262_v35  ;;  %v4886_v35 = vpack.c.bf16 %v1368_v26, %v1356_v22 }
 0x250   :  { %v4872_v46 = vpack.c.bf16 %v1297_v40, %v1285_v39  ;;  %v1380_v39 = vld [vmem:[#allocation3 + $0x2660] sm:$0xff]  ;;  %v1489_v22 = vld [vmem:[#allocation3 + $0x29c8] sm:$0xff] }
 0x251   :  { %4855 = vmatpush1.bf16.msra.mxu0 %v4854_v52  ;;  %v1298_v52 = vld [vmem:[#allocation3 + $0x23d0] sm:$0xff]  ;;  %v1392_v40 = vld [vmem:[#allocation3 + $0x26c0] sm:$0xff] }
 0x252   :  { %5111 = vmatpush1.bf16.msra.mxu1 %v5110_v53  ;;  %4857 = vmatprep.subr.bf16.mxu0 %v4856_v54  ;;  %v1309_v53 = vld [vmem:[#allocation3 + $0x2428] sm:$0xff] }
 0x253   :  { %5113 = vmatprep.subr.bf16.mxu1 %v5112_v59  ;;  %v1321_v54 = vld [vmem:[#allocation3 + $0x2488] sm:$0xff]  ;;  %v5130_v59 = vpack.c.bf16 %v1298_v52, %v1286_v49  ;;  %v4890_v49 = vpack.c.bf16 %v1392_v40, %v1380_v39  ;;  %v1488_v39 = vld [vmem:[#allocation3 + $0x29c0] sm:$0xff]  ;;  %v1478_v40 = vld [vmem:[#allocation3 + $0x2970] sm:$0xff] }
 0x254   :  { %v4876_v60 = vpack.c.bf16 %v1321_v54, %v1309_v53  ;;  %v1404_v53 = vld [vmem:[#allocation3 + $0x2720] sm:$0xff] }
 0x255   :  { %4859 = vmatpush1.bf16.msra.mxu0 %v4858_v1  ;;  %v1322_v1 = vld [vmem:[#allocation3 + $0x2490] sm:$0xff]  ;;  %v1416_v54 = vld [vmem:[#allocation3 + $0x2780] sm:$0xff] }
 0x256   :  { %5115 = vmatpush1.bf16.msra.mxu1 %v5114_v2  ;;  %4861 = vmatprep.subr.bf16.mxu0 %v4860_v3  ;;  %v1333_v2 = vld [vmem:[#allocation3 + $0x24e8] sm:$0xff] }
 0x257   :  { %5117 = vmatprep.subr.bf16.mxu1 %v5116_v7  ;;  %v1345_v3 = vld [vmem:[#allocation3 + $0x2548] sm:$0xff]  ;;  %v5134_v7 = vpack.c.bf16 %v1322_v1, %v1310_v63  ;;  %v4894_v63 = vpack.c.bf16 %v1416_v54, %v1404_v53 }
 0x258   :  { %v4880_v8 = vpack.c.bf16 %v1345_v3, %v1333_v2  ;;  %v1428_v2 = vld [vmem:[#allocation3 + $0x27e0] sm:$0xff] }
 0x259   :  { %4863 = vmatpush1.bf16.msra.mxu0 %v4862_v14  ;;  %v1346_v14 = vld [vmem:[#allocation3 + $0x2550] sm:$0xff]  ;;  %v1440_v3 = vld [vmem:[#allocation3 + $0x2840] sm:$0xff] }
 0x25a   :  { %5119 = vmatpush1.bf16.msra.mxu1 %v5118_v15  ;;  %4865 = vmatprep.subr.bf16.mxu0 %v4864_v16  ;;  %v1357_v15 = vld [vmem:[#allocation3 + $0x25a8] sm:$0xff] }
 0x25b   :  { %5121 = vmatprep.subr.bf16.mxu1 %v5120_v21  ;;  %v1369_v16 = vld [vmem:[#allocation3 + $0x2608] sm:$0xff]  ;;  %v5138_v21 = vpack.c.bf16 %v1346_v14, %v1334_v12  ;;  %v4898_v12 = vpack.c.bf16 %v1440_v3, %v1428_v2  ;;  %v4912_v3 = vpack.c.bf16 %v1537_v62, %v1525_v61  ;;  %v1620_v61 = vld [vmem:[#allocation3 + $0x2de0] sm:$0xff] }
 0x25c   :  { %v4884_v23 = vpack.c.bf16 %v1369_v16, %v1357_v15  ;;  %v1452_v15 = vld [vmem:[#allocation3 + $0x28a0] sm:$0xff] }
 0x25d   :  { %4867 = vmatpush1.bf16.msra.mxu0 %v4866_v29  ;;  %v1370_v29 = vld [vmem:[#allocation3 + $0x2610] sm:$0xff]  ;;  %v1464_v16 = vld [vmem:[#allocation3 + $0x2900] sm:$0xff] }
 0x25e   :  { %5123 = vmatpush1.bf16.msra.mxu1 %v5122_v30  ;;  %4869 = vmatprep.subr.bf16.mxu0 %v4868_v31  ;;  %v1381_v30 = vld [vmem:[#allocation3 + $0x2668] sm:$0xff]  ;;  %v4902_v33 = vpack.c.bf16 %v1464_v16, %v1452_v15  ;;  %v1632_v62 = vld [vmem:[#allocation3 + $0x2e40] sm:$0xff] }
 0x25f   :  { %5125 = vmatprep.subr.bf16.mxu1 %v5124_v36  ;;  %v1393_v31 = vld [vmem:[#allocation3 + $0x26c8] sm:$0xff]  ;;  %v5142_v36 = vpack.c.bf16 %v1370_v29, %v1358_v27  ;;  %v1491_v29 = vld [vmem:[#allocation3 + $0x29d8] sm:$0xff] }
 0x260   :  { %v4888_v37 = vpack.c.bf16 %v1393_v31, %v1381_v30 }
 0x261   :  { %4871 = vmatpush1.bf16.msra.mxu0 %v4870_v43  ;;  %v1394_v43 = vld [vmem:[#allocation3 + $0x26d0] sm:$0xff] }
 0x262   :  { %5127 = vmatpush1.bf16.msra.mxu1 %v5126_v44  ;;  %4873 = vmatprep.subr.bf16.mxu0 %v4872_v46  ;;  %v1405_v44 = vld [vmem:[#allocation3 + $0x2728] sm:$0xff] }
 0x263   :  { %5129 = vmatprep.subr.bf16.mxu1 %v5128_v50  ;;  %v1417_v46 = vld [vmem:[#allocation3 + $0x2788] sm:$0xff]  ;;  %v5146_v50 = vpack.c.bf16 %v1394_v43, %v1382_v41  ;;  %v1490_v43 = vld [vmem:[#allocation3 + $0x29d0] sm:$0xff] }
 0x264   :  { %v4892_v52 = vpack.c.bf16 %v1417_v46, %v1405_v44  ;;  %v1501_v44 = vld [vmem:[#allocation3 + $0x2a28] sm:$0xff]  ;;  %v5162_v53 = vpack.c.bf16 %v1490_v43, %v1478_v40 }
 0x265   :  { %4875 = vmatpush1.bf16.msra.mxu0 %v4874_v57  ;;  %v1418_v57 = vld [vmem:[#allocation3 + $0x2790] sm:$0xff]  ;;  %v1513_v46 = vld [vmem:[#allocation3 + $0x2a88] sm:$0xff] }
 0x266   :  { %5131 = vmatpush1.bf16.msra.mxu1 %v5130_v59  ;;  %4877 = vmatprep.subr.bf16.mxu0 %v4876_v60  ;;  %v1429_v59 = vld [vmem:[#allocation3 + $0x27e8] sm:$0xff]  ;;  %v4908_v54 = vpack.c.bf16 %v1513_v46, %v1501_v44 }
 0x267   :  { %5133 = vmatprep.subr.bf16.mxu1 %v5132_v0  ;;  %v1441_v60 = vld [vmem:[#allocation3 + $0x2848] sm:$0xff]  ;;  %v5150_v0 = vpack.c.bf16 %v1418_v57, %v1406_v55  ;;  %v1500_v55 = vld [vmem:[#allocation3 + $0x2a20] sm:$0xff]  ;;  %v1502_v57 = vld [vmem:[#allocation3 + $0x2a30] sm:$0xff] }
 0x268   :  { %2507 = vmatmul.mubr.f32.vlgmr.msra.gmra.mrb[2].mxu0 %v6309_v51  ;;  %v4896_v1 = vpack.c.bf16 %v1441_v60, %v1429_v59  ;;  %v1514_v60 = vld [vmem:[#allocation3 + $0x2a90] sm:$0xff]  ;;  %v1609_v40 = vld [vmem:[#allocation3 + $0x2d88] sm:$0xff] }
 0x269   :  { %4879 = vmatpush1.bf16.msra.mxu0 %v4878_v45  ;;  %2791 = vmatmul.mubr.f32.vlgmr.msra.gmra.mrb[2].mxu1 %v6309_v51  ;;  %v1442_v45 = vld [vmem:[#allocation3 + $0x2850] sm:$0xff]  ;;  %v5166_v2 = vpack.c.bf16 %v1514_v60, %v1502_v57 }
 0x26a   :  { %5135 = vmatpush1.bf16.msra.mxu1 %v5134_v7  ;;  %4881 = vmatprep.subr.bf16.mxu0 %v4880_v8  ;;  %v1453_v7 = vld [vmem:[#allocation3 + $0x28a8] sm:$0xff] }
 0x26b   :  { %5137 = vmatprep.subr.bf16.mxu1 %v5136_v13  ;;  %2577 = vmatprep.mubr.f32.mxu0 %v6326_v19  ;;  %v1465_v8 = vld [vmem:[#allocation3 + $0x2908] sm:$0xff]  ;;  %v5154_v13 = vpack.c.bf16 %v1442_v45, %v1430_v4  ;;  %v1524_v4 = vld [vmem:[#allocation3 + $0x2ae0] sm:$0xff]  ;;  %v1526_v45 = vld [vmem:[#allocation3 + $0x2af0] sm:$0xff] }
 0x26c   :  { %2861 = vmatprep.mubr.f32.mxu1 %v6326_v19  ;;  %v4900_v14 = vpack.c.bf16 %v1465_v8, %v1453_v7  ;;  %v1538_v8 = vld [vmem:[#allocation3 + $0x2b50] sm:$0xff] }
 0x26d   :  { %4883 = vmatpush1.bf16.msra.mxu0 %v4882_v20  ;;  %v5156_v20 = vpack.c.bf16 %v1467_v10, %v1455_v9  ;;  %v1549_v9 = vld [vmem:[#allocation3 + $0x2ba8] sm:$0xff]  ;;  %v5170_v15 = vpack.c.bf16 %v1538_v8, %v1526_v45  ;;  %v4930_v45 = vpack.c.bf16 %v1632_v62, %v1620_v61  ;;  %v211_v61 = vld [vmem:[#allocation3 + $0x1d8] sm:$0xff] }
 0x26e   :  { %5139 = vmatpush1.bf16.msra.mxu1 %v5138_v21  ;;  %4885 = vmatprep.subr.bf16.mxu0 %v4884_v23  ;;  %v1466_v21 = vld [vmem:[#allocation3 + $0x2910] sm:$0xff]  ;;  %v1477_v23 = vld [vmem:[#allocation3 + $0x2968] sm:$0xff]  ;;  %v223_v62 = vld [vmem:[#allocation3 + $0x238] sm:$0xff] }
 0x26f   :  { %5141 = vmatprep.subr.bf16.mxu1 %v5140_v28  ;;  %v1479_v28 = vld [vmem:[#allocation3 + $0x2978] sm:$0xff]  ;;  %v1561_v10 = vld [vmem:[#allocation3 + $0x2c08] sm:$0xff] }
 0x270   :  { %v4916_v16 = vpack.c.bf16 %v1561_v10, %v1549_v9  ;;  %v1644_v9 = vld [vmem:[#allocation3 + $0x2ea0] sm:$0xff] }
 0x271   :  { %4887 = vmatpush1.bf16.msra.mxu0 %v4886_v35  ;;  %v5158_v35 = vpack.c.bf16 %v1466_v21, %v1454_v17  ;;  %v1548_v17 = vld [vmem:[#allocation3 + $0x2ba0] sm:$0xff] }
 0x272   :  { %5143 = vmatpush1.bf16.msra.mxu1 %v5142_v36  ;;  %4889 = vmatprep.subr.bf16.mxu0 %v4888_v37  ;;  %v4904_v36 = vpack.c.bf16 %v1489_v22, %v1477_v23  ;;  %v1476_v37 = vld [vmem:[#allocation3 + $0x2960] sm:$0xff]  ;;  %v1562_v23 = vld [vmem:[#allocation3 + $0x2c10] sm:$0xff]  ;;  %v1573_v22 = vld [vmem:[#allocation3 + $0x2c68] sm:$0xff] }
 0x273   :  { %5145 = vmatprep.subr.bf16.mxu1 %v5144_v42  ;;  %v5160_v42 = vpack.c.bf16 %v1491_v29, %v1479_v28  ;;  %v1587_v28 = vld [vmem:[#allocation3 + $0x2cd8] sm:$0xff]  ;;  %v1656_v10 = vld [vmem:[#allocation3 + $0x2f00] sm:$0xff] }
 0x275   :  { %4891 = vmatpush1.bf16.msra.mxu0 %v4890_v49  ;;  %v1515_v49 = vld [vmem:[#allocation3 + $0x2a98] sm:$0xff] }
 0x276   :  { %5147 = vmatpush1.bf16.msra.mxu1 %v5146_v50  ;;  %4893 = vmatprep.subr.bf16.mxu0 %v4892_v52  ;;  %v4906_v50 = vpack.c.bf16 %v1488_v39, %v1476_v37  ;;  %v5164_v59 = vpack.c.bf16 %v1515_v49, %v1503_v48  ;;  %v1586_v37 = vld [vmem:[#allocation3 + $0x2cd0] sm:$0xff]  ;;  %v1597_v39 = vld [vmem:[#allocation3 + $0x2d28] sm:$0xff]  ;;  %v1608_v48 = vld [vmem:[#allocation3 + $0x2d80] sm:$0xff] }
 0x277   :  { %5149 = vmatprep.subr.bf16.mxu1 %v5148_v56  ;;  %v1512_v56 = vld [vmem:[#allocation3 + $0x2a80] sm:$0xff]  ;;  %v4924_v46 = vpack.c.bf16 %v1609_v40, %v1597_v39  ;;  %v1598_v49 = vld [vmem:[#allocation3 + $0x2d30] sm:$0xff] }
 0x278   :  { %v160_v39 = vld [vmem:[#allocation3 + $0x40] sm:$0xff] }
 0x279   :  { %4895 = vmatpush1.bf16.msra.mxu0 %v4894_v63  ;;  %v1527_v63 = vld [vmem:[#allocation3 + $0x2af8] sm:$0xff]  ;;  %v172_v40 = vld [vmem:[#allocation3 + $0xa0] sm:$0xff] }
 0x27a   :  { %5151 = vmatpush1.bf16.msra.mxu1 %v5150_v0  ;;  %4897 = vmatprep.subr.bf16.mxu0 %v4896_v1  ;;  %v1539_v0 = vld [vmem:[#allocation3 + $0x2b58] sm:$0xff]  ;;  %v4910_v1 = vpack.c.bf16 %v1512_v56, %v1500_v55 }
 0x27b   :  { %v2011_v18 = vpop.f32.mrb[0].mxu0  ;;  %5153 = vmatprep.subr.bf16.mxu1 %v5152_v5  ;;  %v1536_v5 = vld [vmem:[#allocation3 + $0x2b40] sm:$0xff]  ;;  %v5168_v7 = vpack.c.bf16 %v1539_v0, %v1527_v63  ;;  %v1623_v55 = vld [vmem:[#allocation3 + $0x2df8] sm:$0xff]  ;;  %v1622_v63 = vld [vmem:[#allocation3 + $0x2df0] sm:$0xff] }
 0x27c   :  { %v2295_v26 = vpop.f32.mrb[0].mxu1  ;;  %v2013_v27 = vpop.f32.mrb[1].mxu0  ;;  %v1635_v56 = vld [vmem:[#allocation3 + $0x2e58] sm:$0xff] }
 0x27d   :  { %v3448_v30 = vcombine.low %v2011_v18, %v2013_v27  ;;  %v2297_v31 = vpop.f32.mrb[1].mxu1  ;;  %4899 = vmatpush1.bf16.msra.mxu0 %v4898_v12  ;;  %v1551_v12 = vld [vmem:[#allocation3 + $0x2bb8] sm:$0xff]  ;;  %v1560_v18 = vld [vmem:[#allocation3 + $0x2c00] sm:$0xff]  ;;  %v5184_v0 = vpack.c.bf16 %v1635_v56, %v1623_v55  ;;  %v186_v55 = vld [vmem:[#allocation3 + $0x110] sm:$0xff] }
 0x27e   :  { %v3449_v34 = vcombine.low %v2295_v26, %v2297_v31  ;;  %5155 = vmatpush1.bf16.msra.mxu1 %v5154_v13  ;;  %4901 = vmatprep.subr.bf16.mxu0 %v4900_v14  ;;  %v1563_v13 = vld [vmem:[#allocation3 + $0x2c18] sm:$0xff]  ;;  %v4914_v14 = vpack.c.bf16 %v1536_v5, %v1524_v4  ;;  %v1585_v26 = vld [vmem:[#allocation3 + $0x2cc8] sm:$0xff]  ;;  %v4918_v29 = vpack.c.bf16 %v1560_v18, %v1548_v17 }
 0x27f   :  { %v3456_v41 = vrot.slane %v3448_v30, %v6272_v11  ;;  %5157 = vmatprep.subr.bf16.mxu1 %v5156_v20  ;;  %v1550_v20 = vld [vmem:[#allocation3 + $0x2bb0] sm:$0xff]  ;;  %v5172_v21 = vpack.c.bf16 %v1563_v13, %v1551_v12  ;;  %v1575_v27 = vld [vmem:[#allocation3 + $0x2c78] sm:$0xff]  ;;  %v4920_v31 = vpack.c.bf16 %v1585_v26, %v1573_v22  ;;  %v1668_v22 = vld [vmem:[#allocation3 + $0x2f60] sm:$0xff] }
 0x280   :  { %v3463_v47 = vrot.slane %v3449_v34, %v6272_v11  ;;  %v5174_v30 = vpack.c.bf16 %v1562_v23, %v1550_v20  ;;  %v1584_v34 = vld [vmem:[#allocation3 + $0x2cc0] sm:$0xff]  ;;  %v1647_v4 = vld [vmem:[#allocation3 + $0x2eb8] sm:$0xff]  ;;  %v1646_v12 = vld [vmem:[#allocation3 + $0x2eb0] sm:$0xff]  ;;  %v4934_v20 = vpack.c.bf16 %v1656_v10, %v1644_v9 }
 0x281   :  { %4903 = vmatpush1.bf16.msra.mxu0 %v4902_v33  ;;  %v1572_v33 = vld [vmem:[#allocation3 + $0x2c60] sm:$0xff]  ;;  %v1659_v5 = vld [vmem:[#allocation3 + $0x2f18] sm:$0xff] }
 0x282   :  { %v3464_v52 = vcombine.low %v3456_v41, %v3463_v47  ;;  %5159 = vmatpush1.bf16.msra.mxu1 %v5158_v35  ;;  %4905 = vmatprep.subr.bf16.mxu0 %v4904_v36  ;;  %v1574_v35 = vld [vmem:[#allocation3 + $0x2c70] sm:$0xff]  ;;  %v5176_v36 = vpack.c.bf16 %v1587_v28, %v1575_v27  ;;  %v1599_v41 = vld [vmem:[#allocation3 + $0x2d38] sm:$0xff]  ;;  %v4922_v43 = vpack.c.bf16 %v1584_v34, %v1572_v33  ;;  %v1596_v47 = vld [vmem:[#allocation3 + $0x2d20] sm:$0xff] }
 0x283   :  { %5161 = vmatprep.subr.bf16.mxu1 %v5160_v42  ;;  %v1611_v42 = vld [vmem:[#allocation3 + $0x2d98] sm:$0xff]  ;;  %v5178_v44 = vpack.c.bf16 %v1586_v37, %v1574_v35  ;;  %v4926_v57 = vpack.c.bf16 %v1608_v48, %v1596_v47  ;;  %v5188_v13 = vpack.c.bf16 %v1659_v5, %v1647_v4  ;;  %v1680_v26 = vld [vmem:[#allocation3 + $0x2fc0] sm:$0xff]  ;;  %v1670_v27 = vld [vmem:[#allocation3 + $0x2f70] sm:$0xff]  ;;  %v5460_v5 = vpack.c.bf16 %v223_v62, %v211_v61 }
 0x284   :  { %3502 = vst [vmem:[#allocation2] sm:$0xff] %v3464_v52  ;;  %v1610_v52 = vld [vmem:[#allocation3 + $0x2d90] sm:$0xff]  ;;  %v1671_v17 = vld [vmem:[#allocation3 + $0x2f78] sm:$0xff]  ;;  %v4938_v35 = vpack.c.bf16 %v1680_v26, %v1668_v22 }
 0x285   :  { %4907 = vmatpush1.bf16.msra.mxu0 %v4906_v50  ;;  %v5180_v50 = vpack.c.bf16 %v1611_v42, %v1599_v41  ;;  %v1683_v18 = vld [vmem:[#allocation3 + $0x2fd8] sm:$0xff]  ;;  %v162_v41 = vld [vmem:[#allocation3 + $0x50] sm:$0xff] }
 0x286   :  { %5163 = vmatpush1.bf16.msra.mxu1 %v5162_v53  ;;  %4909 = vmatprep.subr.bf16.mxu0 %v4908_v54  ;;  %v1621_v53 = vld [vmem:[#allocation3 + $0x2de8] sm:$0xff]  ;;  %v5192_v28 = vpack.c.bf16 %v1683_v18, %v1671_v17  ;;  %v163_v33 = vld [vmem:[#allocation3 + $0x58] sm:$0xff]  ;;  %v210_v4 = vld [vmem:[#allocation3 + $0x1d0] sm:$0xff] }
 0x287   :  { %5165 = vmatprep.subr.bf16.mxu1 %v5164_v59  ;;  %v1633_v54 = vld [vmem:[#allocation3 + $0x2e48] sm:$0xff]  ;;  %v5182_v59 = vpack.c.bf16 %v1610_v52, %v1598_v49  ;;  %v175_v34 = vld [vmem:[#allocation3 + $0xb8] sm:$0xff]  ;;  %v5198_v49 = vpack.c.bf16 %v172_v40, %v160_v39  ;;  %v234_v17 = vld [vmem:[#allocation3 + $0x290] sm:$0xff] }
 0x288   :  { %v4928_v60 = vpack.c.bf16 %v1633_v54, %v1621_v53  ;;  %v5452_v42 = vpack.c.bf16 %v175_v34, %v163_v33  ;;  %v187_v47 = vld [vmem:[#allocation3 + $0x118] sm:$0xff]  ;;  %v184_v53 = vld [vmem:[#allocation3 + $0x100] sm:$0xff]  ;;  %v270_v34 = vld [vmem:[#allocation3 + $0x3b0] sm:$0xff] }
 0x289   :  { %4911 = vmatpush1.bf16.msra.mxu0 %v4910_v1  ;;  %v1634_v1 = vld [vmem:[#allocation3 + $0x2e50] sm:$0xff]  ;;  %v199_v48 = vld [vmem:[#allocation3 + $0x178] sm:$0xff]  ;;  %v196_v54 = vld [vmem:[#allocation3 + $0x160] sm:$0xff] }
 0x28a   :  { %5167 = vmatpush1.bf16.msra.mxu1 %v5166_v2  ;;  %4913 = vmatprep.subr.bf16.mxu0 %v4912_v3  ;;  %v1645_v2 = vld [vmem:[#allocation3 + $0x2ea8] sm:$0xff]  ;;  %v5456_v56 = vpack.c.bf16 %v199_v48, %v187_v47  ;;  %v235_v9 = vld [vmem:[#allocation3 + $0x298] sm:$0xff]  ;;  %v294_v48 = vld [vmem:[#allocation3 + $0x470] sm:$0xff] }
 0x28b   :  { %5169 = vmatprep.subr.bf16.mxu1 %v5168_v7  ;;  %v1657_v3 = vld [vmem:[#allocation3 + $0x2f08] sm:$0xff]  ;;  %v5186_v7 = vpack.c.bf16 %v1634_v1, %v1622_v63  ;;  %v5202_v63 = vpack.c.bf16 %v196_v54, %v184_v53  ;;  %v247_v10 = vld [vmem:[#allocation3 + $0x2f8] sm:$0xff]  ;;  %v318_v62 = vld [vmem:[#allocation3 + $0x530] sm:$0xff] }
 0x28c   :  { %v4932_v8 = vpack.c.bf16 %v1657_v3, %v1645_v2  ;;  %v208_v2 = vld [vmem:[#allocation3 + $0x1c0] sm:$0xff]  ;;  %v5464_v18 = vpack.c.bf16 %v247_v10, %v235_v9  ;;  %v259_v22 = vld [vmem:[#allocation3 + $0x358] sm:$0xff]  ;;  %v342_v10 = vld [vmem:[#allocation3 + $0x5f0] sm:$0xff] }
 0x28d   :  { %4915 = vmatpush1.bf16.msra.mxu0 %v4914_v14  ;;  %v1658_v14 = vld [vmem:[#allocation3 + $0x2f10] sm:$0xff]  ;;  %v220_v3 = vld [vmem:[#allocation3 + $0x220] sm:$0xff]  ;;  %v271_v26 = vld [vmem:[#allocation3 + $0x3b8] sm:$0xff] }
 0x28e   :  { %5171 = vmatpush1.bf16.msra.mxu1 %v5170_v15  ;;  %4917 = vmatprep.subr.bf16.mxu0 %v4916_v16  ;;  %v1669_v15 = vld [vmem:[#allocation3 + $0x2f68] sm:$0xff]  ;;  %v5468_v33 = vpack.c.bf16 %v271_v26, %v259_v22  ;;  %v295_v39 = vld [vmem:[#allocation3 + $0x478] sm:$0xff]  ;;  %v366_v26 = vld [vmem:[#allocation3 + $0x6b0] sm:$0xff] }
 0x28f   :  { %5173 = vmatprep.subr.bf16.mxu1 %v5172_v21  ;;  %v1681_v16 = vld [vmem:[#allocation3 + $0x2fc8] sm:$0xff]  ;;  %v5190_v21 = vpack.c.bf16 %v1658_v14, %v1646_v12  ;;  %v5206_v12 = vpack.c.bf16 %v220_v3, %v208_v2  ;;  %v319_v53 = vld [vmem:[#allocation3 + $0x538] sm:$0xff] }
 0x290   :  { %v4936_v23 = vpack.c.bf16 %v1681_v16, %v1669_v15  ;;  %v232_v15 = vld [vmem:[#allocation3 + $0x280] sm:$0xff]  ;;  %v343_v2 = vld [vmem:[#allocation3 + $0x5f8] sm:$0xff] }
 0x291   :  { %4919 = vmatpush1.bf16.msra.mxu0 %v4918_v29  ;;  %v1682_v29 = vld [vmem:[#allocation3 + $0x2fd0] sm:$0xff]  ;;  %v244_v16 = vld [vmem:[#allocation3 + $0x2e0] sm:$0xff] }
 0x292   :  { %5175 = vmatpush1.bf16.msra.mxu1 %v5174_v30  ;;  %4921 = vmatprep.subr.bf16.mxu0 %v4920_v31  ;;  %v161_v30 = vld [vmem:[#allocation3 + $0x48] sm:$0xff] }
 0x293   :  { %5177 = vmatprep.subr.bf16.mxu1 %v5176_v36  ;;  %v173_v31 = vld [vmem:[#allocation3 + $0xa8] sm:$0xff]  ;;  %v5194_v36 = vpack.c.bf16 %v1682_v29, %v1670_v27  ;;  %v5210_v27 = vpack.c.bf16 %v244_v16, %v232_v15  ;;  %v256_v29 = vld [vmem:[#allocation3 + $0x340] sm:$0xff]  ;;  %v367_v15 = vld [vmem:[#allocation3 + $0x6b8] sm:$0xff] }
 0x294   :  { %v5196_v37 = vpack.c.bf16 %v173_v31, %v161_v30  ;;  %v268_v30 = vld [vmem:[#allocation3 + $0x3a0] sm:$0xff]  ;;  %v258_v31 = vld [vmem:[#allocation3 + $0x350] sm:$0xff] }
 0x295   :  { %4923 = vmatpush1.bf16.msra.mxu0 %v4922_v43  ;;  %v174_v43 = vld [vmem:[#allocation3 + $0xb0] sm:$0xff]  ;;  %v5214_v40 = vpack.c.bf16 %v268_v30, %v256_v29  ;;  %v391_v29 = vld [vmem:[#allocation3 + $0x778] sm:$0xff] }
 0x296   :  { %5179 = vmatpush1.bf16.msra.mxu1 %v5178_v44  ;;  %4925 = vmatprep.subr.bf16.mxu0 %v4924_v46  ;;  %v185_v44 = vld [vmem:[#allocation3 + $0x108] sm:$0xff] }
 0x297   :  { %5181 = vmatprep.subr.bf16.mxu1 %v5180_v50  ;;  %v197_v46 = vld [vmem:[#allocation3 + $0x168] sm:$0xff]  ;;  %v5454_v50 = vpack.c.bf16 %v174_v43, %v162_v41  ;;  %v5470_v41 = vpack.c.bf16 %v270_v34, %v258_v31  ;;  %v280_v43 = vld [vmem:[#allocation3 + $0x400] sm:$0xff] }
 0x298   :  { %v5200_v52 = vpack.c.bf16 %v197_v46, %v185_v44  ;;  %v292_v44 = vld [vmem:[#allocation3 + $0x460] sm:$0xff]  ;;  %v282_v46 = vld [vmem:[#allocation3 + $0x410] sm:$0xff] }
 0x299   :  { %4927 = vmatpush1.bf16.msra.mxu0 %v4926_v57  ;;  %v198_v57 = vld [vmem:[#allocation3 + $0x170] sm:$0xff]  ;;  %v5218_v54 = vpack.c.bf16 %v292_v44, %v280_v43  ;;  %v376_v34 = vld [vmem:[#allocation3 + $0x700] sm:$0xff]  ;;  %v415_v43 = vld [vmem:[#allocation3 + $0x838] sm:$0xff] }
 0x29a   :  { %5183 = vmatpush1.bf16.msra.mxu1 %v5182_v59  ;;  %4929 = vmatprep.subr.bf16.mxu0 %v4928_v60  ;;  %v209_v59 = vld [vmem:[#allocation3 + $0x1c8] sm:$0xff] }
 0x29b   :  { %5185 = vmatprep.subr.bf16.mxu1 %v5184_v0  ;;  %v221_v60 = vld [vmem:[#allocation3 + $0x228] sm:$0xff]  ;;  %v5458_v0 = vpack.c.bf16 %v198_v57, %v186_v55  ;;  %v5474_v55 = vpack.c.bf16 %v294_v48, %v282_v46  ;;  %v304_v57 = vld [vmem:[#allocation3 + $0x4c0] sm:$0xff] }
 0x29c   :  { %v5204_v1 = vpack.c.bf16 %v221_v60, %v209_v59  ;;  %v316_v59 = vld [vmem:[#allocation3 + $0x520] sm:$0xff]  ;;  %v306_v60 = vld [vmem:[#allocation3 + $0x4d0] sm:$0xff] }
 0x29d   :  { %4931 = vmatpush1.bf16.msra.mxu0 %v4930_v45  ;;  %v222_v45 = vld [vmem:[#allocation3 + $0x230] sm:$0xff]  ;;  %v5222_v3 = vpack.c.bf16 %v316_v59, %v304_v57  ;;  %v400_v48 = vld [vmem:[#allocation3 + $0x7c0] sm:$0xff]  ;;  %v439_v57 = vld [vmem:[#allocation3 + $0x8f8] sm:$0xff] }
 0x29e   :  { %5187 = vmatpush1.bf16.msra.mxu1 %v5186_v7  ;;  %4933 = vmatprep.subr.bf16.mxu0 %v4932_v8  ;;  %v233_v7 = vld [vmem:[#allocation3 + $0x288] sm:$0xff] }
 0x29f   :  { %5189 = vmatprep.subr.bf16.mxu1 %v5188_v13  ;;  %v245_v8 = vld [vmem:[#allocation3 + $0x2e8] sm:$0xff]  ;;  %v5462_v13 = vpack.c.bf16 %v222_v45, %v210_v4  ;;  %v5478_v4 = vpack.c.bf16 %v318_v62, %v306_v60  ;;  %v328_v45 = vld [vmem:[#allocation3 + $0x580] sm:$0xff] }
 0x2a0   :  { %v5208_v14 = vpack.c.bf16 %v245_v8, %v233_v7  ;;  %v340_v7 = vld [vmem:[#allocation3 + $0x5e0] sm:$0xff]  ;;  %v330_v8 = vld [vmem:[#allocation3 + $0x590] sm:$0xff] }
 0x2a1   :  { %4935 = vmatpush1.bf16.msra.mxu0 %v4934_v20  ;;  %v246_v20 = vld [vmem:[#allocation3 + $0x2f0] sm:$0xff]  ;;  %v5226_v16 = vpack.c.bf16 %v340_v7, %v328_v45  ;;  %v424_v62 = vld [vmem:[#allocation3 + $0x880] sm:$0xff]  ;;  %v463_v45 = vld [vmem:[#allocation3 + $0x9b8] sm:$0xff] }
 0x2a2   :  { %5191 = vmatpush1.bf16.msra.mxu1 %v5190_v21  ;;  %4937 = vmatprep.subr.bf16.mxu0 %v4936_v23  ;;  %v257_v21 = vld [vmem:[#allocation3 + $0x348] sm:$0xff] }
 0x2a3   :  { %5193 = vmatprep.subr.bf16.mxu1 %v5192_v28  ;;  %v269_v23 = vld [vmem:[#allocation3 + $0x3a8] sm:$0xff] }
 0x2a4   :  { %v5212_v28 = vpack.c.bf16 %v269_v23, %v257_v21  ;;  %v364_v21 = vld [vmem:[#allocation3 + $0x6a0] sm:$0xff]  ;;  %v354_v23 = vld [vmem:[#allocation3 + $0x650] sm:$0xff] }
 0x2a5   :  { %4939 = vmatpush1.bf16.msra.mxu0 %v4938_v35  ;;  %v281_v35 = vld [vmem:[#allocation3 + $0x408] sm:$0xff]  ;;  %v5486_v31 = vpack.c.bf16 %v366_v26, %v354_v23  ;;  %v472_v26 = vld [vmem:[#allocation3 + $0xa00] sm:$0xff] }
 0x2a6   :  { %5195 = vmatpush1.bf16.msra.mxu1 %v5194_v36  ;;  %5197 = vmatprep.subr.bf16.mxu0 %v5196_v37  ;;  %v293_v36 = vld [vmem:[#allocation3 + $0x468] sm:$0xff]  ;;  %v283_v37 = vld [vmem:[#allocation3 + $0x418] sm:$0xff] }
 0x2a7   :  { %5453 = vmatprep.subr.bf16.mxu1 %v5452_v42  ;;  %v5216_v42 = vpack.c.bf16 %v293_v36, %v281_v35  ;;  %v5472_v47 = vpack.c.bf16 %v295_v39, %v283_v37  ;;  %v388_v35 = vld [vmem:[#allocation3 + $0x760] sm:$0xff]  ;;  %v378_v36 = vld [vmem:[#allocation3 + $0x710] sm:$0xff] }
 0x2a8   :  { %2578 = vmatmul.mubr.f32.vlgmr.msra.gmra.mrb[2].mxu0 %v6322_v6  ;;  %v390_v39 = vld [vmem:[#allocation3 + $0x770] sm:$0xff]  ;;  %v5234_v44 = vpack.c.bf16 %v388_v35, %v376_v34  ;;  %v511_v34 = vld [vmem:[#allocation3 + $0xb38] sm:$0xff] }
 0x2a9   :  { %2862 = vmatmul.mubr.f32.vlgmr.msra.gmra.mrb[2].mxu1 %v6322_v6  ;;  %5199 = vmatpush1.bf16.msra.mxu0 %v5198_v49  ;;  %v305_v49 = vld [vmem:[#allocation3 + $0x4c8] sm:$0xff]  ;;  %v5490_v46 = vpack.c.bf16 %v390_v39, %v378_v36  ;;  %v496_v39 = vld [vmem:[#allocation3 + $0xac0] sm:$0xff] }
 0x2aa   :  { %5455 = vmatpush1.bf16.msra.mxu1 %v5454_v50  ;;  %5201 = vmatprep.subr.bf16.mxu0 %v5200_v52  ;;  %v317_v50 = vld [vmem:[#allocation3 + $0x528] sm:$0xff]  ;;  %v307_v52 = vld [vmem:[#allocation3 + $0x4d8] sm:$0xff] }
 0x2ab   :  { %5457 = vmatprep.subr.bf16.mxu1 %v5456_v56  ;;  %2932 = vmatprep.mubr.f32.mxu0 %v6285_v32  ;;  %v5220_v56 = vpack.c.bf16 %v317_v50, %v305_v49  ;;  %v5476_v61 = vpack.c.bf16 %v319_v53, %v307_v52  ;;  %v412_v49 = vld [vmem:[#allocation3 + $0x820] sm:$0xff]  ;;  %v402_v50 = vld [vmem:[#allocation3 + $0x7d0] sm:$0xff] }
 0x2ac   :  { %3216 = vmatprep.mubr.f32.mxu1 %v6285_v32  ;;  %v5466_v32 = vpack.c.bf16 %v246_v20, %v234_v17  ;;  %v5482_v17 = vpack.c.bf16 %v342_v10, %v330_v8  ;;  %v352_v20 = vld [vmem:[#allocation3 + $0x640] sm:$0xff]  ;;  %v414_v53 = vld [vmem:[#allocation3 + $0x830] sm:$0xff]  ;;  %v5238_v59 = vpack.c.bf16 %v412_v49, %v400_v48  ;;  %v535_v48 = vld [vmem:[#allocation3 + $0xbf8] sm:$0xff] }
 0x2ad   :  { %5203 = vmatpush1.bf16.msra.mxu0 %v5202_v63  ;;  %v329_v63 = vld [vmem:[#allocation3 + $0x588] sm:$0xff]  ;;  %v5230_v30 = vpack.c.bf16 %v364_v21, %v352_v20  ;;  %v5494_v60 = vpack.c.bf16 %v414_v53, %v402_v50  ;;  %v448_v10 = vld [vmem:[#allocation3 + $0x940] sm:$0xff]  ;;  %v487_v20 = vld [vmem:[#allocation3 + $0xa78] sm:$0xff] }
 0x2ae   :  { %5459 = vmatpush1.bf16.msra.mxu1 %v5458_v0  ;;  %5205 = vmatprep.subr.bf16.mxu0 %v5204_v1  ;;  %v341_v0 = vld [vmem:[#allocation3 + $0x5e8] sm:$0xff]  ;;  %v331_v1 = vld [vmem:[#allocation3 + $0x598] sm:$0xff]  ;;  %v520_v53 = vld [vmem:[#allocation3 + $0xb80] sm:$0xff] }
 0x2af   :  { %5461 = vmatprep.subr.bf16.mxu1 %v5460_v5  ;;  %v5224_v5 = vpack.c.bf16 %v341_v0, %v329_v63  ;;  %v5480_v9 = vpack.c.bf16 %v343_v2, %v331_v1  ;;  %v436_v63 = vld [vmem:[#allocation3 + $0x8e0] sm:$0xff]  ;;  %v426_v0 = vld [vmem:[#allocation3 + $0x890] sm:$0xff] }
 0x2b0   :  { %v438_v2 = vld [vmem:[#allocation3 + $0x8f0] sm:$0xff]  ;;  %v5242_v7 = vpack.c.bf16 %v436_v63, %v424_v62  ;;  %v559_v62 = vld [vmem:[#allocation3 + $0xcb8] sm:$0xff] }
 0x2b1   :  { %5207 = vmatpush1.bf16.msra.mxu0 %v5206_v12  ;;  %v353_v12 = vld [vmem:[#allocation3 + $0x648] sm:$0xff]  ;;  %v5498_v8 = vpack.c.bf16 %v438_v2, %v426_v0  ;;  %v544_v2 = vld [vmem:[#allocation3 + $0xc40] sm:$0xff] }
 0x2b2   :  { %5463 = vmatpush1.bf16.msra.mxu1 %v5462_v13  ;;  %5209 = vmatprep.subr.bf16.mxu0 %v5208_v14  ;;  %v365_v13 = vld [vmem:[#allocation3 + $0x6a8] sm:$0xff]  ;;  %v355_v14 = vld [vmem:[#allocation3 + $0x658] sm:$0xff] }
 0x2b3   :  { %5465 = vmatprep.subr.bf16.mxu1 %v5464_v18  ;;  %v5228_v18 = vpack.c.bf16 %v365_v13, %v353_v12  ;;  %v5484_v22 = vpack.c.bf16 %v367_v15, %v355_v14  ;;  %v460_v12 = vld [vmem:[#allocation3 + $0x9a0] sm:$0xff]  ;;  %v450_v13 = vld [vmem:[#allocation3 + $0x950] sm:$0xff] }
 0x2b4   :  { %v462_v15 = vld [vmem:[#allocation3 + $0x9b0] sm:$0xff]  ;;  %v5246_v21 = vpack.c.bf16 %v460_v12, %v448_v10  ;;  %v583_v10 = vld [vmem:[#allocation3 + $0xd78] sm:$0xff] }
 0x2b5   :  { %5211 = vmatpush1.bf16.msra.mxu0 %v5210_v27  ;;  %v377_v27 = vld [vmem:[#allocation3 + $0x708] sm:$0xff]  ;;  %v5502_v23 = vpack.c.bf16 %v462_v15, %v450_v13  ;;  %v568_v15 = vld [vmem:[#allocation3 + $0xd00] sm:$0xff] }
 0x2b6   :  { %5467 = vmatpush1.bf16.msra.mxu1 %v5466_v32  ;;  %5213 = vmatprep.subr.bf16.mxu0 %v5212_v28  ;;  %v389_v32 = vld [vmem:[#allocation3 + $0x768] sm:$0xff]  ;;  %v379_v28 = vld [vmem:[#allocation3 + $0x718] sm:$0xff] }
 0x2b7   :  { %5469 = vmatprep.subr.bf16.mxu1 %v5468_v33  ;;  %v5232_v33 = vpack.c.bf16 %v389_v32, %v377_v27  ;;  %v5488_v37 = vpack.c.bf16 %v391_v29, %v379_v28  ;;  %v484_v27 = vld [vmem:[#allocation3 + $0xa60] sm:$0xff]  ;;  %v474_v32 = vld [vmem:[#allocation3 + $0xa10] sm:$0xff] }
 0x2b8   :  { %v486_v29 = vld [vmem:[#allocation3 + $0xa70] sm:$0xff]  ;;  %v5250_v35 = vpack.c.bf16 %v484_v27, %v472_v26  ;;  %v607_v26 = vld [vmem:[#allocation3 + $0xe38] sm:$0xff] }
 0x2b9   :  { %5215 = vmatpush1.bf16.msra.mxu0 %v5214_v40  ;;  %v401_v40 = vld [vmem:[#allocation3 + $0x7c8] sm:$0xff]  ;;  %v5506_v36 = vpack.c.bf16 %v486_v29, %v474_v32  ;;  %v592_v29 = vld [vmem:[#allocation3 + $0xdc0] sm:$0xff] }
 0x2ba   :  { %5471 = vmatpush1.bf16.msra.mxu1 %v5470_v41  ;;  %5217 = vmatprep.subr.bf16.mxu0 %v5216_v42  ;;  %v413_v41 = vld [vmem:[#allocation3 + $0x828] sm:$0xff]  ;;  %v403_v42 = vld [vmem:[#allocation3 + $0x7d8] sm:$0xff] }
 0x2bb   :  { %5473 = vmatprep.subr.bf16.mxu1 %v5472_v47  ;;  %v5236_v47 = vpack.c.bf16 %v413_v41, %v401_v40  ;;  %v5492_v52 = vpack.c.bf16 %v415_v43, %v403_v42  ;;  %v508_v40 = vld [vmem:[#allocation3 + $0xb20] sm:$0xff]  ;;  %v498_v41 = vld [vmem:[#allocation3 + $0xad0] sm:$0xff] }
 0x2bc   :  { %v510_v43 = vld [vmem:[#allocation3 + $0xb30] sm:$0xff]  ;;  %v5254_v49 = vpack.c.bf16 %v508_v40, %v496_v39  ;;  %v631_v39 = vld [vmem:[#allocation3 + $0xef8] sm:$0xff] }
 0x2bd   :  { %5219 = vmatpush1.bf16.msra.mxu0 %v5218_v54  ;;  %v425_v54 = vld [vmem:[#allocation3 + $0x888] sm:$0xff]  ;;  %v5510_v50 = vpack.c.bf16 %v510_v43, %v498_v41  ;;  %v628_v43 = vld [vmem:[#allocation3 + $0xee0] sm:$0xff] }
 0x2be   :  { %5475 = vmatpush1.bf16.msra.mxu1 %v5474_v55  ;;  %5221 = vmatprep.subr.bf16.mxu0 %v5220_v56  ;;  %v437_v55 = vld [vmem:[#allocation3 + $0x8e8] sm:$0xff]  ;;  %v427_v56 = vld [vmem:[#allocation3 + $0x898] sm:$0xff] }
 0x2bf   :  { %5477 = vmatprep.subr.bf16.mxu1 %v5476_v61  ;;  %v5240_v61 = vpack.c.bf16 %v437_v55, %v425_v54  ;;  %v5496_v1 = vpack.c.bf16 %v439_v57, %v427_v56  ;;  %v532_v54 = vld [vmem:[#allocation3 + $0xbe0] sm:$0xff]  ;;  %v522_v55 = vld [vmem:[#allocation3 + $0xb90] sm:$0xff] }
 0x2c0   :  { %v534_v57 = vld [vmem:[#allocation3 + $0xbf0] sm:$0xff]  ;;  %v5258_v63 = vpack.c.bf16 %v532_v54, %v520_v53 }
 0x2c1   :  { %5223 = vmatpush1.bf16.msra.mxu0 %v5222_v3  ;;  %v449_v3 = vld [vmem:[#allocation3 + $0x948] sm:$0xff]  ;;  %v5514_v0 = vpack.c.bf16 %v534_v57, %v522_v55  ;;  %v640_v55 = vld [vmem:[#allocation3 + $0xf40] sm:$0xff]  ;;  %v642_v57 = vld [vmem:[#allocation3 + $0xf50] sm:$0xff] }
 0x2c2   :  { %5479 = vmatpush1.bf16.msra.mxu1 %v5478_v4  ;;  %5225 = vmatprep.subr.bf16.mxu0 %v5224_v5  ;;  %v461_v4 = vld [vmem:[#allocation3 + $0x9a8] sm:$0xff]  ;;  %v451_v5 = vld [vmem:[#allocation3 + $0x958] sm:$0xff] }
 0x2c3   :  { %5481 = vmatprep.subr.bf16.mxu1 %v5480_v9  ;;  %v5244_v9 = vpack.c.bf16 %v461_v4, %v449_v3  ;;  %v5500_v14 = vpack.c.bf16 %v463_v45, %v451_v5  ;;  %v556_v3 = vld [vmem:[#allocation3 + $0xca0] sm:$0xff]  ;;  %v546_v4 = vld [vmem:[#allocation3 + $0xc50] sm:$0xff] }
 0x2c4   :  { %v558_v45 = vld [vmem:[#allocation3 + $0xcb0] sm:$0xff]  ;;  %v5262_v12 = vpack.c.bf16 %v556_v3, %v544_v2 }
 0x2c5   :  { %5227 = vmatpush1.bf16.msra.mxu0 %v5226_v16  ;;  %v473_v16 = vld [vmem:[#allocation3 + $0xa08] sm:$0xff]  ;;  %v5518_v13 = vpack.c.bf16 %v558_v45, %v546_v4  ;;  %v664_v4 = vld [vmem:[#allocation3 + $0x1000] sm:$0xff]  ;;  %v666_v45 = vld [vmem:[#allocation3 + $0x1010] sm:$0xff] }
 0x2c6   :  { %5483 = vmatpush1.bf16.msra.mxu1 %v5482_v17  ;;  %5229 = vmatprep.subr.bf16.mxu0 %v5228_v18  ;;  %v485_v17 = vld [vmem:[#allocation3 + $0xa68] sm:$0xff]  ;;  %v475_v18 = vld [vmem:[#allocation3 + $0xa18] sm:$0xff] }
 0x2c7   :  { %5485 = vmatprep.subr.bf16.mxu1 %v5484_v22  ;;  %v5248_v22 = vpack.c.bf16 %v485_v17, %v473_v16  ;;  %v5504_v28 = vpack.c.bf16 %v487_v20, %v475_v18  ;;  %v580_v16 = vld [vmem:[#allocation3 + $0xd60] sm:$0xff]  ;;  %v570_v17 = vld [vmem:[#allocation3 + $0xd10] sm:$0xff] }
 0x2c8   :  { %v582_v20 = vld [vmem:[#allocation3 + $0xd70] sm:$0xff]  ;;  %v5266_v27 = vpack.c.bf16 %v580_v16, %v568_v15 }
 0x2c9   :  { %5231 = vmatpush1.bf16.msra.mxu0 %v5230_v30  ;;  %v497_v30 = vld [vmem:[#allocation3 + $0xac8] sm:$0xff]  ;;  %v5522_v32 = vpack.c.bf16 %v582_v20, %v570_v17  ;;  %v688_v17 = vld [vmem:[#allocation3 + $0x10c0] sm:$0xff]  ;;  %v690_v20 = vld [vmem:[#allocation3 + $0x10d0] sm:$0xff] }
 0x2ca   :  { %5487 = vmatpush1.bf16.msra.mxu1 %v5486_v31  ;;  %5233 = vmatprep.subr.bf16.mxu0 %v5232_v33  ;;  %v509_v31 = vld [vmem:[#allocation3 + $0xb28] sm:$0xff]  ;;  %v499_v33 = vld [vmem:[#allocation3 + $0xad8] sm:$0xff] }
 0x2cb   :  { %5489 = vmatprep.subr.bf16.mxu1 %v5488_v37  ;;  %v5252_v37 = vpack.c.bf16 %v509_v31, %v497_v30  ;;  %v5508_v42 = vpack.c.bf16 %v511_v34, %v499_v33  ;;  %v604_v30 = vld [vmem:[#allocation3 + $0xe20] sm:$0xff]  ;;  %v594_v31 = vld [vmem:[#allocation3 + $0xdd0] sm:$0xff] }
 0x2cc   :  { %v606_v34 = vld [vmem:[#allocation3 + $0xe30] sm:$0xff] }
 0x2cd   :  { %5235 = vmatpush1.bf16.msra.mxu0 %v5234_v44  ;;  %v521_v44 = vld [vmem:[#allocation3 + $0xb88] sm:$0xff]  ;;  %v5526_v40 = vpack.c.bf16 %v606_v34, %v594_v31  ;;  %v712_v31 = vld [vmem:[#allocation3 + $0x1180] sm:$0xff]  ;;  %v714_v34 = vld [vmem:[#allocation3 + $0x1190] sm:$0xff] }
 0x2ce   :  { %5491 = vmatpush1.bf16.msra.mxu1 %v5490_v46  ;;  %5237 = vmatprep.subr.bf16.mxu0 %v5236_v47  ;;  %v533_v46 = vld [vmem:[#allocation3 + $0xbe8] sm:$0xff]  ;;  %v523_v47 = vld [vmem:[#allocation3 + $0xb98] sm:$0xff] }
 0x2cf   :  { %5493 = vmatprep.subr.bf16.mxu1 %v5492_v52  ;;  %v5256_v52 = vpack.c.bf16 %v533_v46, %v521_v44  ;;  %v5512_v56 = vpack.c.bf16 %v535_v48, %v523_v47  ;;  %v618_v44 = vld [vmem:[#allocation3 + $0xe90] sm:$0xff]  ;;  %v641_v48 = vld [vmem:[#allocation3 + $0xf48] sm:$0xff] }
 0x2d0   :  { %v630_v47 = vld [vmem:[#allocation3 + $0xef0] sm:$0xff] }
 0x2d1   :  { %5239 = vmatpush1.bf16.msra.mxu0 %v5238_v59  ;;  %v545_v59 = vld [vmem:[#allocation3 + $0xc48] sm:$0xff] }
 0x2d2   :  { %5495 = vmatpush1.bf16.msra.mxu1 %v5494_v60  ;;  %5241 = vmatprep.subr.bf16.mxu0 %v5240_v61  ;;  %v557_v60 = vld [vmem:[#allocation3 + $0xca8] sm:$0xff]  ;;  %v547_v61 = vld [vmem:[#allocation3 + $0xc58] sm:$0xff] }
 0x2d3   :  { %5497 = vmatprep.subr.bf16.mxu1 %v5496_v1  ;;  %v5260_v1 = vpack.c.bf16 %v557_v60, %v545_v59  ;;  %v5516_v5 = vpack.c.bf16 %v559_v62, %v547_v61  ;;  %v654_v60 = vld [vmem:[#allocation3 + $0xfb0] sm:$0xff]  ;;  %v665_v61 = vld [vmem:[#allocation3 + $0x1008] sm:$0xff] }
 0x2d4   :  { %v677_v62 = vld [vmem:[#allocation3 + $0x1068] sm:$0xff]  ;;  %v5534_v2 = vpack.c.bf16 %v654_v60, %v642_v57  ;;  %v760_v57 = vld [vmem:[#allocation3 + $0x1300] sm:$0xff]  ;;  %v762_v60 = vld [vmem:[#allocation3 + $0x1310] sm:$0xff] }
 0x2d5   :  { %5243 = vmatpush1.bf16.msra.mxu0 %v5242_v7  ;;  %v569_v7 = vld [vmem:[#allocation3 + $0xd08] sm:$0xff]  ;;  %v5280_v3 = vpack.c.bf16 %v677_v62, %v665_v61  ;;  %v774_v62 = vld [vmem:[#allocation3 + $0x1370] sm:$0xff] }
 0x2d6   :  { %5499 = vmatpush1.bf16.msra.mxu1 %v5498_v8  ;;  %5245 = vmatprep.subr.bf16.mxu0 %v5244_v9  ;;  %v581_v8 = vld [vmem:[#allocation3 + $0xd68] sm:$0xff]  ;;  %v571_v9 = vld [vmem:[#allocation3 + $0xd18] sm:$0xff] }
 0x2d7   :  { %5501 = vmatprep.subr.bf16.mxu1 %v5500_v14  ;;  %v5264_v14 = vpack.c.bf16 %v581_v8, %v569_v7  ;;  %v5520_v18 = vpack.c.bf16 %v583_v10, %v571_v9  ;;  %v678_v8 = vld [vmem:[#allocation3 + $0x1070] sm:$0xff]  ;;  %v689_v9 = vld [vmem:[#allocation3 + $0x10c8] sm:$0xff] }
 0x2d8   :  { %v701_v10 = vld [vmem:[#allocation3 + $0x1128] sm:$0xff]  ;;  %v5538_v15 = vpack.c.bf16 %v678_v8, %v666_v45  ;;  %v784_v45 = vld [vmem:[#allocation3 + $0x13c0] sm:$0xff]  ;;  %v786_v8 = vld [vmem:[#allocation3 + $0x13d0] sm:$0xff] }
 0x2d9   :  { %5247 = vmatpush1.bf16.msra.mxu0 %v5246_v21  ;;  %v593_v21 = vld [vmem:[#allocation3 + $0xdc8] sm:$0xff]  ;;  %v5284_v16 = vpack.c.bf16 %v701_v10, %v689_v9  ;;  %v798_v10 = vld [vmem:[#allocation3 + $0x1430] sm:$0xff] }
 0x2da   :  { %5503 = vmatpush1.bf16.msra.mxu1 %v5502_v23  ;;  %5249 = vmatprep.subr.bf16.mxu0 %v5248_v22  ;;  %v605_v23 = vld [vmem:[#allocation3 + $0xe28] sm:$0xff]  ;;  %v595_v22 = vld [vmem:[#allocation3 + $0xdd8] sm:$0xff] }
 0x2db   :  { %5505 = vmatprep.subr.bf16.mxu1 %v5504_v28  ;;  %v5268_v28 = vpack.c.bf16 %v605_v23, %v593_v21  ;;  %v5524_v33 = vpack.c.bf16 %v607_v26, %v595_v22  ;;  %v702_v23 = vld [vmem:[#allocation3 + $0x1130] sm:$0xff]  ;;  %v713_v22 = vld [vmem:[#allocation3 + $0x1188] sm:$0xff] }
 0x2dc   :  { %v725_v26 = vld [vmem:[#allocation3 + $0x11e8] sm:$0xff] }
 0x2dd   :  { %5251 = vmatpush1.bf16.msra.mxu0 %v5250_v35  ;;  %v617_v35 = vld [vmem:[#allocation3 + $0xe88] sm:$0xff] }
 0x2de   :  { %5507 = vmatpush1.bf16.msra.mxu1 %v5506_v36  ;;  %5253 = vmatprep.subr.bf16.mxu0 %v5252_v37  ;;  %v629_v36 = vld [vmem:[#allocation3 + $0xee8] sm:$0xff]  ;;  %v619_v37 = vld [vmem:[#allocation3 + $0xe98] sm:$0xff] }
 0x2df   :  { %5509 = vmatprep.subr.bf16.mxu1 %v5508_v42  ;;  %v5272_v41 = vpack.c.bf16 %v629_v36, %v617_v35  ;;  %v616_v42 = vld [vmem:[#allocation3 + $0xe80] sm:$0xff]  ;;  %v5528_v46 = vpack.c.bf16 %v631_v39, %v619_v37  ;;  %v726_v36 = vld [vmem:[#allocation3 + $0x11f0] sm:$0xff]  ;;  %v737_v37 = vld [vmem:[#allocation3 + $0x1248] sm:$0xff] }
 0x2e0   :  { %v5274_v53 = vpack.c.bf16 %v628_v43, %v616_v42  ;;  %v749_v39 = vld [vmem:[#allocation3 + $0x12a8] sm:$0xff]  ;;  %v5546_v42 = vpack.c.bf16 %v726_v36, %v714_v34  ;;  %v832_v34 = vld [vmem:[#allocation3 + $0x1540] sm:$0xff]  ;;  %v834_v36 = vld [vmem:[#allocation3 + $0x1550] sm:$0xff] }
 0x2e1   :  { %5255 = vmatpush1.bf16.msra.mxu0 %v5254_v49  ;;  %v653_v49 = vld [vmem:[#allocation3 + $0xfa8] sm:$0xff]  ;;  %v5292_v43 = vpack.c.bf16 %v749_v39, %v737_v37  ;;  %v846_v39 = vld [vmem:[#allocation3 + $0x15b0] sm:$0xff] }
 0x2e2   :  { %5511 = vmatpush1.bf16.msra.mxu1 %v5510_v50  ;;  %5257 = vmatprep.subr.bf16.mxu0 %v5256_v52  ;;  %v643_v50 = vld [vmem:[#allocation3 + $0xf58] sm:$0xff]  ;;  %v5276_v54 = vpack.c.bf16 %v653_v49, %v641_v48  ;;  %v750_v49 = vld [vmem:[#allocation3 + $0x12b0] sm:$0xff] }
 0x2e3   :  { %5513 = vmatprep.subr.bf16.mxu1 %v5512_v56  ;;  %v655_v52 = vld [vmem:[#allocation3 + $0xfb8] sm:$0xff]  ;;  %v652_v56 = vld [vmem:[#allocation3 + $0xfa0] sm:$0xff] }
 0x2e4   :  { %v5532_v59 = vpack.c.bf16 %v655_v52, %v643_v50  ;;  %v761_v50 = vld [vmem:[#allocation3 + $0x1308] sm:$0xff] }
 0x2e5   :  { %5259 = vmatpush1.bf16.msra.mxu0 %v5258_v63  ;;  %v667_v63 = vld [vmem:[#allocation3 + $0x1018] sm:$0xff]  ;;  %v773_v52 = vld [vmem:[#allocation3 + $0x1368] sm:$0xff] }
 0x2e6   :  { %5515 = vmatpush1.bf16.msra.mxu1 %v5514_v0  ;;  %5261 = vmatprep.subr.bf16.mxu0 %v5260_v1  ;;  %v679_v0 = vld [vmem:[#allocation3 + $0x1078] sm:$0xff]  ;;  %v5278_v1 = vpack.c.bf16 %v652_v56, %v640_v55  ;;  %v5296_v56 = vpack.c.bf16 %v773_v52, %v761_v50  ;;  %v870_v52 = vld [vmem:[#allocation3 + $0x1670] sm:$0xff] }
 0x2e7   :  { %5517 = vmatprep.subr.bf16.mxu1 %v5516_v5  ;;  %v676_v5 = vld [vmem:[#allocation3 + $0x1060] sm:$0xff]  ;;  %v5536_v7 = vpack.c.bf16 %v679_v0, %v667_v63  ;;  %v785_v63 = vld [vmem:[#allocation3 + $0x13c8] sm:$0xff] }
 0x2e8   :  { %2933 = vmatmul.mubr.f32.vlgmr.msra.gmra.mrb[4].mxu0 %v6281_v25  ;;  %v797_v0 = vld [vmem:[#allocation3 + $0x1428] sm:$0xff] }
 0x2e9   :  { %5263 = vmatpush1.bf16.msra.mxu0 %v5262_v12  ;;  %3217 = vmatmul.mubr.f32.vlgmr.msra.gmra.mrb[4].mxu1 %v6281_v25  ;;  %v5270_v25 = vpack.c.bf16 %v604_v30, %v592_v29  ;;  %v691_v12 = vld [vmem:[#allocation3 + $0x10d8] sm:$0xff]  ;;  %v5542_v29 = vpack.c.bf16 %v702_v23, %v690_v20  ;;  %v5288_v30 = vpack.c.bf16 %v725_v26, %v713_v22  ;;  %v808_v20 = vld [vmem:[#allocation3 + $0x1480] sm:$0xff]  ;;  %v810_v23 = vld [vmem:[#allocation3 + $0x1490] sm:$0xff] }
 0x2ea   :  { %5519 = vmatpush1.bf16.msra.mxu1 %v5518_v13  ;;  %5265 = vmatprep.subr.bf16.mxu0 %v5264_v14  ;;  %v703_v13 = vld [vmem:[#allocation3 + $0x1138] sm:$0xff]  ;;  %v5282_v14 = vpack.c.bf16 %v676_v5, %v664_v4  ;;  %v5554_v4 = vpack.c.bf16 %v774_v62, %v762_v60  ;;  %v5300_v5 = vpack.c.bf16 %v797_v0, %v785_v63  ;;  %v822_v26 = vld [vmem:[#allocation3 + $0x14f0] sm:$0xff]  ;;  %v880_v60 = vld [vmem:[#allocation3 + $0x16c0] sm:$0xff] }
 0x2eb   :  { %5521 = vmatprep.subr.bf16.mxu1 %v5520_v18  ;;  %3003 = vmatprep.mubr.f32.mxu0 %v6296_v38  ;;  %v700_v18 = vld [vmem:[#allocation3 + $0x1120] sm:$0xff]  ;;  %v5540_v21 = vpack.c.bf16 %v703_v13, %v691_v12  ;;  %v809_v12 = vld [vmem:[#allocation3 + $0x1488] sm:$0xff]  ;;  %v882_v62 = vld [vmem:[#allocation3 + $0x16d0] sm:$0xff] }
 0x2ec   :  { %3287 = vmatprep.mubr.f32.mxu1 %v6296_v38  ;;  %v5530_v38 = vpack.c.bf16 %v630_v47, %v618_v44  ;;  %v736_v44 = vld [vmem:[#allocation3 + $0x1240] sm:$0xff]  ;;  %v738_v47 = vld [vmem:[#allocation3 + $0x1250] sm:$0xff]  ;;  %v821_v13 = vld [vmem:[#allocation3 + $0x14e8] sm:$0xff] }
 0x2ed   :  { %5267 = vmatpush1.bf16.msra.mxu0 %v5266_v27  ;;  %v715_v27 = vld [vmem:[#allocation3 + $0x1198] sm:$0xff]  ;;  %v5550_v55 = vpack.c.bf16 %v750_v49, %v738_v47  ;;  %v856_v47 = vld [vmem:[#allocation3 + $0x1600] sm:$0xff]  ;;  %v858_v49 = vld [vmem:[#allocation3 + $0x1610] sm:$0xff] }
 0x2ee   :  { %5523 = vmatpush1.bf16.msra.mxu1 %v5522_v32  ;;  %5269 = vmatprep.subr.bf16.mxu0 %v5268_v28  ;;  %v727_v32 = vld [vmem:[#allocation3 + $0x11f8] sm:$0xff]  ;;  %v5286_v28 = vpack.c.bf16 %v700_v18, %v688_v17  ;;  %v5558_v17 = vpack.c.bf16 %v798_v10, %v786_v8  ;;  %v5304_v18 = vpack.c.bf16 %v821_v13, %v809_v12  ;;  %v894_v0 = vld [vmem:[#allocation3 + $0x1730] sm:$0xff]  ;;  %v904_v8 = vld [vmem:[#allocation3 + $0x1780] sm:$0xff] }
 0x2ef   :  { %5525 = vmatprep.subr.bf16.mxu1 %v5524_v33  ;;  %v724_v33 = vld [vmem:[#allocation3 + $0x11e0] sm:$0xff]  ;;  %v5544_v35 = vpack.c.bf16 %v727_v32, %v715_v27  ;;  %v833_v27 = vld [vmem:[#allocation3 + $0x1548] sm:$0xff]  ;;  %v906_v10 = vld [vmem:[#allocation3 + $0x1790] sm:$0xff] }
 0x2f0   :  { %v845_v32 = vld [vmem:[#allocation3 + $0x15a8] sm:$0xff]  ;;  %v918_v13 = vld [vmem:[#allocation3 + $0x17f0] sm:$0xff] }
 0x2f1   :  { %5271 = vmatpush1.bf16.msra.mxu0 %v5270_v25  ;;  %v739_v25 = vld [vmem:[#allocation3 + $0x1258] sm:$0xff] }
 0x2f2   :  { %5527 = vmatpush1.bf16.msra.mxu1 %v5526_v40  ;;  %5273 = vmatprep.subr.bf16.mxu0 %v5272_v41  ;;  %v751_v40 = vld [vmem:[#allocation3 + $0x12b8] sm:$0xff]  ;;  %v5290_v41 = vpack.c.bf16 %v724_v33, %v712_v31  ;;  %v5562_v31 = vpack.c.bf16 %v822_v26, %v810_v23  ;;  %v5308_v33 = vpack.c.bf16 %v845_v32, %v833_v27  ;;  %v928_v23 = vld [vmem:[#allocation3 + $0x1840] sm:$0xff]  ;;  %v930_v26 = vld [vmem:[#allocation3 + $0x1850] sm:$0xff] }
 0x2f3   :  { %5529 = vmatprep.subr.bf16.mxu1 %v5528_v46  ;;  %v748_v46 = vld [vmem:[#allocation3 + $0x12a0] sm:$0xff]  ;;  %v5548_v48 = vpack.c.bf16 %v751_v40, %v739_v25  ;;  %v857_v25 = vld [vmem:[#allocation3 + $0x1608] sm:$0xff]  ;;  %v942_v32 = vld [vmem:[#allocation3 + $0x18b0] sm:$0xff] }
 0x2f4   :  { %v869_v40 = vld [vmem:[#allocation3 + $0x1668] sm:$0xff] }
 0x2f5   :  { %5275 = vmatpush1.bf16.msra.mxu0 %v5274_v53  ;;  %v763_v53 = vld [vmem:[#allocation3 + $0x1318] sm:$0xff] }
 0x2f6   :  { %5531 = vmatpush1.bf16.msra.mxu1 %v5530_v38  ;;  %5277 = vmatprep.subr.bf16.mxu0 %v5276_v54  ;;  %v775_v38 = vld [vmem:[#allocation3 + $0x1378] sm:$0xff]  ;;  %v5294_v54 = vpack.c.bf16 %v748_v46, %v736_v44  ;;  %v5566_v44 = vpack.c.bf16 %v846_v39, %v834_v36  ;;  %v5312_v46 = vpack.c.bf16 %v869_v40, %v857_v25  ;;  %v952_v36 = vld [vmem:[#allocation3 + $0x1900] sm:$0xff]  ;;  %v954_v39 = vld [vmem:[#allocation3 + $0x1910] sm:$0xff] }
 0x2f7   :  { %5533 = vmatprep.subr.bf16.mxu1 %v5532_v59  ;;  %v772_v59 = vld [vmem:[#allocation3 + $0x1360] sm:$0xff]  ;;  %v5552_v61 = vpack.c.bf16 %v775_v38, %v763_v53  ;;  %v881_v53 = vld [vmem:[#allocation3 + $0x16c8] sm:$0xff]  ;;  %v966_v40 = vld [vmem:[#allocation3 + $0x1970] sm:$0xff] }
 0x2f8   :  { %v893_v38 = vld [vmem:[#allocation3 + $0x1728] sm:$0xff] }
 0x2f9   :  { %5279 = vmatpush1.bf16.msra.mxu0 %v5278_v1  ;;  %v787_v1 = vld [vmem:[#allocation3 + $0x13d8] sm:$0xff] }
 0x2fa   :  { %5535 = vmatpush1.bf16.msra.mxu1 %v5534_v2  ;;  %5281 = vmatprep.subr.bf16.mxu0 %v5280_v3  ;;  %v799_v2 = vld [vmem:[#allocation3 + $0x1438] sm:$0xff]  ;;  %v5298_v3 = vpack.c.bf16 %v772_v59, %v760_v57  ;;  %v5570_v57 = vpack.c.bf16 %v870_v52, %v858_v49  ;;  %v5316_v59 = vpack.c.bf16 %v893_v38, %v881_v53  ;;  %v976_v49 = vld [vmem:[#allocation3 + $0x19c0] sm:$0xff]  ;;  %v978_v52 = vld [vmem:[#allocation3 + $0x19d0] sm:$0xff] }
 0x2fb   :  { %5537 = vmatprep.subr.bf16.mxu1 %v5536_v7  ;;  %v796_v7 = vld [vmem:[#allocation3 + $0x1420] sm:$0xff]  ;;  %v5556_v9 = vpack.c.bf16 %v799_v2, %v787_v1  ;;  %v905_v1 = vld [vmem:[#allocation3 + $0x1788] sm:$0xff]  ;;  %v990_v38 = vld [vmem:[#allocation3 + $0x1a30] sm:$0xff] }
 0x2fc   :  { %v917_v2 = vld [vmem:[#allocation3 + $0x17e8] sm:$0xff] }
 0x2fd   :  { %5283 = vmatpush1.bf16.msra.mxu0 %v5282_v14  ;;  %v811_v14 = vld [vmem:[#allocation3 + $0x1498] sm:$0xff] }
 0x2fe   :  { %5539 = vmatpush1.bf16.msra.mxu1 %v5538_v15  ;;  %5285 = vmatprep.subr.bf16.mxu0 %v5284_v16  ;;  %v823_v15 = vld [vmem:[#allocation3 + $0x14f8] sm:$0xff]  ;;  %v5302_v16 = vpack.c.bf16 %v796_v7, %v784_v45  ;;  %v5574_v45 = vpack.c.bf16 %v894_v0, %v882_v62  ;;  %v5320_v7 = vpack.c.bf16 %v917_v2, %v905_v1  ;;  %v1012_v62 = vld [vmem:[#allocation3 + $0x1ae0] sm:$0xff]  ;;  %v1014_v1 = vld [vmem:[#allocation3 + $0x1af0] sm:$0xff] }
 0x2ff   :  { %5541 = vmatprep.subr.bf16.mxu1 %v5540_v21  ;;  %v820_v21 = vld [vmem:[#allocation3 + $0x14e0] sm:$0xff]  ;;  %v5560_v22 = vpack.c.bf16 %v823_v15, %v811_v14  ;;  %v929_v14 = vld [vmem:[#allocation3 + $0x1848] sm:$0xff] }
 0x300   :  { %v941_v15 = vld [vmem:[#allocation3 + $0x18a8] sm:$0xff] }
 0x301   :  { %5287 = vmatpush1.bf16.msra.mxu0 %v5286_v28  ;;  %v835_v28 = vld [vmem:[#allocation3 + $0x1558] sm:$0xff]  ;;  %v1025_v2 = vld [vmem:[#allocation3 + $0x1b48] sm:$0xff] }
 0x302   :  { %5543 = vmatpush1.bf16.msra.mxu1 %v5542_v29  ;;  %5289 = vmatprep.subr.bf16.mxu0 %v5288_v30  ;;  %v847_v29 = vld [vmem:[#allocation3 + $0x15b8] sm:$0xff]  ;;  %v5306_v30 = vpack.c.bf16 %v820_v21, %v808_v20  ;;  %v5578_v20 = vpack.c.bf16 %v918_v13, %v906_v10  ;;  %v5324_v21 = vpack.c.bf16 %v941_v15, %v929_v14  ;;  %v1026_v10 = vld [vmem:[#allocation3 + $0x1b50] sm:$0xff]  ;;  %v1049_v14 = vld [vmem:[#allocation3 + $0x1c08] sm:$0xff] }
 0x303   :  { %5545 = vmatprep.subr.bf16.mxu1 %v5544_v35  ;;  %v844_v35 = vld [vmem:[#allocation3 + $0x15a0] sm:$0xff]  ;;  %v5564_v37 = vpack.c.bf16 %v847_v29, %v835_v28  ;;  %v953_v28 = vld [vmem:[#allocation3 + $0x1908] sm:$0xff]  ;;  %v1038_v13 = vld [vmem:[#allocation3 + $0x1bb0] sm:$0xff] }
 0x304   :  { %v965_v29 = vld [vmem:[#allocation3 + $0x1968] sm:$0xff] }
 0x305   :  { %5291 = vmatpush1.bf16.msra.mxu0 %v5290_v41  ;;  %v859_v41 = vld [vmem:[#allocation3 + $0x1618] sm:$0xff]  ;;  %v1061_v15 = vld [vmem:[#allocation3 + $0x1c68] sm:$0xff] }
 0x306   :  { %5547 = vmatpush1.bf16.msra.mxu1 %v5546_v42  ;;  %5293 = vmatprep.subr.bf16.mxu0 %v5292_v43  ;;  %v871_v42 = vld [vmem:[#allocation3 + $0x1678] sm:$0xff]  ;;  %v5310_v43 = vpack.c.bf16 %v844_v35, %v832_v34  ;;  %v5582_v34 = vpack.c.bf16 %v942_v32, %v930_v26  ;;  %v5328_v35 = vpack.c.bf16 %v965_v29, %v953_v28  ;;  %v1050_v26 = vld [vmem:[#allocation3 + $0x1c10] sm:$0xff]  ;;  %v1073_v28 = vld [vmem:[#allocation3 + $0x1cc8] sm:$0xff] }
 0x307   :  { %5549 = vmatprep.subr.bf16.mxu1 %v5548_v48  ;;  %v868_v48 = vld [vmem:[#allocation3 + $0x1660] sm:$0xff]  ;;  %v5568_v50 = vpack.c.bf16 %v871_v42, %v859_v41  ;;  %v977_v41 = vld [vmem:[#allocation3 + $0x19c8] sm:$0xff]  ;;  %v1062_v32 = vld [vmem:[#allocation3 + $0x1c70] sm:$0xff] }
 0x308   :  { %v989_v42 = vld [vmem:[#allocation3 + $0x1a28] sm:$0xff] }
 0x309   :  { %5295 = vmatpush1.bf16.msra.mxu0 %v5294_v54  ;;  %v883_v54 = vld [vmem:[#allocation3 + $0x16d8] sm:$0xff]  ;;  %v1085_v29 = vld [vmem:[#allocation3 + $0x1d28] sm:$0xff] }
 0x30a   :  { %5551 = vmatpush1.bf16.msra.mxu1 %v5550_v55  ;;  %5297 = vmatprep.subr.bf16.mxu0 %v5296_v56  ;;  %v895_v55 = vld [vmem:[#allocation3 + $0x1738] sm:$0xff]  ;;  %v5314_v56 = vpack.c.bf16 %v868_v48, %v856_v47  ;;  %v5586_v47 = vpack.c.bf16 %v966_v40, %v954_v39  ;;  %v5332_v48 = vpack.c.bf16 %v989_v42, %v977_v41  ;;  %v1074_v39 = vld [vmem:[#allocation3 + $0x1cd0] sm:$0xff]  ;;  %v1097_v41 = vld [vmem:[#allocation3 + $0x1d88] sm:$0xff] }
 0x30b   :  { %5553 = vmatprep.subr.bf16.mxu1 %v5552_v61  ;;  %v892_v61 = vld [vmem:[#allocation3 + $0x1720] sm:$0xff]  ;;  %v5572_v63 = vpack.c.bf16 %v895_v55, %v883_v54  ;;  %v1001_v54 = vld [vmem:[#allocation3 + $0x1a88] sm:$0xff]  ;;  %v1086_v40 = vld [vmem:[#allocation3 + $0x1d30] sm:$0xff] }
 0x30c   :  { %v1013_v55 = vld [vmem:[#allocation3 + $0x1ae8] sm:$0xff] }
 0x30d   :  { %5299 = vmatpush1.bf16.msra.mxu0 %v5298_v3  ;;  %v907_v3 = vld [vmem:[#allocation3 + $0x1798] sm:$0xff]  ;;  %v1109_v42 = vld [vmem:[#allocation3 + $0x1de8] sm:$0xff] }
 0x30e   :  { %5555 = vmatpush1.bf16.msra.mxu1 %v5554_v4  ;;  %5301 = vmatprep.subr.bf16.mxu0 %v5300_v5  ;;  %v919_v4 = vld [vmem:[#allocation3 + $0x17f8] sm:$0xff]  ;;  %v5318_v5 = vpack.c.bf16 %v892_v61, %v880_v60  ;;  %v5336_v60 = vpack.c.bf16 %v1013_v55, %v1001_v54  ;;  %v1000_v61 = vld [vmem:[#allocation3 + $0x1a80] sm:$0xff]  ;;  %v1121_v54 = vld [vmem:[#allocation3 + $0x1e48] sm:$0xff] }
 0x30f   :  { %5557 = vmatprep.subr.bf16.mxu1 %v5556_v9  ;;  %v916_v9 = vld [vmem:[#allocation3 + $0x17e0] sm:$0xff]  ;;  %v5576_v12 = vpack.c.bf16 %v919_v4, %v907_v3  ;;  %v1037_v3 = vld [vmem:[#allocation3 + $0x1ba8] sm:$0xff]  ;;  %v1027_v4 = vld [vmem:[#allocation3 + $0x1b58] sm:$0xff] }
 0x310   :  { %v1133_v55 = vld [vmem:[#allocation3 + $0x1ea8] sm:$0xff] }
 0x311   :  { %5303 = vmatpush1.bf16.msra.mxu0 %v5302_v16  ;;  %v931_v16 = vld [vmem:[#allocation3 + $0x1858] sm:$0xff] }
 0x312   :  { %5559 = vmatpush1.bf16.msra.mxu1 %v5558_v17  ;;  %5305 = vmatprep.subr.bf16.mxu0 %v5304_v18  ;;  %v943_v17 = vld [vmem:[#allocation3 + $0x18b8] sm:$0xff]  ;;  %v5322_v18 = vpack.c.bf16 %v916_v9, %v904_v8  ;;  %v1024_v8 = vld [vmem:[#allocation3 + $0x1b40] sm:$0xff] }
 0x313   :  { %5561 = vmatprep.subr.bf16.mxu1 %v5560_v22  ;;  %v940_v22 = vld [vmem:[#allocation3 + $0x18a0] sm:$0xff]  ;;  %v5580_v27 = vpack.c.bf16 %v943_v17, %v931_v16  ;;  %v1051_v16 = vld [vmem:[#allocation3 + $0x1c18] sm:$0xff] }
 0x314   :  { %v1036_v9 = vld [vmem:[#allocation3 + $0x1ba0] sm:$0xff]  ;;  %v1063_v17 = vld [vmem:[#allocation3 + $0x1c78] sm:$0xff] }
 0x315   :  { %5307 = vmatpush1.bf16.msra.mxu0 %v5306_v30  ;;  %v955_v30 = vld [vmem:[#allocation3 + $0x1918] sm:$0xff] }
 0x316   :  { %5563 = vmatpush1.bf16.msra.mxu1 %v5562_v31  ;;  %5309 = vmatprep.subr.bf16.mxu0 %v5308_v33  ;;  %v967_v31 = vld [vmem:[#allocation3 + $0x1978] sm:$0xff]  ;;  %v5326_v33 = vpack.c.bf16 %v940_v22, %v928_v23  ;;  %v1048_v23 = vld [vmem:[#allocation3 + $0x1c00] sm:$0xff] }
 0x317   :  { %5565 = vmatprep.subr.bf16.mxu1 %v5564_v37  ;;  %v964_v37 = vld [vmem:[#allocation3 + $0x1960] sm:$0xff]  ;;  %v5584_v25 = vpack.c.bf16 %v967_v31, %v955_v30  ;;  %v1075_v30 = vld [vmem:[#allocation3 + $0x1cd8] sm:$0xff] }
 0x318   :  { %v1060_v22 = vld [vmem:[#allocation3 + $0x1c60] sm:$0xff]  ;;  %v1087_v31 = vld [vmem:[#allocation3 + $0x1d38] sm:$0xff] }
 0x319   :  { %5311 = vmatpush1.bf16.msra.mxu0 %v5310_v43  ;;  %v979_v43 = vld [vmem:[#allocation3 + $0x19d8] sm:$0xff] }
 0x31a   :  { %5567 = vmatpush1.bf16.msra.mxu1 %v5566_v44  ;;  %5313 = vmatprep.subr.bf16.mxu0 %v5312_v46  ;;  %v991_v44 = vld [vmem:[#allocation3 + $0x1a38] sm:$0xff]  ;;  %v5330_v46 = vpack.c.bf16 %v964_v37, %v952_v36  ;;  %v1072_v36 = vld [vmem:[#allocation3 + $0x1cc0] sm:$0xff] }
 0x31b   :  { %5569 = vmatprep.subr.bf16.mxu1 %v5568_v50  ;;  %v988_v50 = vld [vmem:[#allocation3 + $0x1a20] sm:$0xff]  ;;  %v5588_v53 = vpack.c.bf16 %v991_v44, %v979_v43  ;;  %v1099_v43 = vld [vmem:[#allocation3 + $0x1d98] sm:$0xff] }
 0x31c   :  { %v1084_v37 = vld [vmem:[#allocation3 + $0x1d20] sm:$0xff]  ;;  %v1111_v44 = vld [vmem:[#allocation3 + $0x1df8] sm:$0xff] }
 0x31d   :  { %5315 = vmatpush1.bf16.msra.mxu0 %v5314_v56  ;;  %v1003_v56 = vld [vmem:[#allocation3 + $0x1a98] sm:$0xff] }
 0x31e   :  { %5571 = vmatpush1.bf16.msra.mxu1 %v5570_v57  ;;  %5317 = vmatprep.subr.bf16.mxu0 %v5316_v59  ;;  %v1015_v57 = vld [vmem:[#allocation3 + $0x1af8] sm:$0xff]  ;;  %v5590_v59 = vpack.c.bf16 %v990_v38, %v978_v52  ;;  %v1098_v52 = vld [vmem:[#allocation3 + $0x1d90] sm:$0xff] }
 0x31f   :  { %5573 = vmatprep.subr.bf16.mxu1 %v5572_v63  ;;  %v1002_v63 = vld [vmem:[#allocation3 + $0x1a90] sm:$0xff]  ;;  %v5592_v0 = vpack.c.bf16 %v1015_v57, %v1003_v56  ;;  %v1123_v56 = vld [vmem:[#allocation3 + $0x1e58] sm:$0xff] }
 0x320   :  { %v1110_v38 = vld [vmem:[#allocation3 + $0x1df0] sm:$0xff]  ;;  %v1135_v57 = vld [vmem:[#allocation3 + $0x1eb8] sm:$0xff] }
 0x321   :  { %5319 = vmatpush1.bf16.msra.mxu0 %v5318_v5  ;;  %v1039_v5 = vld [vmem:[#allocation3 + $0x1bb8] sm:$0xff] }
 0x322   :  { %5575 = vmatpush1.bf16.msra.mxu1 %v5574_v45  ;;  %5321 = vmatprep.subr.bf16.mxu0 %v5320_v7  ;;  %v5338_v45 = vpack.c.bf16 %v1012_v62, %v1000_v61  ;;  %v5340_v7 = vpack.c.bf16 %v1037_v3, %v1025_v2  ;;  %v1120_v61 = vld [vmem:[#allocation3 + $0x1e40] sm:$0xff]  ;;  %v1145_v2 = vld [vmem:[#allocation3 + $0x1f08] sm:$0xff] }
 0x323   :  { %5577 = vmatprep.subr.bf16.mxu1 %v5576_v12  ;;  %v5596_v12 = vpack.c.bf16 %v1039_v5, %v1027_v4  ;;  %v1132_v62 = vld [vmem:[#allocation3 + $0x1ea0] sm:$0xff]  ;;  %v1157_v3 = vld [vmem:[#allocation3 + $0x1f68] sm:$0xff]  ;;  %v1147_v4 = vld [vmem:[#allocation3 + $0x1f18] sm:$0xff] }
 0x324   :  { %v1159_v5 = vld [vmem:[#allocation3 + $0x1f78] sm:$0xff] }
 0x325   :  { %5323 = vmatpush1.bf16.msra.mxu0 %v5322_v18  ;;  %v5342_v18 = vpack.c.bf16 %v1036_v9, %v1024_v8  ;;  %v1144_v8 = vld [vmem:[#allocation3 + $0x1f00] sm:$0xff] }
 0x326   :  { %5579 = vmatpush1.bf16.msra.mxu1 %v5578_v20  ;;  %5325 = vmatprep.subr.bf16.mxu0 %v5324_v21  ;;  %v5598_v20 = vpack.c.bf16 %v1038_v13, %v1026_v10  ;;  %v5344_v21 = vpack.c.bf16 %v1061_v15, %v1049_v14  ;;  %v1156_v9 = vld [vmem:[#allocation3 + $0x1f60] sm:$0xff]  ;;  %v1146_v10 = vld [vmem:[#allocation3 + $0x1f10] sm:$0xff]  ;;  %v1169_v14 = vld [vmem:[#allocation3 + $0x1fc8] sm:$0xff] }
 0x327   :  { %5581 = vmatprep.subr.bf16.mxu1 %v5580_v27  ;;  %v5600_v27 = vpack.c.bf16 %v1063_v17, %v1051_v16  ;;  %v1158_v13 = vld [vmem:[#allocation3 + $0x1f70] sm:$0xff]  ;;  %v1181_v15 = vld [vmem:[#allocation3 + $0x2028] sm:$0xff]  ;;  %v1171_v16 = vld [vmem:[#allocation3 + $0x1fd8] sm:$0xff] }
 0x328   :  { %3004 = vmatmul.mubr.f32.vlgmr.msra.gmra.mrb[4].mxu0 %v6292_v24  ;;  %v1183_v17 = vld [vmem:[#allocation3 + $0x2038] sm:$0xff] }
 0x329   :  { %5327 = vmatpush1.bf16.msra.mxu0 %v5326_v33  ;;  %3288 = vmatmul.mubr.f32.vlgmr.msra.gmra.mrb[4].mxu1 %v6292_v24  ;;  %v5334_v24 = vpack.c.bf16 %v988_v50, %v976_v49  ;;  %v5346_v33 = vpack.c.bf16 %v1060_v22, %v1048_v23  ;;  %v1096_v49 = vld [vmem:[#allocation3 + $0x1d80] sm:$0xff] }
 0x32a   :  { %5583 = vmatpush1.bf16.msra.mxu1 %v5582_v34  ;;  %5329 = vmatprep.subr.bf16.mxu0 %v5328_v35  ;;  %v5602_v34 = vpack.c.bf16 %v1062_v32, %v1050_v26  ;;  %v5348_v35 = vpack.c.bf16 %v1085_v29, %v1073_v28  ;;  %v1108_v50 = vld [vmem:[#allocation3 + $0x1de0] sm:$0xff]  ;;  %v1170_v26 = vld [vmem:[#allocation3 + $0x1fd0] sm:$0xff]  ;;  %v1193_v28 = vld [vmem:[#allocation3 + $0x2088] sm:$0xff] }
 0x32b   :  { %5585 = vmatprep.subr.bf16.mxu1 %v5584_v25  ;;  %3074 = vmatprep.mubr.f32.mxu0 %v6314_v58  ;;  %v5604_v25 = vpack.c.bf16 %v1087_v31, %v1075_v30  ;;  %v1168_v23 = vld [vmem:[#allocation3 + $0x1fc0] sm:$0xff]  ;;  %v1182_v32 = vld [vmem:[#allocation3 + $0x2030] sm:$0xff]  ;;  %v1205_v29 = vld [vmem:[#allocation3 + $0x20e8] sm:$0xff] }
 0x32c   :  { %3358 = vmatprep.mubr.f32.mxu1 %v6314_v58  ;;  %v5594_v58 = vpack.c.bf16 %v1014_v1, %v1002_v63  ;;  %v1122_v63 = vld [vmem:[#allocation3 + $0x1e50] sm:$0xff]  ;;  %v1180_v22 = vld [vmem:[#allocation3 + $0x2020] sm:$0xff]  ;;  %v1195_v30 = vld [vmem:[#allocation3 + $0x2098] sm:$0xff] }
 0x32d   :  { %5331 = vmatpush1.bf16.msra.mxu0 %v5330_v46  ;;  %v5350_v46 = vpack.c.bf16 %v1084_v37, %v1072_v36  ;;  %v1134_v1 = vld [vmem:[#allocation3 + $0x1eb0] sm:$0xff]  ;;  %v1207_v31 = vld [vmem:[#allocation3 + $0x20f8] sm:$0xff]  ;;  %v1192_v36 = vld [vmem:[#allocation3 + $0x2080] sm:$0xff] }
 0x32e   :  { %5587 = vmatpush1.bf16.msra.mxu1 %v5586_v47  ;;  %5333 = vmatprep.subr.bf16.mxu0 %v5332_v48  ;;  %v5606_v47 = vpack.c.bf16 %v1086_v40, %v1074_v39  ;;  %v5352_v48 = vpack.c.bf16 %v1109_v42, %v1097_v41  ;;  %v1204_v37 = vld [vmem:[#allocation3 + $0x20e0] sm:$0xff]  ;;  %v1194_v39 = vld [vmem:[#allocation3 + $0x2090] sm:$0xff]  ;;  %v1217_v41 = vld [vmem:[#allocation3 + $0x2148] sm:$0xff] }
 0x32f   :  { %5589 = vmatprep.subr.bf16.mxu1 %v5588_v53  ;;  %v5608_v53 = vpack.c.bf16 %v1111_v44, %v1099_v43  ;;  %v1206_v40 = vld [vmem:[#allocation3 + $0x20f0] sm:$0xff]  ;;  %v1229_v42 = vld [vmem:[#allocation3 + $0x21a8] sm:$0xff]  ;;  %v1219_v43 = vld [vmem:[#allocation3 + $0x2158] sm:$0xff] }
 0x330   :  { %v1231_v44 = vld [vmem:[#allocation3 + $0x21b8] sm:$0xff] }
 0x331   :  { %5335 = vmatpush1.bf16.msra.mxu0 %v5334_v24  ;;  %v5354_v24 = vpack.c.bf16 %v1108_v50, %v1096_v49  ;;  %v1216_v49 = vld [vmem:[#allocation3 + $0x2140] sm:$0xff] }
 0x332   :  { %5591 = vmatpush1.bf16.msra.mxu1 %v5590_v59  ;;  %5337 = vmatprep.subr.bf16.mxu0 %v5336_v60  ;;  %v5610_v59 = vpack.c.bf16 %v1110_v38, %v1098_v52  ;;  %v5356_v60 = vpack.c.bf16 %v1133_v55, %v1121_v54  ;;  %v1228_v50 = vld [vmem:[#allocation3 + $0x21a0] sm:$0xff]  ;;  %v1218_v52 = vld [vmem:[#allocation3 + $0x2150] sm:$0xff]  ;;  %v1241_v54 = vld [vmem:[#allocation3 + $0x2208] sm:$0xff] }
 0x333   :  { %5593 = vmatprep.subr.bf16.mxu1 %v5592_v0  ;;  %v5612_v0 = vpack.c.bf16 %v1135_v57, %v1123_v56  ;;  %v1230_v38 = vld [vmem:[#allocation3 + $0x21b0] sm:$0xff]  ;;  %v1253_v55 = vld [vmem:[#allocation3 + $0x2268] sm:$0xff]  ;;  %v1243_v56 = vld [vmem:[#allocation3 + $0x2218] sm:$0xff] }
 0x334   :  { %v1255_v57 = vld [vmem:[#allocation3 + $0x2278] sm:$0xff] }
 0x335   :  { %5339 = vmatpush1.bf16.msra.mxu0 %v5338_v45  ;;  %v5358_v45 = vpack.c.bf16 %v1132_v62, %v1120_v61  ;;  %v1240_v61 = vld [vmem:[#allocation3 + $0x2200] sm:$0xff] }
 0x336   :  { %5595 = vmatpush1.bf16.msra.mxu1 %v5594_v58  ;;  %5341 = vmatprep.subr.bf16.mxu0 %v5340_v7  ;;  %v5614_v58 = vpack.c.bf16 %v1134_v1, %v1122_v63  ;;  %v5360_v7 = vpack.c.bf16 %v1157_v3, %v1145_v2  ;;  %v1252_v62 = vld [vmem:[#allocation3 + $0x2260] sm:$0xff]  ;;  %v1242_v63 = vld [vmem:[#allocation3 + $0x2210] sm:$0xff]  ;;  %v1265_v2 = vld [vmem:[#allocation3 + $0x22c8] sm:$0xff] }
 0x337   :  { %5597 = vmatprep.subr.bf16.mxu1 %v5596_v12  ;;  %v5616_v12 = vpack.c.bf16 %v1159_v5, %v1147_v4  ;;  %v1254_v1 = vld [vmem:[#allocation3 + $0x2270] sm:$0xff]  ;;  %v1277_v3 = vld [vmem:[#allocation3 + $0x2328] sm:$0xff]  ;;  %v1267_v4 = vld [vmem:[#allocation3 + $0x22d8] sm:$0xff] }
 0x338   :  { %v1279_v5 = vld [vmem:[#allocation3 + $0x2338] sm:$0xff] }
 0x339   :  { %5343 = vmatpush1.bf16.msra.mxu0 %v5342_v18  ;;  %v5362_v18 = vpack.c.bf16 %v1156_v9, %v1144_v8  ;;  %v1264_v8 = vld [vmem:[#allocation3 + $0x22c0] sm:$0xff] }
 0x33a   :  { %5599 = vmatpush1.bf16.msra.mxu1 %v5598_v20  ;;  %5345 = vmatprep.subr.bf16.mxu0 %v5344_v21  ;;  %v5618_v20 = vpack.c.bf16 %v1158_v13, %v1146_v10  ;;  %v5364_v21 = vpack.c.bf16 %v1181_v15, %v1169_v14  ;;  %v1276_v9 = vld [vmem:[#allocation3 + $0x2320] sm:$0xff]  ;;  %v1266_v10 = vld [vmem:[#allocation3 + $0x22d0] sm:$0xff]  ;;  %v1289_v14 = vld [vmem:[#allocation3 + $0x2388] sm:$0xff] }
 0x33b   :  { %5601 = vmatprep.subr.bf16.mxu1 %v5600_v27  ;;  %v5620_v27 = vpack.c.bf16 %v1183_v17, %v1171_v16  ;;  %v1278_v13 = vld [vmem:[#allocation3 + $0x2330] sm:$0xff]  ;;  %v1301_v15 = vld [vmem:[#allocation3 + $0x23e8] sm:$0xff]  ;;  %v1291_v16 = vld [vmem:[#allocation3 + $0x2398] sm:$0xff] }
 0x33c   :  { %v1303_v17 = vld [vmem:[#allocation3 + $0x23f8] sm:$0xff] }
 0x33d   :  { %5347 = vmatpush1.bf16.msra.mxu0 %v5346_v33  ;;  %v5366_v33 = vpack.c.bf16 %v1180_v22, %v1168_v23  ;;  %v1288_v23 = vld [vmem:[#allocation3 + $0x2380] sm:$0xff] }
 0x33e   :  { %5603 = vmatpush1.bf16.msra.mxu1 %v5602_v34  ;;  %5349 = vmatprep.subr.bf16.mxu0 %v5348_v35  ;;  %v5622_v34 = vpack.c.bf16 %v1182_v32, %v1170_v26  ;;  %v5368_v35 = vpack.c.bf16 %v1205_v29, %v1193_v28  ;;  %v1300_v22 = vld [vmem:[#allocation3 + $0x23e0] sm:$0xff]  ;;  %v1290_v26 = vld [vmem:[#allocation3 + $0x2390] sm:$0xff]  ;;  %v1313_v28 = vld [vmem:[#allocation3 + $0x2448] sm:$0xff] }
 0x33f   :  { %5605 = vmatprep.subr.bf16.mxu1 %v5604_v25  ;;  %v5624_v25 = vpack.c.bf16 %v1207_v31, %v1195_v30  ;;  %v1302_v32 = vld [vmem:[#allocation3 + $0x23f0] sm:$0xff]  ;;  %v1325_v29 = vld [vmem:[#allocation3 + $0x24a8] sm:$0xff]  ;;  %v1315_v30 = vld [vmem:[#allocation3 + $0x2458] sm:$0xff] }
 0x340   :  { %v1327_v31 = vld [vmem:[#allocation3 + $0x24b8] sm:$0xff] }
 0x341   :  { %5351 = vmatpush1.bf16.msra.mxu0 %v5350_v46  ;;  %v5370_v46 = vpack.c.bf16 %v1204_v37, %v1192_v36  ;;  %v1312_v36 = vld [vmem:[#allocation3 + $0x2440] sm:$0xff] }
 0x342   :  { %5607 = vmatpush1.bf16.msra.mxu1 %v5606_v47  ;;  %5353 = vmatprep.subr.bf16.mxu0 %v5352_v48  ;;  %v5626_v47 = vpack.c.bf16 %v1206_v40, %v1194_v39  ;;  %v5372_v48 = vpack.c.bf16 %v1229_v42, %v1217_v41  ;;  %v1324_v37 = vld [vmem:[#allocation3 + $0x24a0] sm:$0xff]  ;;  %v1314_v39 = vld [vmem:[#allocation3 + $0x2450] sm:$0xff]  ;;  %v1337_v41 = vld [vmem:[#allocation3 + $0x2508] sm:$0xff] }
 0x343   :  { %5609 = vmatprep.subr.bf16.mxu1 %v5608_v53  ;;  %v5628_v53 = vpack.c.bf16 %v1231_v44, %v1219_v43  ;;  %v1326_v40 = vld [vmem:[#allocation3 + $0x24b0] sm:$0xff]  ;;  %v1349_v42 = vld [vmem:[#allocation3 + $0x2568] sm:$0xff]  ;;  %v1339_v43 = vld [vmem:[#allocation3 + $0x2518] sm:$0xff] }
 0x344   :  { %v1351_v44 = vld [vmem:[#allocation3 + $0x2578] sm:$0xff] }
 0x345   :  { %5355 = vmatpush1.bf16.msra.mxu0 %v5354_v24  ;;  %v5374_v24 = vpack.c.bf16 %v1228_v50, %v1216_v49  ;;  %v1336_v49 = vld [vmem:[#allocation3 + $0x2500] sm:$0xff] }
 0x346   :  { %5611 = vmatpush1.bf16.msra.mxu1 %v5610_v59  ;;  %5357 = vmatprep.subr.bf16.mxu0 %v5356_v60  ;;  %v5630_v59 = vpack.c.bf16 %v1230_v38, %v1218_v52  ;;  %v5376_v60 = vpack.c.bf16 %v1253_v55, %v1241_v54  ;;  %v1348_v50 = vld [vmem:[#allocation3 + $0x2560] sm:$0xff]  ;;  %v1338_v52 = vld [vmem:[#allocation3 + $0x2510] sm:$0xff]  ;;  %v1361_v54 = vld [vmem:[#allocation3 + $0x25c8] sm:$0xff] }
 0x347   :  { %5613 = vmatprep.subr.bf16.mxu1 %v5612_v0  ;;  %v5632_v0 = vpack.c.bf16 %v1255_v57, %v1243_v56  ;;  %v1350_v38 = vld [vmem:[#allocation3 + $0x2570] sm:$0xff]  ;;  %v1373_v55 = vld [vmem:[#allocation3 + $0x2628] sm:$0xff]  ;;  %v1363_v56 = vld [vmem:[#allocation3 + $0x25d8] sm:$0xff] }
 0x348   :  { %v1375_v57 = vld [vmem:[#allocation3 + $0x2638] sm:$0xff] }
 0x349   :  { %5359 = vmatpush1.bf16.msra.mxu0 %v5358_v45  ;;  %v5378_v45 = vpack.c.bf16 %v1252_v62, %v1240_v61  ;;  %v1360_v61 = vld [vmem:[#allocation3 + $0x25c0] sm:$0xff] }
 0x34a   :  { %5615 = vmatpush1.bf16.msra.mxu1 %v5614_v58  ;;  %5361 = vmatprep.subr.bf16.mxu0 %v5360_v7  ;;  %v5634_v58 = vpack.c.bf16 %v1254_v1, %v1242_v63  ;;  %v5380_v7 = vpack.c.bf16 %v1277_v3, %v1265_v2  ;;  %v1372_v62 = vld [vmem:[#allocation3 + $0x2620] sm:$0xff]  ;;  %v1362_v63 = vld [vmem:[#allocation3 + $0x25d0] sm:$0xff]  ;;  %v1385_v2 = vld [vmem:[#allocation3 + $0x2688] sm:$0xff] }
 0x34b   :  { %5617 = vmatprep.subr.bf16.mxu1 %v5616_v12  ;;  %v5636_v12 = vpack.c.bf16 %v1279_v5, %v1267_v4  ;;  %v1374_v1 = vld [vmem:[#allocation3 + $0x2630] sm:$0xff]  ;;  %v1397_v3 = vld [vmem:[#allocation3 + $0x26e8] sm:$0xff]  ;;  %v1387_v4 = vld [vmem:[#allocation3 + $0x2698] sm:$0xff] }
 0x34c   :  { %v1399_v5 = vld [vmem:[#allocation3 + $0x26f8] sm:$0xff] }
 0x34d   :  { %5363 = vmatpush1.bf16.msra.mxu0 %v5362_v18  ;;  %v5382_v18 = vpack.c.bf16 %v1276_v9, %v1264_v8  ;;  %v1396_v8 = vld [vmem:[#allocation3 + $0x26e0] sm:$0xff]  ;;  %v1386_v9 = vld [vmem:[#allocation3 + $0x2690] sm:$0xff] }
 0x34e   :  { %5619 = vmatpush1.bf16.msra.mxu1 %v5618_v20  ;;  %5365 = vmatprep.subr.bf16.mxu0 %v5364_v21  ;;  %v5638_v20 = vpack.c.bf16 %v1278_v13, %v1266_v10  ;;  %v5384_v21 = vpack.c.bf16 %v1301_v15, %v1289_v14  ;;  %v5656_v10 = vpack.c.bf16 %v1399_v5, %v1387_v4  ;;  %v1409_v13 = vld [vmem:[#allocation3 + $0x2748] sm:$0xff]  ;;  %v1411_v15 = vld [vmem:[#allocation3 + $0x2758] sm:$0xff] }
 0x34f   :  { %5621 = vmatprep.subr.bf16.mxu1 %v5620_v27  ;;  %v5640_v27 = vpack.c.bf16 %v1303_v17, %v1291_v16  ;;  %v1421_v14 = vld [vmem:[#allocation3 + $0x27a8] sm:$0xff]  ;;  %v1423_v16 = vld [vmem:[#allocation3 + $0x27b8] sm:$0xff] }
 0x351   :  { %5367 = vmatpush1.bf16.msra.mxu0 %v5366_v33  ;;  %v5386_v33 = vpack.c.bf16 %v1300_v22, %v1288_v23  ;;  %v1410_v23 = vld [vmem:[#allocation3 + $0x2750] sm:$0xff]  ;;  %v5660_v22 = vpack.c.bf16 %v1423_v16, %v1411_v15  ;;  %v1504_v15 = vld [vmem:[#allocation3 + $0x2a40] sm:$0xff] }
 0x352   :  { %5623 = vmatpush1.bf16.msra.mxu1 %v5622_v34  ;;  %5369 = vmatprep.subr.bf16.mxu0 %v5368_v35  ;;  %v5642_v34 = vpack.c.bf16 %v1302_v32, %v1290_v26  ;;  %v5388_v35 = vpack.c.bf16 %v1325_v29, %v1313_v28  ;;  %v1422_v26 = vld [vmem:[#allocation3 + $0x27b0] sm:$0xff]  ;;  %v1445_v32 = vld [vmem:[#allocation3 + $0x2868] sm:$0xff]  ;;  %v1435_v28 = vld [vmem:[#allocation3 + $0x2818] sm:$0xff] }
 0x353   :  { %5625 = vmatprep.subr.bf16.mxu1 %v5624_v25  ;;  %v5644_v25 = vpack.c.bf16 %v1327_v31, %v1315_v30  ;;  %v1447_v29 = vld [vmem:[#allocation3 + $0x2878] sm:$0xff]  ;;  %v5662_v31 = vpack.c.bf16 %v1422_v26, %v1410_v23  ;;  %v1516_v16 = vld [vmem:[#allocation3 + $0x2aa0] sm:$0xff] }
 0x354   :  { %v1531_v23 = vld [vmem:[#allocation3 + $0x2b18] sm:$0xff]  ;;  %v5422_v26 = vpack.c.bf16 %v1516_v16, %v1504_v15  ;;  %v1626_v15 = vld [vmem:[#allocation3 + $0x2e10] sm:$0xff] }
 0x355   :  { %5371 = vmatpush1.bf16.msra.mxu0 %v5370_v46  ;;  %v5390_v46 = vpack.c.bf16 %v1324_v37, %v1312_v36  ;;  %v1434_v36 = vld [vmem:[#allocation3 + $0x2810] sm:$0xff]  ;;  %v5664_v37 = vpack.c.bf16 %v1447_v29, %v1435_v28  ;;  %v1528_v28 = vld [vmem:[#allocation3 + $0x2b00] sm:$0xff] }
 0x356   :  { %5627 = vmatpush1.bf16.msra.mxu1 %v5626_v47  ;;  %5373 = vmatprep.subr.bf16.mxu0 %v5372_v48  ;;  %v5646_v47 = vpack.c.bf16 %v1326_v40, %v1314_v39  ;;  %v5392_v48 = vpack.c.bf16 %v1349_v42, %v1337_v41  ;;  %v1446_v39 = vld [vmem:[#allocation3 + $0x2870] sm:$0xff]  ;;  %v1469_v40 = vld [vmem:[#allocation3 + $0x2928] sm:$0xff]  ;;  %v1459_v41 = vld [vmem:[#allocation3 + $0x28d8] sm:$0xff] }
 0x357   :  { %5629 = vmatprep.subr.bf16.mxu1 %v5628_v53  ;;  %v5648_v53 = vpack.c.bf16 %v1351_v44, %v1339_v43  ;;  %v1471_v42 = vld [vmem:[#allocation3 + $0x2938] sm:$0xff]  ;;  %v5666_v44 = vpack.c.bf16 %v1446_v39, %v1434_v36  ;;  %v1540_v29 = vld [vmem:[#allocation3 + $0x2b60] sm:$0xff] }
 0x358   :  { %v1555_v36 = vld [vmem:[#allocation3 + $0x2bd8] sm:$0xff]  ;;  %v5426_v39 = vpack.c.bf16 %v1540_v29, %v1528_v28  ;;  %v1650_v28 = vld [vmem:[#allocation3 + $0x2ed0] sm:$0xff] }
 0x359   :  { %5375 = vmatpush1.bf16.msra.mxu0 %v5374_v24  ;;  %v5394_v24 = vpack.c.bf16 %v1348_v50, %v1336_v49  ;;  %v1458_v49 = vld [vmem:[#allocation3 + $0x28d0] sm:$0xff] }
 0x35a   :  { %5631 = vmatpush1.bf16.msra.mxu1 %v5630_v59  ;;  %5377 = vmatprep.subr.bf16.mxu0 %v5376_v60  ;;  %v5650_v59 = vpack.c.bf16 %v1350_v38, %v1338_v52  ;;  %v5396_v60 = vpack.c.bf16 %v1373_v55, %v1361_v54  ;;  %v5668_v52 = vpack.c.bf16 %v1471_v42, %v1459_v41  ;;  %v1481_v38 = vld [vmem:[#allocation3 + $0x2988] sm:$0xff]  ;;  %v1552_v41 = vld [vmem:[#allocation3 + $0x2bc0] sm:$0xff] }
 0x35b   :  { %5633 = vmatprep.subr.bf16.mxu1 %v5632_v0  ;;  %v5652_v0 = vpack.c.bf16 %v1375_v57, %v1363_v56  ;;  %v1493_v54 = vld [vmem:[#allocation3 + $0x29e8] sm:$0xff]  ;;  %v1483_v57 = vld [vmem:[#allocation3 + $0x2998] sm:$0xff]  ;;  %v1564_v42 = vld [vmem:[#allocation3 + $0x2c20] sm:$0xff] }
 0x35d   :  { %5379 = vmatpush1.bf16.msra.mxu0 %v5378_v45  ;;  %v5654_v45 = vpack.c.bf16 %v1374_v1, %v1362_v63  ;;  %v1480_v1 = vld [vmem:[#allocation3 + $0x2980] sm:$0xff] }
 0x35e   :  { %5635 = vmatpush1.bf16.msra.mxu1 %v5634_v58  ;;  %5381 = vmatprep.subr.bf16.mxu0 %v5380_v7  ;;  %v5400_v58 = vpack.c.bf16 %v1397_v3, %v1385_v2  ;;  %v1384_v7 = vld [vmem:[#allocation3 + $0x2680] sm:$0xff]  ;;  %v1482_v3 = vld [vmem:[#allocation3 + $0x2990] sm:$0xff] }
 0x35f   :  { %5637 = vmatprep.subr.bf16.mxu1 %v5636_v12  ;;  %v1398_v12 = vld [vmem:[#allocation3 + $0x26f0] sm:$0xff]  ;;  %v5402_v17 = vpack.c.bf16 %v1396_v8, %v1384_v7  ;;  %v1492_v2 = vld [vmem:[#allocation3 + $0x29e0] sm:$0xff]  ;;  %v1507_v8 = vld [vmem:[#allocation3 + $0x2a58] sm:$0xff] }
 0x361   :  { %5383 = vmatpush1.bf16.msra.mxu0 %v5382_v18  ;;  %v5404_v18 = vpack.c.bf16 %v1421_v14, %v1409_v13 }
 0x362   :  { %5639 = vmatpush1.bf16.msra.mxu1 %v5638_v20  ;;  %5385 = vmatprep.subr.bf16.mxu0 %v5384_v21  ;;  %v1408_v20 = vld [vmem:[#allocation3 + $0x2740] sm:$0xff] }
 0x363   :  { %5641 = vmatprep.subr.bf16.mxu1 %v5640_v27  ;;  %v1420_v21 = vld [vmem:[#allocation3 + $0x27a0] sm:$0xff]  ;;  %v1433_v27 = vld [vmem:[#allocation3 + $0x2808] sm:$0xff] }
 0x364   :  { %v5406_v30 = vpack.c.bf16 %v1420_v21, %v1408_v20  ;;  %v1529_v20 = vld [vmem:[#allocation3 + $0x2b08] sm:$0xff] }
 0x365   :  { %5387 = vmatpush1.bf16.msra.mxu0 %v5386_v33  ;;  %v5408_v33 = vpack.c.bf16 %v1445_v32, %v1433_v27  ;;  %v1541_v21 = vld [vmem:[#allocation3 + $0x2b68] sm:$0xff] }
 0x366   :  { %5643 = vmatpush1.bf16.msra.mxu1 %v5642_v34  ;;  %5389 = vmatprep.subr.bf16.mxu0 %v5388_v35  ;;  %v1432_v34 = vld [vmem:[#allocation3 + $0x2800] sm:$0xff]  ;;  %v5424_v32 = vpack.c.bf16 %v1541_v21, %v1529_v20  ;;  %v1651_v20 = vld [vmem:[#allocation3 + $0x2ed8] sm:$0xff] }
 0x367   :  { %5645 = vmatprep.subr.bf16.mxu1 %v5644_v25  ;;  %v1444_v35 = vld [vmem:[#allocation3 + $0x2860] sm:$0xff]  ;;  %v1457_v25 = vld [vmem:[#allocation3 + $0x28c8] sm:$0xff]  ;;  %v1663_v21 = vld [vmem:[#allocation3 + $0x2f38] sm:$0xff] }
 0x368   :  { %3075 = vmatmul.mubr.f32.vlgmr.msra.gmra.mrb[4].mxu0 %v6309_v51  ;;  %v5410_v43 = vpack.c.bf16 %v1444_v35, %v1432_v34  ;;  %v1553_v34 = vld [vmem:[#allocation3 + $0x2bc8] sm:$0xff]  ;;  %v5700_v29 = vpack.c.bf16 %v1663_v21, %v1651_v20  ;;  %v3552_v20 = vld [vmem:[#allocation6 + $0x140] sm:$0xff] }
 0x369   :  { %5391 = vmatpush1.bf16.msra.mxu0 %v5390_v46  ;;  %3359 = vmatmul.mubr.f32.vlgmr.msra.gmra.mrb[4].mxu1 %v6309_v51  ;;  %v5398_v51 = vpack.c.bf16 %v1372_v62, %v1360_v61  ;;  %v5412_v46 = vpack.c.bf16 %v1469_v40, %v1457_v25  ;;  %v1565_v35 = vld [vmem:[#allocation3 + $0x2c28] sm:$0xff] }
 0x36a   :  { %5647 = vmatpush1.bf16.msra.mxu1 %v5646_v47  ;;  %5393 = vmatprep.subr.bf16.mxu0 %v5392_v48  ;;  %v1456_v47 = vld [vmem:[#allocation3 + $0x28c0] sm:$0xff]  ;;  %v5428_v40 = vpack.c.bf16 %v1565_v35, %v1553_v34  ;;  %v1675_v34 = vld [vmem:[#allocation3 + $0x2f98] sm:$0xff] }
 0x36b   :  { %5649 = vmatprep.subr.bf16.mxu1 %v5648_v53  ;;  %3145 = vmatprep.mubr.f32.mxu0 %v6326_v19  ;;  %v1468_v48 = vld [vmem:[#allocation3 + $0x2920] sm:$0xff]  ;;  %v1470_v53 = vld [vmem:[#allocation3 + $0x2930] sm:$0xff]  ;;  %v1687_v35 = vld [vmem:[#allocation3 + $0x2ff8] sm:$0xff] }
 0x36c   :  { %3429 = vmatprep.mubr.f32.mxu1 %v6326_v19  ;;  %v5658_v19 = vpack.c.bf16 %v1398_v12, %v1386_v9  ;;  %v5414_v61 = vpack.c.bf16 %v1468_v48, %v1456_v47  ;;  %v5670_v63 = vpack.c.bf16 %v1470_v53, %v1458_v49  ;;  %v1519_v9 = vld [vmem:[#allocation3 + $0x2ab8] sm:$0xff]  ;;  %v1577_v47 = vld [vmem:[#allocation3 + $0x2c88] sm:$0xff] }
 0x36d   :  { %5395 = vmatpush1.bf16.msra.mxu0 %v5394_v24  ;;  %v1495_v24 = vld [vmem:[#allocation3 + $0x29f8] sm:$0xff]  ;;  %v1589_v48 = vld [vmem:[#allocation3 + $0x2ce8] sm:$0xff] }
 0x36e   :  { %5651 = vmatpush1.bf16.msra.mxu1 %v5650_v59  ;;  %5397 = vmatprep.subr.bf16.mxu0 %v5396_v60  ;;  %v5672_v5 = vpack.c.bf16 %v1495_v24, %v1483_v57  ;;  %v1579_v49 = vld [vmem:[#allocation3 + $0x2c98] sm:$0xff]  ;;  %v1590_v24 = vld [vmem:[#allocation3 + $0x2cf0] sm:$0xff] }
 0x36f   :  { %5653 = vmatprep.subr.bf16.mxu1 %v5652_v0  ;;  %v5416_v0 = vpack.c.bf16 %v1493_v54, %v1481_v38  ;;  %v5432_v38 = vpack.c.bf16 %v1589_v48, %v1577_v47  ;;  %v1576_v54 = vld [vmem:[#allocation3 + $0x2c80] sm:$0xff] }
 0x371   :  { %5399 = vmatpush1.bf16.msra.mxu0 %v5398_v51  ;;  %v1494_v51 = vld [vmem:[#allocation3 + $0x29f0] sm:$0xff] }
 0x372   :  { %5655 = vmatpush1.bf16.msra.mxu1 %v5654_v45  ;;  %5401 = vmatprep.subr.bf16.mxu0 %v5400_v58  ;;  %v1505_v45 = vld [vmem:[#allocation3 + $0x2a48] sm:$0xff]  ;;  %v5674_v13 = vpack.c.bf16 %v1494_v51, %v1482_v3  ;;  %v1612_v3 = vld [vmem:[#allocation3 + $0x2da0] sm:$0xff]  ;;  %v1614_v51 = vld [vmem:[#allocation3 + $0x2db0] sm:$0xff] }
 0x373   :  { %5657 = vmatprep.subr.bf16.mxu1 %v5656_v10  ;;  %v1517_v58 = vld [vmem:[#allocation3 + $0x2aa8] sm:$0xff]  ;;  %v5418_v10 = vpack.c.bf16 %v1492_v2, %v1480_v1  ;;  %v1600_v2 = vld [vmem:[#allocation3 + $0x2d40] sm:$0xff] }
 0x374   :  { %v5420_v14 = vpack.c.bf16 %v1517_v58, %v1505_v45  ;;  %v1625_v45 = vld [vmem:[#allocation3 + $0x2e08] sm:$0xff] }
 0x375   :  { %5403 = vmatpush1.bf16.msra.mxu0 %v5402_v17  ;;  %v1506_v17 = vld [vmem:[#allocation3 + $0x2a50] sm:$0xff]  ;;  %v1637_v58 = vld [vmem:[#allocation3 + $0x2e68] sm:$0xff] }
 0x376   :  { %5659 = vmatpush1.bf16.msra.mxu1 %v5658_v19  ;;  %5405 = vmatprep.subr.bf16.mxu0 %v5404_v18  ;;  %v5676_v19 = vpack.c.bf16 %v1519_v9, %v1507_v8  ;;  %v1518_v18 = vld [vmem:[#allocation3 + $0x2ab0] sm:$0xff]  ;;  %v1639_v8 = vld [vmem:[#allocation3 + $0x2e78] sm:$0xff]  ;;  %v5438_v9 = vpack.c.bf16 %v1612_v3, %v1600_v2  ;;  %v3532_v2 = vld [vmem:[#allocation6 + $0xa0] sm:$0xff] }
 0x377   :  { %5661 = vmatprep.subr.bf16.mxu1 %v5660_v22  ;;  %v1543_v22 = vld [vmem:[#allocation3 + $0x2b78] sm:$0xff]  ;;  %v5678_v27 = vpack.c.bf16 %v1518_v18, %v1506_v17  ;;  %v1638_v17 = vld [vmem:[#allocation3 + $0x2e70] sm:$0xff]  ;;  %v1661_v18 = vld [vmem:[#allocation3 + $0x2f28] sm:$0xff] }
 0x378   :  { %v3533_v3 = vld [vmem:[#allocation6 + $0xa8] sm:$0xff] }
 0x379   :  { %5407 = vmatpush1.bf16.msra.mxu0 %v5406_v30  ;;  %v1530_v30 = vld [vmem:[#allocation3 + $0x2b10] sm:$0xff] }
 0x37a   :  { %5663 = vmatpush1.bf16.msra.mxu1 %v5662_v31  ;;  %5409 = vmatprep.subr.bf16.mxu0 %v5408_v33  ;;  %v5680_v31 = vpack.c.bf16 %v1543_v22, %v1531_v23  ;;  %v1542_v33 = vld [vmem:[#allocation3 + $0x2b70] sm:$0xff]  ;;  %v5698_v22 = vpack.c.bf16 %v1638_v17, %v1626_v15  ;;  %v3519_v15 = vld [vmem:[#allocation6 + $0x38] sm:$0xff] }
 0x37b   :  { %v2579_v50 = vpop.f32.mrb[2].mxu0  ;;  %5665 = vmatprep.subr.bf16.mxu1 %v5664_v37  ;;  %v1567_v37 = vld [vmem:[#allocation3 + $0x2c38] sm:$0xff]  ;;  %v5682_v25 = vpack.c.bf16 %v1542_v33, %v1530_v30  ;;  %v1662_v30 = vld [vmem:[#allocation3 + $0x2f30] sm:$0xff]  ;;  %v1685_v33 = vld [vmem:[#allocation3 + $0x2fe8] sm:$0xff] }
 0x37c   :  { %v2863_v55 = vpop.f32.mrb[2].mxu1  ;;  %v2581_v56 = vpop.f32.mrb[3].mxu0 }
 0x37d   :  { %v3465_v59 = vcombine.low %v2579_v50, %v2581_v56  ;;  %v2865_v60 = vpop.f32.mrb[3].mxu1  ;;  %5411 = vmatpush1.bf16.msra.mxu0 %v5410_v43  ;;  %v1554_v43 = vld [vmem:[#allocation3 + $0x2bd0] sm:$0xff]  ;;  %v1591_v50 = vld [vmem:[#allocation3 + $0x2cf8] sm:$0xff] }
 0x37e   :  { %v3466_v62 = vcombine.low %v2863_v55, %v2865_v60  ;;  %5667 = vmatpush1.bf16.msra.mxu1 %v5666_v44  ;;  %5413 = vmatprep.subr.bf16.mxu0 %v5412_v46  ;;  %v5684_v44 = vpack.c.bf16 %v1567_v37, %v1555_v36  ;;  %v1566_v46 = vld [vmem:[#allocation3 + $0x2c30] sm:$0xff]  ;;  %v1588_v55 = vld [vmem:[#allocation3 + $0x2ce0] sm:$0xff]  ;;  %v5688_v57 = vpack.c.bf16 %v1591_v50, %v1579_v49  ;;  %v1613_v60 = vld [vmem:[#allocation3 + $0x2da8] sm:$0xff] }
 0x37f   :  { %v3473_v4 = vrot.slane %v3465_v59, %v6272_v11  ;;  %5669 = vmatprep.subr.bf16.mxu1 %v5668_v52  ;;  %v5430_v52 = vpack.c.bf16 %v1564_v42, %v1552_v41  ;;  %v5686_v53 = vpack.c.bf16 %v1566_v46, %v1554_v43  ;;  %v1578_v56 = vld [vmem:[#allocation3 + $0x2c90] sm:$0xff]  ;;  %v1601_v59 = vld [vmem:[#allocation3 + $0x2d48] sm:$0xff]  ;;  %v5702_v37 = vpack.c.bf16 %v1662_v30, %v1650_v28  ;;  %v3544_v50 = vld [vmem:[#allocation6 + $0x100] sm:$0xff] }
 0x380   :  { %v3480_v7 = vrot.slane %v3466_v62, %v6272_v11  ;;  %v1615_v62 = vld [vmem:[#allocation3 + $0x2db8] sm:$0xff]  ;;  %v5436_v1 = vpack.c.bf16 %v1613_v60, %v1601_v59  ;;  %v1674_v41 = vld [vmem:[#allocation3 + $0x2f90] sm:$0xff]  ;;  %v5704_v42 = vpack.c.bf16 %v1687_v35, %v1675_v34  ;;  %v3529_v46 = vld [vmem:[#allocation6 + $0x88] sm:$0xff] }
 0x381   :  { %5415 = vmatpush1.bf16.msra.mxu0 %v5414_v61  ;;  %v1603_v61 = vld [vmem:[#allocation3 + $0x2d58] sm:$0xff]  ;;  %v1686_v43 = vld [vmem:[#allocation3 + $0x2ff0] sm:$0xff] }
 0x382   :  { %v3481_v12 = vcombine.low %v3473_v4, %v3480_v7  ;;  %5671 = vmatpush1.bf16.msra.mxu1 %v5670_v63  ;;  %5417 = vmatprep.subr.bf16.mxu0 %v5416_v0  ;;  %v5434_v63 = vpack.c.bf16 %v1588_v55, %v1576_v54  ;;  %v5690_v0 = vpack.c.bf16 %v1590_v24, %v1578_v56  ;;  %v1602_v4 = vld [vmem:[#allocation3 + $0x2d50] sm:$0xff]  ;;  %v1627_v7 = vld [vmem:[#allocation3 + $0x2e18] sm:$0xff] }
 0x383   :  { %5673 = vmatprep.subr.bf16.mxu1 %v5672_v5  ;;  %v5692_v5 = vpack.c.bf16 %v1615_v62, %v1603_v61  ;;  %v5696_v16 = vpack.c.bf16 %v1639_v8, %v1627_v7  ;;  %v5706_v48 = vpack.c.bf16 %v1686_v43, %v1674_v41  ;;  %v3530_v54 = vld [vmem:[#allocation6 + $0x90] sm:$0xff]  ;;  %v3531_v55 = vld [vmem:[#allocation6 + $0x98] sm:$0xff]  ;;  %v6092_v61 = vmov 0.0|0.0   ;;  %v3556_v41 = vld [vmem:[#allocation6 + $0x160] sm:$0xff] }
 0x384   :  { %3503 = vst [vmem:[#allocation2 + $0x8] sm:$0xff] %v3481_v12  ;;  %v5440_v12 = vpack.c.bf16 %v1637_v58, %v1625_v45  ;;  %v5712_v24 = vpack.c.bf16 %v3531_v55, %v3530_v54  ;;  %v3514_v59 = vld [vmem:[#allocation6 + $0x10] sm:$0xff]  ;;  %v3515_v60 = vld [vmem:[#allocation6 + $0x18] sm:$0xff]  ;;  %v3516_v45 = vld [vmem:[#allocation6 + $0x20] sm:$0xff] }
 0x385   :  { %5419 = vmatpush1.bf16.msra.mxu0 %v5418_v10  ;;  %v5694_v10 = vpack.c.bf16 %v1614_v51, %v1602_v4  ;;  %v3546_v62 = vld [vmem:[#allocation6 + $0x110] sm:$0xff]  ;;  %v3548_v4 = vld [vmem:[#allocation6 + $0x120] sm:$0xff]  ;;  %v3549_v51 = vld [vmem:[#allocation6 + $0x128] sm:$0xff] }
 0x386   :  { %5675 = vmatpush1.bf16.msra.mxu1 %v5674_v13  ;;  %5421 = vmatprep.subr.bf16.mxu0 %v5420_v14  ;;  %v1624_v13 = vld [vmem:[#allocation3 + $0x2e00] sm:$0xff]  ;;  %v3517_v58 = vld [vmem:[#allocation6 + $0x28] sm:$0xff]  ;;  %v5747_v7 = vpack.c.bf16 %v3549_v51, %v3548_v4  ;;  %v3534_v8 = vld [vmem:[#allocation6 + $0xb0] sm:$0xff] }
 0x387   :  { %5677 = vmatprep.subr.bf16.mxu1 %v5676_v19  ;;  %v1636_v14 = vld [vmem:[#allocation3 + $0x2e60] sm:$0xff]  ;;  %v1649_v19 = vld [vmem:[#allocation3 + $0x2ec8] sm:$0xff]  ;;  %v3538_v28 = vld [vmem:[#allocation6 + $0xd0] sm:$0xff] }
 0x388   :  { %v5442_v23 = vpack.c.bf16 %v1636_v14, %v1624_v13  ;;  %v3551_v13 = vld [vmem:[#allocation6 + $0x138] sm:$0xff]  ;;  %v3518_v14 = vld [vmem:[#allocation6 + $0x30] sm:$0xff]  ;;  %v3557_v43 = vld [vmem:[#allocation6 + $0x168] sm:$0xff] }
 0x389   :  { %5423 = vmatpush1.bf16.msra.mxu0 %v5422_v26  ;;  %v5444_v26 = vpack.c.bf16 %v1661_v18, %v1649_v19  ;;  %v5722_v17 = vpack.c.bf16 %v3519_v15, %v3518_v14  ;;  %v3536_v19 = vld [vmem:[#allocation6 + $0xc0] sm:$0xff]  ;;  %v3537_v18 = vld [vmem:[#allocation6 + $0xc8] sm:$0xff]  ;;  %v3554_v30 = vld [vmem:[#allocation6 + $0x150] sm:$0xff] }
 0x38a   :  { %5679 = vmatpush1.bf16.msra.mxu1 %v5678_v27  ;;  %5425 = vmatprep.subr.bf16.mxu0 %v5424_v32  ;;  %v1648_v27 = vld [vmem:[#allocation3 + $0x2ec0] sm:$0xff]  ;;  %v5724_v21 = vpack.c.bf16 %v3537_v18, %v3536_v19  ;;  %v3522_v34 = vld [vmem:[#allocation6 + $0x50] sm:$0xff]  ;;  %v3523_v35 = vld [vmem:[#allocation6 + $0x58] sm:$0xff] }
 0x38b   :  { %5681 = vmatprep.subr.bf16.mxu1 %v5680_v31  ;;  %v1660_v32 = vld [vmem:[#allocation3 + $0x2f20] sm:$0xff]  ;;  %v1673_v31 = vld [vmem:[#allocation3 + $0x2f88] sm:$0xff]  ;;  %v3526_v54 = vld [vmem:[#allocation6 + $0x70] sm:$0xff] }
 0x38c   :  { %v5446_v36 = vpack.c.bf16 %v1660_v32, %v1648_v27  ;;  %v3527_v55 = vld [vmem:[#allocation6 + $0x78] sm:$0xff]  ;;  %v3506_v4 = vld [vmem:[#allocation2 + $0x6] sm:$0x3f] }
 0x38d   :  { %5427 = vmatpush1.bf16.msra.mxu0 %v5426_v39  ;;  %v5448_v39 = vpack.c.bf16 %v1685_v33, %v1673_v31  ;;  %v3555_v33 = vld [vmem:[#allocation6 + $0x158] sm:$0xff]  ;;  %v3732_v18 = vld [vmem:[#allocation9 + $0x28] sm:$0xff] }
 0x38e   :  { %5683 = vmatpush1.bf16.msra.mxu1 %v5682_v25  ;;  %5429 = vmatprep.subr.bf16.mxu0 %v5428_v40  ;;  %v1672_v25 = vld [vmem:[#allocation3 + $0x2f80] sm:$0xff] }
 0x38f   :  { %5685 = vmatprep.subr.bf16.mxu1 %v5684_v44  ;;  %v1684_v40 = vld [vmem:[#allocation3 + $0x2fe0] sm:$0xff] }
 0x390   :  { %v3528_v44 = vld [vmem:[#allocation6 + $0x80] sm:$0xff]  ;;  %v5450_v47 = vpack.c.bf16 %v1684_v40, %v1672_v25  ;;  %v3541_v40 = vld [vmem:[#allocation6 + $0xe8] sm:$0xff] }
 0x391   :  { %5431 = vmatpush1.bf16.msra.mxu0 %v5430_v52  ;;  %v5708_v49 = vpack.c.bf16 %v3529_v46, %v3528_v44  ;;  %v3512_v52 = vld [vmem:[#allocation6] sm:$0xff]  ;;  %v3525_v46 = vld [vmem:[#allocation6 + $0x68] sm:$0xff] }
 0x392   :  { %5687 = vmatpush1.bf16.msra.mxu1 %v5686_v53  ;;  %5433 = vmatprep.subr.bf16.mxu0 %v5432_v38  ;;  %v3513_v53 = vld [vmem:[#allocation6 + $0x8] sm:$0xff]  ;;  %v3540_v25 = vld [vmem:[#allocation6 + $0xe0] sm:$0xff] }
 0x393   :  { %5689 = vmatprep.subr.bf16.mxu1 %v5688_v57  ;;  %v3545_v38 = vld [vmem:[#allocation6 + $0x108] sm:$0xff]  ;;  %v5710_v56 = vpack.c.bf16 %v3513_v53, %v3512_v52  ;;  %v3524_v44 = vld [vmem:[#allocation6 + $0x60] sm:$0xff]  ;;  %v3558_v52 = vld [vmem:[#allocation6 + $0x170] sm:$0xff] }
 0x394   :  { %v5741_v57 = vpack.c.bf16 %v3545_v38, %v3544_v50  ;;  %v5734_v50 = vpack.c.bf16 %v3525_v46, %v3524_v44  ;;  %v3559_v38 = vld [vmem:[#allocation6 + $0x178] sm:$0xff]  ;;  %v4015_v44 = vld [vmem:[#allocation11] ss:$0 sm:$0xff] }
 0x395   :  { %5435 = vmatpush1.bf16.msra.mxu0 %v5434_v63  ;;  %v3547_v63 = vld [vmem:[#allocation6 + $0x118] sm:$0xff] }
 0x396   :  { %5691 = vmatpush1.bf16.msra.mxu1 %v5690_v0  ;;  %5437 = vmatprep.subr.bf16.mxu0 %v5436_v1  ;;  %v5714_v0 = vpack.c.bf16 %v3515_v60, %v3514_v59  ;;  %v5744_v1 = vpack.c.bf16 %v3547_v63, %v3546_v62  ;;  %v3909_v46 = vld [vmem:[#allocation15] sm:$0xff] }
 0x397   :  { %5693 = vmatprep.subr.bf16.mxu1 %v5692_v5  ;;  %v5716_v5 = vpack.c.bf16 %v3533_v3, %v3532_v2 }
 0x399   :  { %5439 = vmatpush1.bf16.msra.mxu0 %v5438_v9  ;;  %v3535_v9 = vld [vmem:[#allocation6 + $0xb8] sm:$0xff] }
 0x39a   :  { %5695 = vmatpush1.bf16.msra.mxu1 %v5694_v10  ;;  %5441 = vmatprep.subr.bf16.mxu0 %v5440_v12  ;;  %v3550_v10 = vld [vmem:[#allocation6 + $0x130] sm:$0xff]  ;;  %v5720_v12 = vpack.c.bf16 %v3535_v9, %v3534_v8  ;;  %v3727_v8 = vld [vmem:[#allocation9] sm:$0xff] }
 0x39b   :  { %5697 = vmatprep.subr.bf16.mxu1 %v5696_v16  ;;  %v5750_v16 = vpack.c.bf16 %v3551_v13, %v3550_v10  ;;  %v3728_v9 = vld [vmem:[#allocation9 + $0x8] sm:$0xff] }
 0x39c   :  { %v5765_v15 = vpack.c.bf16 %v3728_v9, %v3727_v8 }
 0x39d   :  { %5443 = vmatpush1.bf16.msra.mxu0 %v5442_v23  ;;  %v3553_v23 = vld [vmem:[#allocation6 + $0x148] sm:$0xff] }
 0x39e   :  { %5699 = vmatpush1.bf16.msra.mxu1 %v5698_v22  ;;  %5445 = vmatprep.subr.bf16.mxu0 %v5444_v26  ;;  %v3520_v22 = vld [vmem:[#allocation6 + $0x40] sm:$0xff]  ;;  %v3521_v26 = vld [vmem:[#allocation6 + $0x48] sm:$0xff]  ;;  %v5753_v27 = vpack.c.bf16 %v3553_v23, %v3552_v20 }
 0x39f   :  { %5701 = vmatprep.subr.bf16.mxu1 %v5700_v29  ;;  %v5726_v32 = vpack.c.bf16 %v3521_v26, %v3520_v22  ;;  %v3539_v29 = vld [vmem:[#allocation6 + $0xd8] sm:$0xff]  ;;  %v3817_v26 = vld [vmem:[#allocation12] sm:$0xff] }
 0x3a0   :  { %v5728_v31 = vpack.c.bf16 %v3539_v29, %v3538_v28  ;;  %v3734_v23 = vld [vmem:[#allocation9 + $0x38] sm:$0xff] }
 0x3a1   :  { %5447 = vmatpush1.bf16.msra.mxu0 %v5446_v36  ;;  %v6094_v36 = vmov 0.0   ;;  %v3820_v29 = vld [vmem:[#allocation12 + $0x18] sm:$0xff] }
 0x3a2   :  { %5703 = vmatpush1.bf16.msra.mxu1 %v5702_v37  ;;  %5449 = vmatprep.subr.bf16.mxu0 %v5448_v39  ;;  %v5756_v37 = vpack.c.bf16 %v3555_v33, %v3554_v30  ;;  %v5730_v39 = vpack.c.bf16 %v3523_v35, %v3522_v34  ;;  %v4014_v35 = vld [vmem:[#allocation8] ss:$0 sm:$0xff] }
 0x3a3   :  { %5705 = vmatprep.subr.bf16.mxu1 %v5704_v42  ;;  %v5732_v42 = vpack.c.bf16 %v3541_v40, %v3540_v25 }
 0x3a5   :  { %5451 = vmatpush1.bf16.msra.mxu0 %v5450_v47  ;;  %v3542_v47 = vld [vmem:[#allocation6 + $0xf0] sm:$0xff] }
 0x3a6   :  { %5707 = vmatpush1.bf16.msra.mxu1 %v5706_v48  ;;  %5709 = vmatprep.subr.bf16.mxu0 %v5708_v49  ;;  %v3543_v48 = vld [vmem:[#allocation6 + $0xf8] sm:$0xff]  ;;  %v5759_v49 = vpack.c.bf16 %v3557_v43, %v3556_v41  ;;  %v3821_v41 = vld [vmem:[#allocation12 + $0x20] sm:$0xff] }
 0x3a7   :  { %5740 = vmatprep.subr.bf16.mxu1 %v6092_v61  ;;  %v5736_v53 = vpack.c.bf16 %v3543_v48, %v3542_v47  ;;  %v3910_v47 = vld [vmem:[#allocation15 + $0x8] sm:$0xff] }
 0x3a8   :  { %3146 = vmatmul.mubr.f32.vlgmr.msra.gmra.mrb[4].mxu0 %v6322_v6 }
 0x3a9   :  { %3430 = vmatmul.mubr.f32.vlgmr.msra.gmra.mrb[4].mxu1 %v6322_v6  ;;  %5711 = vmatpush3.bf16.msra.mxu0 %v5710_v56  ;;  %v5718_v6 = vpack.c.bf16 %v3517_v58, %v3516_v45  ;;  %v5762_v56 = vpack.c.bf16 %v3559_v38, %v3558_v52  ;;  %v5787_v52 = vpack.c.bf16 %v3910_v47, %v3909_v46  ;;  %v3911_v38 = vld [vmem:[#allocation15 + $0x10] sm:$0xff] }
 0x3aa   :  { %5742 = vmatpush3.bf16.msra.mxu1 %v5741_v57  ;;  %5713 = vmatprep.subr.bf16.mxu0 %v5712_v24  ;;  %v5738_v57 = vpack.c.bf16 %v3527_v55, %v3526_v54  ;;  %v4017_v54 = vld [vmem:[#allocation14] ss:$0 sm:$0xff] }
 0x3ab   :  { %5743 = vmatprep.subr.bf16.mxu1 %v6092_v61  ;;  %4126 = vmatprep.mubr.msk.f32.mxu1 %vm6093_vm0, %v6094_v36 }
 0x3ad   :  { %5715 = vmatpush3.bf16.msra.mxu0 %v5714_v0 }
 0x3ae   :  { %5745 = vmatpush3.bf16.msra.mxu1 %v5744_v1  ;;  %5717 = vmatprep.subr.bf16.mxu0 %v5716_v5  ;;  %v3505_v5 = vld [vmem:[#allocation2] sm:$0x3f] }
 0x3af   :  { %5746 = vmatprep.subr.bf16.mxu1 %v6092_v61  ;;  %v3507_v51 = vmax.f32 %v3505_v5, %v3506_v4 }
 0x3b1   :  { %5719 = vmatpush3.bf16.msra.mxu0 %v5718_v6 }
 0x3b2   :  { %5748 = vmatpush3.bf16.msra.mxu1 %v5747_v7  ;;  %5721 = vmatprep.subr.bf16.mxu0 %v5720_v12 }
 0x3b3   :  { %5749 = vmatprep.subr.bf16.mxu1 %v6092_v61 }
 0x3b5   :  { %5723 = vmatpush3.bf16.msra.mxu0 %v5722_v17  ;;  %v3730_v17 = vld [vmem:[#allocation9 + $0x18] sm:$0xff] }
 0x3b6   :  { %5751 = vmatpush3.bf16.msra.mxu1 %v5750_v16  ;;  %5725 = vmatprep.subr.bf16.mxu0 %v5724_v21  ;;  %v3729_v16 = vld [vmem:[#allocation9 + $0x10] sm:$0xff] }
 0x3b7   :  { %5752 = vmatprep.subr.bf16.mxu1 %v6092_v61  ;;  %v5768_v19 = vpack.c.bf16 %v3730_v17, %v3729_v16  ;;  %v3733_v21 = vld [vmem:[#allocation9 + $0x30] sm:$0xff] }
 0x3b8   :  { %v5774_v22 = vpack.c.bf16 %v3734_v23, %v3733_v21 }
 0x3b9   :  { %5727 = vmatpush3.bf16.msra.mxu0 %v5726_v32  ;;  %v3819_v32 = vld [vmem:[#allocation12 + $0x10] sm:$0xff] }
 0x3ba   :  { %5754 = vmatpush3.bf16.msra.mxu1 %v5753_v27  ;;  %5729 = vmatprep.subr.bf16.mxu0 %v5728_v31  ;;  %v3818_v27 = vld [vmem:[#allocation12 + $0x8] sm:$0xff]  ;;  %v5780_v30 = vpack.c.bf16 %v3820_v29, %v3819_v32 }
 0x3bb   :  { %5755 = vmatprep.subr.bf16.mxu1 %v6092_v61  ;;  %v5777_v28 = vpack.c.bf16 %v3818_v27, %v3817_v26 }
 0x3bd   :  { %5731 = vmatpush3.bf16.msra.mxu0 %v5730_v39 }
 0x3be   :  { %5757 = vmatpush3.bf16.msra.mxu1 %v5756_v37  ;;  %5733 = vmatprep.subr.bf16.mxu0 %v5732_v42  ;;  %v3822_v42 = vld [vmem:[#allocation12 + $0x28] sm:$0xf] }
 0x3bf   :  { %5758 = vmatprep.subr.bf16.mxu1 %v6092_v61  ;;  %v5783_v43 = vpack.c.bf16 %v3822_v42, %v3821_v41 }
 0x3c1   :  { %5735 = vmatpush3.bf16.msra.mxu0 %v5734_v50 }
 0x3c2   :  { %5760 = vmatpush3.bf16.msra.mxu1 %v5759_v49  ;;  %5737 = vmatprep.subr.bf16.mxu0 %v5736_v53 }
 0x3c3   :  { %5761 = vmatprep.subr.bf16.mxu1 %v6092_v61 }
 0x3c5   :  { %5739 = vmatpush3.bf16.msra.mxu0 %v5738_v57 }
 0x3c6   :  { %5763 = vmatpush3.bf16.msra.mxu1 %v5762_v56  ;;  %5764 = vmatprep.subr.bf16.mxu0 %v6092_v61 }
 0x3c7   :  { %5776 = vmatprep.subr.bf16.mxu1 %v6092_v61 }
 0x47b   :  { %v3147_v24 = vpop.f32.mrb[4].mxu0 }
 0x47c   :  { %v3431_v59 = vpop.f32.mrb[4].mxu1  ;;  %v3149_v60 = vpop.f32.mrb[5].mxu0 }
 0x47d   :  { %v3482_v62 = vcombine.low %v3147_v24, %v3149_v60  ;;  %v3433_v63 = vpop.f32.mrb[5].mxu1  ;;  %v4020_v24 = vld [vmem:[#allocation17] ss:$0 sm:$0xff] }
 0x47e   :  { %v3483_v0 = vcombine.low %v3431_v59, %v3433_v63 }
 0x47f   :  { %v3490_v1 = vrot.slane %v3482_v62, %v6272_v11 }
 0x480   :  { %v3497_v2 = vrot.slane %v3483_v0, %v6272_v11 }
 0x482   :  { %v3498_v3 = vcombine.low %v3490_v1, %v3497_v2 }
 0x484   :  { %3504 = vst [vmem:[#allocation2 + $0x10] sm:$0xff] %v3498_v3 }
 0x48b   :  { %v3508_v45 = vld [vmem:[#allocation2 + $0xc] sm:$0x3f]  ;;  %v3510_v7 = vld [vmem:[#allocation2 + $0x12] sm:$0x3f] }
 0x48c   :  { %v3509_v58 = vmax.f32 %v3507_v51, %v3508_v45 }
 0x48e   :  { %v3511_v6 = vmax.f32 %v3509_v58, %v3510_v7 }
 0x490   :  { %v3575_v10 = vrot.slane %v3511_v6, %v6272_v11  ;;  %v3568_v12 = vcombine.high %v3511_v6, %v3511_v6 }
 0x492   :  { %v3583_v13 = vcombine.high %v3575_v10, %v3575_v10  ;;  %v3582_v14 = vrot.slane %v3568_v12, %v6272_v11  ;;  %v3731_v11 = vld [vmem:[#allocation9 + $0x20] sm:$0xff] }
 0x493   :  { %v5771_v20 = vpack.c.bf16 %v3732_v18, %v3731_v11 }
 0x494   :  { %3651 = vmatprep.mubr.f32.mxu0 %v3583_v13  ;;  %4127 = vmatmul.mubr.f32.vlgmr.msra.gmra.mrb[6].mxu1 %v3582_v14 }
 0x495   :  { %3652 = vmatmul.mubr.f32.vlgmr.msra.gmra.mrb[6].mxu0 %v3575_v10  ;;  %4160 = vmatprep.mubr.msk.f32.mxu1 %vm6093_vm0, %v6094_v36 }
 0x496   :  { %5766 = vmatpush3.bf16.msra.mxu0 %v5765_v15  ;;  %4145 = vmatprep.mubr.msk.f32.mxu0 %vm6093_vm0, %v6094_v36 }
 0x497   :  { %5767 = vmatprep.subr.bf16.mxu0 %v6092_v61  ;;  %5778 = vmatpush3.bf16.msra.mxu1 %v5777_v28 }
 0x498   :  { %5779 = vmatprep.subr.bf16.mxu1 %v6092_v61 }
 0x49a   :  { %5769 = vmatpush3.bf16.msra.mxu0 %v5768_v19 }
 0x49b   :  { %5770 = vmatprep.subr.bf16.mxu0 %v6092_v61  ;;  %5781 = vmatpush3.bf16.msra.mxu1 %v5780_v30 }
 0x49c   :  { %5782 = vmatprep.subr.bf16.mxu1 %v6092_v61 }
 0x49e   :  { %5772 = vmatpush3.bf16.msra.mxu0 %v5771_v20 }
 0x49f   :  { %5773 = vmatprep.subr.bf16.mxu0 %v6092_v61  ;;  %5785 = vmatpush3.bf16.msk.msra.mxu1 %vm5784_vm4, %v5783_v43 }
 0x4a0   :  { %5786 = vmatprep.subr.bf16.mxu1 %v6092_v61 }
 0x4a2   :  { %5775 = vmatpush3.bf16.msra.mxu0 %v5774_v22 }
 0x567   :  { %v3723_v31 = vpop.f32.mrb[6].mxu1 }
 0x568   :  { %v4054_v33 = vpop.f32.mrb[6].mxu0  ;;  %v4128_v34 = vpop.f32.mrb[7].mxu1 }
 0x569   :  { %v4055_v37 = vpop.f32.mrb[7].mxu0 }
 0x56a   :  { %v4056_v39 = vadd.f32 %v4055_v37, %v4054_v33 }
 0x56c   :  { %v3654_v25 = vadd.f32 %v4056_v39, %v4014_v35 }
 0x56e   :  { %v3724_v40 = vadd.f32 %v3723_v31, %v3654_v25 }
 0x570   :  { %4146 = vmatmul.mubr.msk.f32.vlgmr.msra.gmra.mrb[8].mxu0 %vm3742_vm1, %v3724_v40 }
 0x643   :  { %v3812_v48 = vpop.f32.mrb[8].mxu0 }
 0x644   :  { %v3813_v49 = vadd.f32 %v4015_v44, %v3812_v48  ;;  %v4147_v50 = vpop.f32.mrb[9].mxu0 }
 0x646   :  { %v3816_v53 = vmax.f32 %v3813_v49, 0.0 }
 0x648   :  { %4161 = vmatmul.mubr.msk.f32.vlgmr.msra.gmra.mrb[8].mxu1 %vm3830_vm5, %v3816_v53 }
 0x649   :  { %5788 = vmatpush3.bf16.msra.mxu1 %v5787_v52  ;;  %4169 = vmatprep.mubr.msk.f32.mxu1 %vm6093_vm0, %v6094_v36 }
 0x64a   :  { %4167 = vmatprep.subr.mxu1 %v6094_v36 }
 0x64d   :  { %4168 = vmatpush3.msra.mxu1 %v3911_v38 }
 0x71b   :  { %v3904_v61 = vpop.f32.mrb[8].mxu1 }
 0x71c   :  { %v3905_v55 = vadd.f32 %v4017_v54, %v3904_v61  ;;  %v4162_v56 = vpop.f32.mrb[9].mxu1 }
 0x71e   :  { %v3908_v57 = vmax.f32 %v3905_v55, 0.0 }
 0x720   :  { %4170 = vmatmul.mubr.msk.f32.vlgmr.msra.gmra.mrb[10].mxu1 %vm3919_vm6, %v3908_v57 }
 0x7f3   :  { %v3989_v59 = vpop.f32.mrb[10].mxu1 }
 0x7f4   :  { %v3990_v60 = vadd.f32 %v4020_v24, %v3989_v59  ;;  %v4171_v62 = vpop.f32.mrb[11].mxu1 }
 0x7f6   :  { %3994 = vst.msk [vmem:[#allocation18] sm:$0x3] %vm3993_vm7, %v3990_v60 }
 0x7f7   :  { %6055 = shalt.err (!%p6052_p6)
}
 0x7f8   :  { %s6056_s20 = scalar_lea.hbm %s6421_s10, 32 }
 0x7f9   :  { %p6057_p7 = scmp.ne.s32.totalorder %s6421_s10, %s6056_s20  ;;  %p6060_p8 = scmp.lt.u32.totalorder %s6056_s20, %s6421_s10 }
 0x7fb   :  { %p6062_p9 = pnand %p6060_p8, %p6057_p7 }
 0x7fd   :  { %6065 = shalt.err (!%p6062_p9)
}
 0x7fe   :  { %4004 = dma.vmem_to_hbm [thread:$0]  %s4002_s17, 32, %s6421_s10, [#allocation5]  }
 0x7ff   :  { %6076 = dma.done.wait [#allocation5], 32  }
 0x800   :  { %6077 = vsyncadd [#allocation5], 4294967264 }
 0x801   :  { %4008 = vsyncpa [#allocation4], 1 }
 0x802   :  { %4009 = vsyncpa [#allocation7], 1 }
 0x803   :  { %4010 = vsyncpa [#allocation10], 1 }
 0x804   :  { %4011 = vsyncpa [#allocation13], 1 }
 0x805   :  { %4012 = vsyncpa [#allocation16], 1 }
 0x806   :  { %4013 = vsyncpa [#allocation5], 1 }

</bundles_post_ra>
